<compile_context>
chip_gen: v5e
topology: v5e:2x2
jax: 0.10.0
libtpu: 0.0.40
codegen_flags: <defaults>
</compile_context>

<pallas_src>
import numpy as np
import jax
import jax.numpy as jnp
from jax import lax
from jax.experimental import pallas as pl
from jax.experimental.pallas import tpu as pltpu

# -----------------------------------------------------------------------------
# Synthetic module configuration (mirrors the torch __init__ bookkeeping).
# -----------------------------------------------------------------------------
N_ATOMS = 8
Z_MATRIX = np.array([[5, 3, 4, 0],
                     [6, 4, 3, 1],
                     [7, 3, 0, 4]], dtype=np.int32)          # (atom, bond, angle, torsion)
CARTESIAN_ATOM_INDICES = np.array([0, 1, 2, 3, 4], dtype=np.int32)
REFERENCE_ATOM_INDICES = np.array([0, 1, 2], dtype=np.int32)  # origin, axis, plane
REMOVE_REF_ROTOTRANSLATION = (True, True, True)
# TODO(synk): only remove_ref_rototranslation=(True, True, True) is implemented here.

# Constructor logic: drop reference atoms from the cartesian list, re-append at the end.
_cart = [i for i in CARTESIAN_ATOM_INDICES.tolist()
         if i not in set(REFERENCE_ATOM_INDICES.tolist())]
FIXED_ATOMS = tuple(_cart + REFERENCE_ATOM_INDICES.tolist())   # (3, 4, 0, 1, 2)

N_IC = int(Z_MATRIX.shape[0])
N_CART = len(FIXED_ATOMS)
N_CART_MAPPED = N_CART - 3
N_DOFS_OUT = 3 * N_IC + 3 + 3 * N_CART_MAPPED                  # == 3*N_ATOMS - 6 == 18

# Column (within FIXED_ATOMS) of each Z-matrix reference atom, used by the inverse pass.
_pos_in_fixed = {int(a): k for k, a in enumerate(FIXED_ATOMS)}
B_COLS = tuple(_pos_in_fixed[int(a)] for a in Z_MATRIX[:, 1])
C_COLS = tuple(_pos_in_fixed[int(a)] for a in Z_MATRIX[:, 2])
D_COLS = tuple(_pos_in_fixed[int(a)] for a in Z_MATRIX[:, 3])

PI = float(np.pi)
TWO_PI = 2.0 * PI
LOG_PI = float(np.log(np.pi))
LOG_2PI = float(np.log(2.0 * np.pi))
EPS = 1e-7

BATCH_BLOCK = 8            # sublane-aligned batch tile
PACK_WIDTH = 128           # lane-dense packed output slab
X_WIDTH = 3 * N_ATOMS      # 24 flattened Cartesian DOFs
LD_COL = X_WIDTH           # packed column holding log|det J|


# -----------------------------------------------------------------------------
# Fused kernel: cartesian -> mixed -> affine flow -> mixed -> cartesian.
# -----------------------------------------------------------------------------
def _fused_kernel(x_ref, ls_ref, sh_ref, out_ref):
    blk = x_ref.shape[0]
    x = x_ref[...]                                   # (blk, 3*N_ATOMS)

    # --- small vec3 helpers on (blk, 1) column vectors ------------------------
    def dot3(a, b):
        return a[0] * b[0] + a[1] * b[1] + a[2] * b[2]

    def sub3(a, b):
        return (a[0] - b[0], a[1] - b[1], a[2] - b[2])

    def cross3(a, b):
        return (a[1] * b[2] - a[2] * b[1],
                a[2] * b[0] - a[0] * b[2],
                a[0] * b[1] - a[1] * b[0])

    def scale3(a, s):
        return (a[0] * s, a[1] * s, a[2] * s)

    def axpy3(a, s, b):                              # a + s * b
        return (a[0] + s * b[0], a[1] + s * b[1], a[2] + s * b[2])

    # --- in-kernel static gather: one xyz column-triple per atom --------------
    pos = []
    for a in range(N_ATOMS):
        pos.append((x[:, 3 * a + 0:3 * a + 1],
                    x[:, 3 * a + 1:3 * a + 2],
                    x[:, 3 * a + 2:3 * a + 3]))

    # =========================== cartesian -> mixed ===========================
    bonds, angles, torsions = [], [], []
    ld_prod = None                                   # fused forward log-det product
    for i in range(N_IC):
        ai, bi, ci, di = (int(Z_MATRIX[i, 0]), int(Z_MATRIX[i, 1]),
                          int(Z_MATRIX[i, 2]), int(Z_MATRIX[i, 3]))
        pa, pb, pc, pd = pos[ai], pos[bi], pos[ci], pos[di]
        r12 = sub3(pa, pb)
        r32 = sub3(pc, pb)
        d2 = dot3(r12, r12)
        n32sq = dot3(r32, r32)
        inv_b = lax.rsqrt(jnp.maximum(d2, EPS))
        inv_n32 = lax.rsqrt(jnp.maximum(n32sq, EPS))
        bond = d2 * inv_b                            # |a - b|
        cos_a = dot3(r12, r32) * (inv_b * inv_n32)
        cos_a = jnp.clip(cos_a, -1.0 + EPS, 1.0 - EPS)
        sin_a = jnp.sqrt(1.0 - cos_a * cos_a)
        angle = jnp.arctan2(sin_a, cos_a) * (1.0 / PI)        # normalize_angles
        # torsion (dihedral a-b-c-d)
        b1 = scale3(r32, inv_n32)
        b2 = sub3(pd, pc)
        v = axpy3(r12, -dot3(r12, b1), b1)
        w = axpy3(b2, -dot3(b2, b1), b1)
        tx = dot3(v, w)
        ty = dot3(cross3(b1, v), w)
        tors = (jnp.arctan2(ty, tx) + PI) * (1.0 / TWO_PI)    # normalize_torsions
        bonds.append(bond)
        angles.append(angle)
        torsions.append(tors)
        term = jnp.maximum(d2, EPS) * jnp.maximum(sin_a, EPS)  # bond^2 * sin(angle)
        ld_prod = term if ld_prod is None else ld_prod * term

    # relative frame of reference from origin / axis / plane atoms
    origin = pos[FIXED_ATOMS[-3]]
    av = sub3(pos[FIXED_ATOMS[-2]], origin)
    pv = sub3(pos[FIXED_ATOMS[-1]], origin)
    n1sq = dot3(av, av)
    inv_n1 = lax.rsqrt(jnp.maximum(n1sq, EPS))
    e1 = scale3(av, inv_n1)
    pdot = dot3(pv, e1)
    t2 = axpy3(pv, -pdot, e1)
    t2sq = dot3(t2, t2)
    inv_n2 = lax.rsqrt(jnp.maximum(t2sq, EPS))
    e2 = scale3(t2, inv_n2)
    e3 = cross3(e1, e2)

    d01 = n1sq * inv_n1                              # e1 . (axis - origin) == |av|
    qx = pdot                                        # e1 . (plane - origin)
    qy = t2sq * inv_n2                               # e2 . (plane - origin) == |t2|
    d02 = jnp.sqrt(jnp.maximum(qx * qx + qy * qy, EPS))
    a102 = (jnp.arctan2(qy, qx) + PI) * (1.0 / TWO_PI)

    # mapped Cartesian atoms rotated into the reference frame
    cart_cols = []
    for k in range(N_CART_MAPPED):
        rel = sub3(pos[FIXED_ATOMS[k]], origin)
        cart_cols.extend([dot3(rel, e1), dot3(rel, e2), dot3(rel, e3)])

    # fused forward log|det J| (single log for all bond/angle/polar terms)
    ld_fwd = -jnp.log(ld_prod * d02) - N_IC * (LOG_PI + LOG_2PI) - LOG_2PI

    # ======================== wrapped flow (affine) ===========================
    y = jnp.concatenate(bonds + angles + torsions + [d01, d02, a102] + cart_cols,
                        axis=-1)                                   # (blk, N_DOFS_OUT)
    s = ls_ref[...]                                                # (1, N_DOFS_OUT)
    t = sh_ref[...]
    z = y * jnp.exp(s) + t
    ld_flow = jnp.sum(s, axis=-1, keepdims=True)                   # (1, 1)

    def zc(j):
        return z[:, j:j + 1]

    # =========================== mixed -> cartesian ===========================
    d01_n = zc(3 * N_IC + 0)
    d02_n = zc(3 * N_IC + 1)
    a102_n = zc(3 * N_IC + 2) * TWO_PI - PI          # unnormalize_torsions
    px = d02_n * jnp.cos(a102_n)                     # polar -> cartesian (plane atom)
    py = d02_n * jnp.sin(a102_n)

    # world-frame positions of the fixed (Cartesian) atoms: w = R^T rel + origin
    def to_world(relx, rely, relz):
        return (e1[0] * relx + e2[0] * rely + e3[0] * relz + origin[0],
                e1[1] * relx + e2[1] * rely + e3[1] * relz + origin[1],
                e1[2] * relx + e2[2] * rely + e3[2] * relz + origin[2])

    world = [None] * N_CART
    base = 3 * N_IC + 3
    for k in range(N_CART_MAPPED):
        world[k] = to_world(zc(base + 3 * k),
                            zc(base + 3 * k + 1),
                            zc(base + 3 * k + 2))
    world[N_CART - 3] = origin                                     # origin atom
    world[N_CART - 2] = axpy3(origin, d01_n, e1)                   # axis atom
    world[N_CART - 1] = (origin[0] + px * e1[0] + py * e2[0],      # plane atom
                         origin[1] + px * e1[1] + py * e2[1],
                         origin[2] + px * e1[2] + py * e2[2])

    # NeRF placement of the internal-coordinate atoms (fully unrolled).
    ic_world = []
    inv_prod = jnp.maximum(d02_n, EPS)               # fused inverse log-det product
    for i in range(N_IC):
        r = zc(i)
        theta = zc(N_IC + i) * PI
        phi = zc(2 * N_IC + i) * TWO_PI - PI
        sin_t, cos_t = jnp.sin(theta), jnp.cos(theta)
        sin_p, cos_p = jnp.sin(phi), jnp.cos(phi)
        # reference atoms via static Python selection -> zero in-kernel shuffles
        pb = world[B_COLS[i]]
        pc = world[C_COLS[i]]
        pd = world[D_COLS[i]]
        u = sub3(pc, pb)
        inv_un = lax.rsqrt(jnp.maximum(dot3(u, u), EPS))
        n1 = scale3(u, inv_un)
        b2 = sub3(pd, pc)
        ww = axpy3(b2, -dot3(b2, n1), n1)
        inv_wn = lax.rsqrt(jnp.maximum(dot3(ww, ww), EPS))
        wh = scale3(ww, inv_wn)
        m = cross3(n1, wh)
        dirx = cos_t * n1[0] + sin_t * (cos_p * wh[0] - sin_p * m[0])
        diry = cos_t * n1[1] + sin_t * (cos_p * wh[1] - sin_p * m[1])
        dirz = cos_t * n1[2] + sin_t * (cos_p * wh[2] - sin_p * m[2])
        ic_world.append((pb[0] + r * dirx, pb[1] + r * diry, pb[2] + r * dirz))
        rr = jnp.maximum(r, EPS)
        inv_prod = inv_prod * (rr * rr * jnp.maximum(sin_t, EPS))

    ld_inv = jnp.log(inv_prod) + N_IC * (LOG_PI + LOG_2PI) + LOG_2PI
    ld_total = ld_fwd + ld_flow + ld_inv                           # (blk, 1)

    # ======================= lane-dense packed output =========================
    out_atoms = [None] * N_ATOMS
    for k, a in enumerate(FIXED_ATOMS):
        out_atoms[a] = world[k]
    for i in range(N_IC):
        out_atoms[int(Z_MATRIX[i, 0])] = ic_world[i]

    cols = []
    for a in range(N_ATOMS):
        cols.extend(list(out_atoms[a]))
    cols.append(ld_total)
    pad = jnp.zeros((blk, PACK_WIDTH - len(cols)), jnp.float32)
    out_ref[...] = jnp.concatenate(cols + [pad], axis=-1)          # one 128-lane store


# -----------------------------------------------------------------------------
# Wrapper: single fused pallas_call, batch tiled over a parallel grid axis.
# -----------------------------------------------------------------------------
@jax.jit
def forward(x, log_scale, shift):
    B = x.shape[0]
    x = x.astype(jnp.float32)
    BP = ((B + BATCH_BLOCK - 1) // BATCH_BLOCK) * BATCH_BLOCK
    if BP != B:
        x = jnp.pad(x, ((0, BP - B), (0, 0)))

    packed = pl.pallas_call(
        _fused_kernel,
        grid=(BP // BATCH_BLOCK,),
        in_specs=[
            pl.BlockSpec((BATCH_BLOCK, X_WIDTH), lambda i: (i, 0)),
            pl.BlockSpec((1, N_DOFS_OUT), lambda i: (0, 0)),
            pl.BlockSpec((1, N_DOFS_OUT), lambda i: (0, 0)),
        ],
        out_specs=pl.BlockSpec((BATCH_BLOCK, PACK_WIDTH), lambda i: (i, 0)),
        out_shape=jax.ShapeDtypeStruct((BP, PACK_WIDTH), jnp.float32),
        compiler_params=pltpu.CompilerParams(dimension_semantics=("parallel",)),
    )(x, log_scale.astype(jnp.float32), shift.astype(jnp.float32))

    x_out = packed[:B, :X_WIDTH]
    log_det = packed[:B, LD_COL]
    return x_out, log_det


if __name__ == "__main__":
    B = 4
    base = jnp.array([[0.0, 0.0, 0.0],
                      [1.2, 0.0, 0.0],
                      [0.0, 1.1, 0.0],
                      [0.3, 0.4, 1.0],
                      [1.0, 1.0, 0.5],
                      [-0.8, 0.5, 0.7],
                      [0.9, -0.7, 1.3],
                      [-0.5, -0.9, -0.6]], dtype=jnp.float32)
    key = jax.random.PRNGKey(0)
    noise = 0.05 * jax.random.normal(key, (B, N_ATOMS, 3), dtype=jnp.float32)
    x = (base[None, :, :] + noise).reshape(B, N_ATOMS * 3)

    # Self-check: with an identity wrapped flow the module is an exact round trip
    # and the Jacobian contributions cancel.
    s0 = jnp.zeros((1, N_DOFS_OUT), jnp.float32)
    t0 = jnp.zeros((1, N_DOFS_OUT), jnp.float32)
    x_rt, ld_rt = forward(x, s0, t0)
    jax.block_until_ready((x_rt, ld_rt))
    assert x_rt.shape == (B, N_ATOMS * 3) and ld_rt.shape == (B,)
    assert jnp.allclose(x_rt, x, atol=5e-3), "round-trip mismatch"
    assert float(jnp.max(jnp.abs(ld_rt))) < 5e-3, "log|det J| should cancel"

    # Run with a deterministic, non-trivial wrapped affine flow.
    k = jnp.arange(N_DOFS_OUT, dtype=jnp.float32)
    log_scale = (0.03 * jnp.sin(0.7 * k)).reshape(1, -1)
    shift = (0.01 * jnp.cos(1.3 * k)).reshape(1, -1)
    x_out, log_det = forward(x, log_scale, shift)
    jax.block_until_ready((x_out, log_det))
    assert x_out.shape == (B, N_ATOMS * 3) and log_det.shape == (B,)
    assert bool(jnp.all(jnp.isfinite(x_out))) and bool(jnp.all(jnp.isfinite(log_det)))
    print("KERNEL_OK")
</pallas_src>

<mosaic_0001>
module attributes {stable_mosaic.version = 11 : i64} {
  func.func @_fused_kernel(%arg0: i32, %arg1: memref<8x24xf32, #tpu.memory_space<vmem>>, %arg2: memref<1x18xf32, #tpu.memory_space<vmem>>, %arg3: memref<1x18xf32, #tpu.memory_space<vmem>>, %arg4: memref<8x128xf32, #tpu.memory_space<vmem>>) attributes {dimension_semantics = [#tpu.dimension_semantics<parallel>], iteration_bounds = array<i64: 1>, scalar_prefetch = 0 : i64, scratch_operands = 0 : i64, tpu.core_type = #tpu.core_type<tc>, window_params = [{transform_indices = @transform_0, window_bounds = array<i64: 8, 24>}, {pipeline_mode = #tpu.pipeline_mode<synchronous>, transform_indices = @transform_1, window_bounds = array<i64: 1, 18>}, {pipeline_mode = #tpu.pipeline_mode<synchronous>, transform_indices = @transform_2, window_bounds = array<i64: 1, 18>}, {transform_indices = @transform_3, window_bounds = array<i64: 8, 128>}]} {
    %c0 = arith.constant 0 : index
    %c0_0 = arith.constant 0 : index
    %0 = vector.load %arg1[%c0, %c0_0] : memref<8x24xf32, #tpu.memory_space<vmem>>, vector<8x24xf32>
    %1 = vector.extract_strided_slice %0 {offsets = [0, 0], sizes = [8, 1], strides = [1, 1]} : vector<8x24xf32> to vector<8x1xf32>
    %2 = vector.extract_strided_slice %0 {offsets = [0, 1], sizes = [8, 1], strides = [1, 1]} : vector<8x24xf32> to vector<8x1xf32>
    %3 = vector.extract_strided_slice %0 {offsets = [0, 2], sizes = [8, 1], strides = [1, 1]} : vector<8x24xf32> to vector<8x1xf32>
    %4 = vector.extract_strided_slice %0 {offsets = [0, 3], sizes = [8, 1], strides = [1, 1]} : vector<8x24xf32> to vector<8x1xf32>
    %5 = vector.extract_strided_slice %0 {offsets = [0, 4], sizes = [8, 1], strides = [1, 1]} : vector<8x24xf32> to vector<8x1xf32>
    %6 = vector.extract_strided_slice %0 {offsets = [0, 5], sizes = [8, 1], strides = [1, 1]} : vector<8x24xf32> to vector<8x1xf32>
    %7 = vector.extract_strided_slice %0 {offsets = [0, 6], sizes = [8, 1], strides = [1, 1]} : vector<8x24xf32> to vector<8x1xf32>
    %8 = vector.extract_strided_slice %0 {offsets = [0, 7], sizes = [8, 1], strides = [1, 1]} : vector<8x24xf32> to vector<8x1xf32>
    %9 = vector.extract_strided_slice %0 {offsets = [0, 8], sizes = [8, 1], strides = [1, 1]} : vector<8x24xf32> to vector<8x1xf32>
    %10 = vector.extract_strided_slice %0 {offsets = [0, 9], sizes = [8, 1], strides = [1, 1]} : vector<8x24xf32> to vector<8x1xf32>
    %11 = vector.extract_strided_slice %0 {offsets = [0, 10], sizes = [8, 1], strides = [1, 1]} : vector<8x24xf32> to vector<8x1xf32>
    %12 = vector.extract_strided_slice %0 {offsets = [0, 11], sizes = [8, 1], strides = [1, 1]} : vector<8x24xf32> to vector<8x1xf32>
    %13 = vector.extract_strided_slice %0 {offsets = [0, 12], sizes = [8, 1], strides = [1, 1]} : vector<8x24xf32> to vector<8x1xf32>
    %14 = vector.extract_strided_slice %0 {offsets = [0, 13], sizes = [8, 1], strides = [1, 1]} : vector<8x24xf32> to vector<8x1xf32>
    %15 = vector.extract_strided_slice %0 {offsets = [0, 14], sizes = [8, 1], strides = [1, 1]} : vector<8x24xf32> to vector<8x1xf32>
    %16 = vector.extract_strided_slice %0 {offsets = [0, 15], sizes = [8, 1], strides = [1, 1]} : vector<8x24xf32> to vector<8x1xf32>
    %17 = vector.extract_strided_slice %0 {offsets = [0, 16], sizes = [8, 1], strides = [1, 1]} : vector<8x24xf32> to vector<8x1xf32>
    %18 = vector.extract_strided_slice %0 {offsets = [0, 17], sizes = [8, 1], strides = [1, 1]} : vector<8x24xf32> to vector<8x1xf32>
    %19 = vector.extract_strided_slice %0 {offsets = [0, 18], sizes = [8, 1], strides = [1, 1]} : vector<8x24xf32> to vector<8x1xf32>
    %20 = vector.extract_strided_slice %0 {offsets = [0, 19], sizes = [8, 1], strides = [1, 1]} : vector<8x24xf32> to vector<8x1xf32>
    %21 = vector.extract_strided_slice %0 {offsets = [0, 20], sizes = [8, 1], strides = [1, 1]} : vector<8x24xf32> to vector<8x1xf32>
    %22 = vector.extract_strided_slice %0 {offsets = [0, 21], sizes = [8, 1], strides = [1, 1]} : vector<8x24xf32> to vector<8x1xf32>
    %23 = vector.extract_strided_slice %0 {offsets = [0, 22], sizes = [8, 1], strides = [1, 1]} : vector<8x24xf32> to vector<8x1xf32>
    %24 = vector.extract_strided_slice %0 {offsets = [0, 23], sizes = [8, 1], strides = [1, 1]} : vector<8x24xf32> to vector<8x1xf32>
    %25 = arith.subf %16, %10 : vector<8x1xf32>
    %26 = arith.subf %17, %11 : vector<8x1xf32>
    %27 = arith.subf %18, %12 : vector<8x1xf32>
    %28 = arith.subf %13, %10 : vector<8x1xf32>
    %29 = arith.subf %14, %11 : vector<8x1xf32>
    %30 = arith.subf %15, %12 : vector<8x1xf32>
    %31 = arith.mulf %25, %25 : vector<8x1xf32>
    %32 = arith.mulf %26, %26 : vector<8x1xf32>
    %33 = arith.addf %31, %32 : vector<8x1xf32>
    %34 = arith.mulf %27, %27 : vector<8x1xf32>
    %35 = arith.addf %33, %34 : vector<8x1xf32>
    %36 = arith.mulf %28, %28 : vector<8x1xf32>
    %37 = arith.mulf %29, %29 : vector<8x1xf32>
    %38 = arith.addf %36, %37 : vector<8x1xf32>
    %39 = arith.mulf %30, %30 : vector<8x1xf32>
    %40 = arith.addf %38, %39 : vector<8x1xf32>
    %cst = arith.constant 1.000000e-07 : f32
    %41 = vector.broadcast %cst : f32 to vector<8x1xf32>
    %42 = arith.maximumf %35, %41 : vector<8x1xf32>
    %43 = math.rsqrt %42 : vector<8x1xf32>
    %cst_1 = arith.constant 1.000000e-07 : f32
    %44 = vector.broadcast %cst_1 : f32 to vector<8x1xf32>
    %45 = arith.maximumf %40, %44 : vector<8x1xf32>
    %46 = math.rsqrt %45 : vector<8x1xf32>
    %47 = arith.mulf %35, %43 : vector<8x1xf32>
    %48 = arith.mulf %25, %28 : vector<8x1xf32>
    %49 = arith.mulf %26, %29 : vector<8x1xf32>
    %50 = arith.addf %48, %49 : vector<8x1xf32>
    %51 = arith.mulf %27, %30 : vector<8x1xf32>
    %52 = arith.addf %50, %51 : vector<8x1xf32>
    %53 = arith.mulf %43, %46 : vector<8x1xf32>
    %54 = arith.mulf %52, %53 : vector<8x1xf32>
    %cst_2 = arith.constant -0.99999988 : f32
    %cst_3 = arith.constant 0.99999988 : f32
    %55 = vector.broadcast %cst_2 : f32 to vector<8x1xf32>
    %56 = arith.maximumf %55, %54 : vector<8x1xf32>
    %57 = vector.broadcast %cst_3 : f32 to vector<8x1xf32>
    %58 = arith.minimumf %57, %56 : vector<8x1xf32>
    %59 = arith.mulf %58, %58 : vector<8x1xf32>
    %cst_4 = arith.constant 1.000000e+00 : f32
    %60 = vector.broadcast %cst_4 : f32 to vector<8x1xf32>
    %61 = arith.subf %60, %59 : vector<8x1xf32>
    %62 = math.sqrt %61 : vector<8x1xf32>
    %63 = math.atan2 %62, %58 : vector<8x1xf32>
    %cst_5 = arith.constant 0.318309873 : f32
    %64 = vector.broadcast %cst_5 : f32 to vector<8x1xf32>
    %65 = arith.mulf %63, %64 : vector<8x1xf32>
    %66 = arith.mulf %28, %46 : vector<8x1xf32>
    %67 = arith.mulf %29, %46 : vector<8x1xf32>
    %68 = arith.mulf %30, %46 : vector<8x1xf32>
    %69 = arith.subf %1, %13 : vector<8x1xf32>
    %70 = arith.subf %2, %14 : vector<8x1xf32>
    %71 = arith.subf %3, %15 : vector<8x1xf32>
    %72 = arith.mulf %25, %66 : vector<8x1xf32>
    %73 = arith.mulf %26, %67 : vector<8x1xf32>
    %74 = arith.addf %72, %73 : vector<8x1xf32>
    %75 = arith.mulf %27, %68 : vector<8x1xf32>
    %76 = arith.addf %74, %75 : vector<8x1xf32>
    %cst_6 = arith.constant 0.000000e+00 : f32
    %77 = vector.broadcast %cst_6 : f32 to vector<8x1xf32>
    %78 = arith.subf %77, %76 : vector<8x1xf32>
    %79 = arith.mulf %78, %66 : vector<8x1xf32>
    %80 = arith.addf %25, %79 : vector<8x1xf32>
    %81 = arith.mulf %78, %67 : vector<8x1xf32>
    %82 = arith.addf %26, %81 : vector<8x1xf32>
    %83 = arith.mulf %78, %68 : vector<8x1xf32>
    %84 = arith.addf %27, %83 : vector<8x1xf32>
    %85 = arith.mulf %69, %66 : vector<8x1xf32>
    %86 = arith.mulf %70, %67 : vector<8x1xf32>
    %87 = arith.addf %85, %86 : vector<8x1xf32>
    %88 = arith.mulf %71, %68 : vector<8x1xf32>
    %89 = arith.addf %87, %88 : vector<8x1xf32>
    %cst_7 = arith.constant 0.000000e+00 : f32
    %90 = vector.broadcast %cst_7 : f32 to vector<8x1xf32>
    %91 = arith.subf %90, %89 : vector<8x1xf32>
    %92 = arith.mulf %91, %66 : vector<8x1xf32>
    %93 = arith.addf %69, %92 : vector<8x1xf32>
    %94 = arith.mulf %91, %67 : vector<8x1xf32>
    %95 = arith.addf %70, %94 : vector<8x1xf32>
    %96 = arith.mulf %91, %68 : vector<8x1xf32>
    %97 = arith.addf %71, %96 : vector<8x1xf32>
    %98 = arith.mulf %80, %93 : vector<8x1xf32>
    %99 = arith.mulf %82, %95 : vector<8x1xf32>
    %100 = arith.addf %98, %99 : vector<8x1xf32>
    %101 = arith.mulf %84, %97 : vector<8x1xf32>
    %102 = arith.addf %100, %101 : vector<8x1xf32>
    %103 = arith.mulf %67, %84 : vector<8x1xf32>
    %104 = arith.mulf %68, %82 : vector<8x1xf32>
    %105 = arith.subf %103, %104 : vector<8x1xf32>
    %106 = arith.mulf %68, %80 : vector<8x1xf32>
    %107 = arith.mulf %66, %84 : vector<8x1xf32>
    %108 = arith.subf %106, %107 : vector<8x1xf32>
    %109 = arith.mulf %66, %82 : vector<8x1xf32>
    %110 = arith.mulf %67, %80 : vector<8x1xf32>
    %111 = arith.subf %109, %110 : vector<8x1xf32>
    %112 = arith.mulf %105, %93 : vector<8x1xf32>
    %113 = arith.mulf %108, %95 : vector<8x1xf32>
    %114 = arith.addf %112, %113 : vector<8x1xf32>
    %115 = arith.mulf %111, %97 : vector<8x1xf32>
    %116 = arith.addf %114, %115 : vector<8x1xf32>
    %117 = math.atan2 %116, %102 : vector<8x1xf32>
    %cst_8 = arith.constant 3.14159274 : f32
    %118 = vector.broadcast %cst_8 : f32 to vector<8x1xf32>
    %119 = arith.addf %117, %118 : vector<8x1xf32>
    %cst_9 = arith.constant 0.159154937 : f32
    %120 = vector.broadcast %cst_9 : f32 to vector<8x1xf32>
    %121 = arith.mulf %119, %120 : vector<8x1xf32>
    %cst_10 = arith.constant 1.000000e-07 : f32
    %122 = vector.broadcast %cst_10 : f32 to vector<8x1xf32>
    %123 = arith.maximumf %35, %122 : vector<8x1xf32>
    %cst_11 = arith.constant 1.000000e-07 : f32
    %124 = vector.broadcast %cst_11 : f32 to vector<8x1xf32>
    %125 = arith.maximumf %62, %124 : vector<8x1xf32>
    %126 = arith.mulf %123, %125 : vector<8x1xf32>
    %127 = arith.subf %19, %13 : vector<8x1xf32>
    %128 = arith.subf %20, %14 : vector<8x1xf32>
    %129 = arith.subf %21, %15 : vector<8x1xf32>
    %130 = arith.subf %10, %13 : vector<8x1xf32>
    %131 = arith.subf %11, %14 : vector<8x1xf32>
    %132 = arith.subf %12, %15 : vector<8x1xf32>
    %133 = arith.mulf %127, %127 : vector<8x1xf32>
    %134 = arith.mulf %128, %128 : vector<8x1xf32>
    %135 = arith.addf %133, %134 : vector<8x1xf32>
    %136 = arith.mulf %129, %129 : vector<8x1xf32>
    %137 = arith.addf %135, %136 : vector<8x1xf32>
    %138 = arith.mulf %130, %130 : vector<8x1xf32>
    %139 = arith.mulf %131, %131 : vector<8x1xf32>
    %140 = arith.addf %138, %139 : vector<8x1xf32>
    %141 = arith.mulf %132, %132 : vector<8x1xf32>
    %142 = arith.addf %140, %141 : vector<8x1xf32>
    %cst_12 = arith.constant 1.000000e-07 : f32
    %143 = vector.broadcast %cst_12 : f32 to vector<8x1xf32>
    %144 = arith.maximumf %137, %143 : vector<8x1xf32>
    %145 = math.rsqrt %144 : vector<8x1xf32>
    %cst_13 = arith.constant 1.000000e-07 : f32
    %146 = vector.broadcast %cst_13 : f32 to vector<8x1xf32>
    %147 = arith.maximumf %142, %146 : vector<8x1xf32>
    %148 = math.rsqrt %147 : vector<8x1xf32>
    %149 = arith.mulf %137, %145 : vector<8x1xf32>
    %150 = arith.mulf %127, %130 : vector<8x1xf32>
    %151 = arith.mulf %128, %131 : vector<8x1xf32>
    %152 = arith.addf %150, %151 : vector<8x1xf32>
    %153 = arith.mulf %129, %132 : vector<8x1xf32>
    %154 = arith.addf %152, %153 : vector<8x1xf32>
    %155 = arith.mulf %145, %148 : vector<8x1xf32>
    %156 = arith.mulf %154, %155 : vector<8x1xf32>
    %cst_14 = arith.constant -0.99999988 : f32
    %cst_15 = arith.constant 0.99999988 : f32
    %157 = vector.broadcast %cst_14 : f32 to vector<8x1xf32>
    %158 = arith.maximumf %157, %156 : vector<8x1xf32>
    %159 = vector.broadcast %cst_15 : f32 to vector<8x1xf32>
    %160 = arith.minimumf %159, %158 : vector<8x1xf32>
    %161 = arith.mulf %160, %160 : vector<8x1xf32>
    %cst_16 = arith.constant 1.000000e+00 : f32
    %162 = vector.broadcast %cst_16 : f32 to vector<8x1xf32>
    %163 = arith.subf %162, %161 : vector<8x1xf32>
    %164 = math.sqrt %163 : vector<8x1xf32>
    %165 = math.atan2 %164, %160 : vector<8x1xf32>
    %cst_17 = arith.constant 0.318309873 : f32
    %166 = vector.broadcast %cst_17 : f32 to vector<8x1xf32>
    %167 = arith.mulf %165, %166 : vector<8x1xf32>
    %168 = arith.mulf %130, %148 : vector<8x1xf32>
    %169 = arith.mulf %131, %148 : vector<8x1xf32>
    %170 = arith.mulf %132, %148 : vector<8x1xf32>
    %171 = arith.subf %4, %10 : vector<8x1xf32>
    %172 = arith.subf %5, %11 : vector<8x1xf32>
    %173 = arith.subf %6, %12 : vector<8x1xf32>
    %174 = arith.mulf %127, %168 : vector<8x1xf32>
    %175 = arith.mulf %128, %169 : vector<8x1xf32>
    %176 = arith.addf %174, %175 : vector<8x1xf32>
    %177 = arith.mulf %129, %170 : vector<8x1xf32>
    %178 = arith.addf %176, %177 : vector<8x1xf32>
    %cst_18 = arith.constant 0.000000e+00 : f32
    %179 = vector.broadcast %cst_18 : f32 to vector<8x1xf32>
    %180 = arith.subf %179, %178 : vector<8x1xf32>
    %181 = arith.mulf %180, %168 : vector<8x1xf32>
    %182 = arith.addf %127, %181 : vector<8x1xf32>
    %183 = arith.mulf %180, %169 : vector<8x1xf32>
    %184 = arith.addf %128, %183 : vector<8x1xf32>
    %185 = arith.mulf %180, %170 : vector<8x1xf32>
    %186 = arith.addf %129, %185 : vector<8x1xf32>
    %187 = arith.mulf %171, %168 : vector<8x1xf32>
    %188 = arith.mulf %172, %169 : vector<8x1xf32>
    %189 = arith.addf %187, %188 : vector<8x1xf32>
    %190 = arith.mulf %173, %170 : vector<8x1xf32>
    %191 = arith.addf %189, %190 : vector<8x1xf32>
    %cst_19 = arith.constant 0.000000e+00 : f32
    %192 = vector.broadcast %cst_19 : f32 to vector<8x1xf32>
    %193 = arith.subf %192, %191 : vector<8x1xf32>
    %194 = arith.mulf %193, %168 : vector<8x1xf32>
    %195 = arith.addf %171, %194 : vector<8x1xf32>
    %196 = arith.mulf %193, %169 : vector<8x1xf32>
    %197 = arith.addf %172, %196 : vector<8x1xf32>
    %198 = arith.mulf %193, %170 : vector<8x1xf32>
    %199 = arith.addf %173, %198 : vector<8x1xf32>
    %200 = arith.mulf %182, %195 : vector<8x1xf32>
    %201 = arith.mulf %184, %197 : vector<8x1xf32>
    %202 = arith.addf %200, %201 : vector<8x1xf32>
    %203 = arith.mulf %186, %199 : vector<8x1xf32>
    %204 = arith.addf %202, %203 : vector<8x1xf32>
    %205 = arith.mulf %169, %186 : vector<8x1xf32>
    %206 = arith.mulf %170, %184 : vector<8x1xf32>
    %207 = arith.subf %205, %206 : vector<8x1xf32>
    %208 = arith.mulf %170, %182 : vector<8x1xf32>
    %209 = arith.mulf %168, %186 : vector<8x1xf32>
    %210 = arith.subf %208, %209 : vector<8x1xf32>
    %211 = arith.mulf %168, %184 : vector<8x1xf32>
    %212 = arith.mulf %169, %182 : vector<8x1xf32>
    %213 = arith.subf %211, %212 : vector<8x1xf32>
    %214 = arith.mulf %207, %195 : vector<8x1xf32>
    %215 = arith.mulf %210, %197 : vector<8x1xf32>
    %216 = arith.addf %214, %215 : vector<8x1xf32>
    %217 = arith.mulf %213, %199 : vector<8x1xf32>
    %218 = arith.addf %216, %217 : vector<8x1xf32>
    %219 = math.atan2 %218, %204 : vector<8x1xf32>
    %cst_20 = arith.constant 3.14159274 : f32
    %220 = vector.broadcast %cst_20 : f32 to vector<8x1xf32>
    %221 = arith.addf %219, %220 : vector<8x1xf32>
    %cst_21 = arith.constant 0.159154937 : f32
    %222 = vector.broadcast %cst_21 : f32 to vector<8x1xf32>
    %223 = arith.mulf %221, %222 : vector<8x1xf32>
    %cst_22 = arith.constant 1.000000e-07 : f32
    %224 = vector.broadcast %cst_22 : f32 to vector<8x1xf32>
    %225 = arith.maximumf %137, %224 : vector<8x1xf32>
    %cst_23 = arith.constant 1.000000e-07 : f32
    %226 = vector.broadcast %cst_23 : f32 to vector<8x1xf32>
    %227 = arith.maximumf %164, %226 : vector<8x1xf32>
    %228 = arith.mulf %225, %227 : vector<8x1xf32>
    %229 = arith.mulf %126, %228 : vector<8x1xf32>
    %230 = arith.subf %22, %10 : vector<8x1xf32>
    %231 = arith.subf %23, %11 : vector<8x1xf32>
    %232 = arith.subf %24, %12 : vector<8x1xf32>
    %233 = arith.subf %1, %10 : vector<8x1xf32>
    %234 = arith.subf %2, %11 : vector<8x1xf32>
    %235 = arith.subf %3, %12 : vector<8x1xf32>
    %236 = arith.mulf %230, %230 : vector<8x1xf32>
    %237 = arith.mulf %231, %231 : vector<8x1xf32>
    %238 = arith.addf %236, %237 : vector<8x1xf32>
    %239 = arith.mulf %232, %232 : vector<8x1xf32>
    %240 = arith.addf %238, %239 : vector<8x1xf32>
    %241 = arith.mulf %233, %233 : vector<8x1xf32>
    %242 = arith.mulf %234, %234 : vector<8x1xf32>
    %243 = arith.addf %241, %242 : vector<8x1xf32>
    %244 = arith.mulf %235, %235 : vector<8x1xf32>
    %245 = arith.addf %243, %244 : vector<8x1xf32>
    %cst_24 = arith.constant 1.000000e-07 : f32
    %246 = vector.broadcast %cst_24 : f32 to vector<8x1xf32>
    %247 = arith.maximumf %240, %246 : vector<8x1xf32>
    %248 = math.rsqrt %247 : vector<8x1xf32>
    %cst_25 = arith.constant 1.000000e-07 : f32
    %249 = vector.broadcast %cst_25 : f32 to vector<8x1xf32>
    %250 = arith.maximumf %245, %249 : vector<8x1xf32>
    %251 = math.rsqrt %250 : vector<8x1xf32>
    %252 = arith.mulf %240, %248 : vector<8x1xf32>
    %253 = arith.mulf %230, %233 : vector<8x1xf32>
    %254 = arith.mulf %231, %234 : vector<8x1xf32>
    %255 = arith.addf %253, %254 : vector<8x1xf32>
    %256 = arith.mulf %232, %235 : vector<8x1xf32>
    %257 = arith.addf %255, %256 : vector<8x1xf32>
    %258 = arith.mulf %248, %251 : vector<8x1xf32>
    %259 = arith.mulf %257, %258 : vector<8x1xf32>
    %cst_26 = arith.constant -0.99999988 : f32
    %cst_27 = arith.constant 0.99999988 : f32
    %260 = vector.broadcast %cst_26 : f32 to vector<8x1xf32>
    %261 = arith.maximumf %260, %259 : vector<8x1xf32>
    %262 = vector.broadcast %cst_27 : f32 to vector<8x1xf32>
    %263 = arith.minimumf %262, %261 : vector<8x1xf32>
    %264 = arith.mulf %263, %263 : vector<8x1xf32>
    %cst_28 = arith.constant 1.000000e+00 : f32
    %265 = vector.broadcast %cst_28 : f32 to vector<8x1xf32>
    %266 = arith.subf %265, %264 : vector<8x1xf32>
    %267 = math.sqrt %266 : vector<8x1xf32>
    %268 = math.atan2 %267, %263 : vector<8x1xf32>
    %cst_29 = arith.constant 0.318309873 : f32
    %269 = vector.broadcast %cst_29 : f32 to vector<8x1xf32>
    %270 = arith.mulf %268, %269 : vector<8x1xf32>
    %271 = arith.mulf %233, %251 : vector<8x1xf32>
    %272 = arith.mulf %234, %251 : vector<8x1xf32>
    %273 = arith.mulf %235, %251 : vector<8x1xf32>
    %274 = arith.subf %13, %1 : vector<8x1xf32>
    %275 = arith.subf %14, %2 : vector<8x1xf32>
    %276 = arith.subf %15, %3 : vector<8x1xf32>
    %277 = arith.mulf %230, %271 : vector<8x1xf32>
    %278 = arith.mulf %231, %272 : vector<8x1xf32>
    %279 = arith.addf %277, %278 : vector<8x1xf32>
    %280 = arith.mulf %232, %273 : vector<8x1xf32>
    %281 = arith.addf %279, %280 : vector<8x1xf32>
    %cst_30 = arith.constant 0.000000e+00 : f32
    %282 = vector.broadcast %cst_30 : f32 to vector<8x1xf32>
    %283 = arith.subf %282, %281 : vector<8x1xf32>
    %284 = arith.mulf %283, %271 : vector<8x1xf32>
    %285 = arith.addf %230, %284 : vector<8x1xf32>
    %286 = arith.mulf %283, %272 : vector<8x1xf32>
    %287 = arith.addf %231, %286 : vector<8x1xf32>
    %288 = arith.mulf %283, %273 : vector<8x1xf32>
    %289 = arith.addf %232, %288 : vector<8x1xf32>
    %290 = arith.mulf %274, %271 : vector<8x1xf32>
    %291 = arith.mulf %275, %272 : vector<8x1xf32>
    %292 = arith.addf %290, %291 : vector<8x1xf32>
    %293 = arith.mulf %276, %273 : vector<8x1xf32>
    %294 = arith.addf %292, %293 : vector<8x1xf32>
    %cst_31 = arith.constant 0.000000e+00 : f32
    %295 = vector.broadcast %cst_31 : f32 to vector<8x1xf32>
    %296 = arith.subf %295, %294 : vector<8x1xf32>
    %297 = arith.mulf %296, %271 : vector<8x1xf32>
    %298 = arith.addf %274, %297 : vector<8x1xf32>
    %299 = arith.mulf %296, %272 : vector<8x1xf32>
    %300 = arith.addf %275, %299 : vector<8x1xf32>
    %301 = arith.mulf %296, %273 : vector<8x1xf32>
    %302 = arith.addf %276, %301 : vector<8x1xf32>
    %303 = arith.mulf %285, %298 : vector<8x1xf32>
    %304 = arith.mulf %287, %300 : vector<8x1xf32>
    %305 = arith.addf %303, %304 : vector<8x1xf32>
    %306 = arith.mulf %289, %302 : vector<8x1xf32>
    %307 = arith.addf %305, %306 : vector<8x1xf32>
    %308 = arith.mulf %272, %289 : vector<8x1xf32>
    %309 = arith.mulf %273, %287 : vector<8x1xf32>
    %310 = arith.subf %308, %309 : vector<8x1xf32>
    %311 = arith.mulf %273, %285 : vector<8x1xf32>
    %312 = arith.mulf %271, %289 : vector<8x1xf32>
    %313 = arith.subf %311, %312 : vector<8x1xf32>
    %314 = arith.mulf %271, %287 : vector<8x1xf32>
    %315 = arith.mulf %272, %285 : vector<8x1xf32>
    %316 = arith.subf %314, %315 : vector<8x1xf32>
    %317 = arith.mulf %310, %298 : vector<8x1xf32>
    %318 = arith.mulf %313, %300 : vector<8x1xf32>
    %319 = arith.addf %317, %318 : vector<8x1xf32>
    %320 = arith.mulf %316, %302 : vector<8x1xf32>
    %321 = arith.addf %319, %320 : vector<8x1xf32>
    %322 = math.atan2 %321, %307 : vector<8x1xf32>
    %cst_32 = arith.constant 3.14159274 : f32
    %323 = vector.broadcast %cst_32 : f32 to vector<8x1xf32>
    %324 = arith.addf %322, %323 : vector<8x1xf32>
    %cst_33 = arith.constant 0.159154937 : f32
    %325 = vector.broadcast %cst_33 : f32 to vector<8x1xf32>
    %326 = arith.mulf %324, %325 : vector<8x1xf32>
    %cst_34 = arith.constant 1.000000e-07 : f32
    %327 = vector.broadcast %cst_34 : f32 to vector<8x1xf32>
    %328 = arith.maximumf %240, %327 : vector<8x1xf32>
    %cst_35 = arith.constant 1.000000e-07 : f32
    %329 = vector.broadcast %cst_35 : f32 to vector<8x1xf32>
    %330 = arith.maximumf %267, %329 : vector<8x1xf32>
    %331 = arith.mulf %328, %330 : vector<8x1xf32>
    %332 = arith.mulf %229, %331 : vector<8x1xf32>
    %333 = arith.subf %4, %1 : vector<8x1xf32>
    %334 = arith.subf %5, %2 : vector<8x1xf32>
    %335 = arith.subf %6, %3 : vector<8x1xf32>
    %336 = arith.subf %7, %1 : vector<8x1xf32>
    %337 = arith.subf %8, %2 : vector<8x1xf32>
    %338 = arith.subf %9, %3 : vector<8x1xf32>
    %339 = arith.mulf %333, %333 : vector<8x1xf32>
    %340 = arith.mulf %334, %334 : vector<8x1xf32>
    %341 = arith.addf %339, %340 : vector<8x1xf32>
    %342 = arith.mulf %335, %335 : vector<8x1xf32>
    %343 = arith.addf %341, %342 : vector<8x1xf32>
    %cst_36 = arith.constant 1.000000e-07 : f32
    %344 = vector.broadcast %cst_36 : f32 to vector<8x1xf32>
    %345 = arith.maximumf %343, %344 : vector<8x1xf32>
    %346 = math.rsqrt %345 : vector<8x1xf32>
    %347 = arith.mulf %333, %346 : vector<8x1xf32>
    %348 = arith.mulf %334, %346 : vector<8x1xf32>
    %349 = arith.mulf %335, %346 : vector<8x1xf32>
    %350 = arith.mulf %336, %347 : vector<8x1xf32>
    %351 = arith.mulf %337, %348 : vector<8x1xf32>
    %352 = arith.addf %350, %351 : vector<8x1xf32>
    %353 = arith.mulf %338, %349 : vector<8x1xf32>
    %354 = arith.addf %352, %353 : vector<8x1xf32>
    %cst_37 = arith.constant 0.000000e+00 : f32
    %355 = vector.broadcast %cst_37 : f32 to vector<8x1xf32>
    %356 = arith.subf %355, %354 : vector<8x1xf32>
    %357 = arith.mulf %356, %347 : vector<8x1xf32>
    %358 = arith.addf %336, %357 : vector<8x1xf32>
    %359 = arith.mulf %356, %348 : vector<8x1xf32>
    %360 = arith.addf %337, %359 : vector<8x1xf32>
    %361 = arith.mulf %356, %349 : vector<8x1xf32>
    %362 = arith.addf %338, %361 : vector<8x1xf32>
    %363 = arith.mulf %358, %358 : vector<8x1xf32>
    %364 = arith.mulf %360, %360 : vector<8x1xf32>
    %365 = arith.addf %363, %364 : vector<8x1xf32>
    %366 = arith.mulf %362, %362 : vector<8x1xf32>
    %367 = arith.addf %365, %366 : vector<8x1xf32>
    %cst_38 = arith.constant 1.000000e-07 : f32
    %368 = vector.broadcast %cst_38 : f32 to vector<8x1xf32>
    %369 = arith.maximumf %367, %368 : vector<8x1xf32>
    %370 = math.rsqrt %369 : vector<8x1xf32>
    %371 = arith.mulf %358, %370 : vector<8x1xf32>
    %372 = arith.mulf %360, %370 : vector<8x1xf32>
    %373 = arith.mulf %362, %370 : vector<8x1xf32>
    %374 = arith.mulf %348, %373 : vector<8x1xf32>
    %375 = arith.mulf %349, %372 : vector<8x1xf32>
    %376 = arith.subf %374, %375 : vector<8x1xf32>
    %377 = arith.mulf %349, %371 : vector<8x1xf32>
    %378 = arith.mulf %347, %373 : vector<8x1xf32>
    %379 = arith.subf %377, %378 : vector<8x1xf32>
    %380 = arith.mulf %347, %372 : vector<8x1xf32>
    %381 = arith.mulf %348, %371 : vector<8x1xf32>
    %382 = arith.subf %380, %381 : vector<8x1xf32>
    %383 = arith.mulf %343, %346 : vector<8x1xf32>
    %384 = arith.mulf %367, %370 : vector<8x1xf32>
    %385 = arith.mulf %354, %354 : vector<8x1xf32>
    %386 = arith.mulf %384, %384 : vector<8x1xf32>
    %387 = arith.addf %385, %386 : vector<8x1xf32>
    %cst_39 = arith.constant 1.000000e-07 : f32
    %388 = vector.broadcast %cst_39 : f32 to vector<8x1xf32>
    %389 = arith.maximumf %387, %388 : vector<8x1xf32>
    %390 = math.sqrt %389 : vector<8x1xf32>
    %391 = math.atan2 %384, %354 : vector<8x1xf32>
    %cst_40 = arith.constant 3.14159274 : f32
    %392 = vector.broadcast %cst_40 : f32 to vector<8x1xf32>
    %393 = arith.addf %391, %392 : vector<8x1xf32>
    %cst_41 = arith.constant 0.159154937 : f32
    %394 = vector.broadcast %cst_41 : f32 to vector<8x1xf32>
    %395 = arith.mulf %393, %394 : vector<8x1xf32>
    %396 = arith.subf %10, %1 : vector<8x1xf32>
    %397 = arith.subf %11, %2 : vector<8x1xf32>
    %398 = arith.subf %12, %3 : vector<8x1xf32>
    %399 = arith.mulf %396, %347 : vector<8x1xf32>
    %400 = arith.mulf %397, %348 : vector<8x1xf32>
    %401 = arith.addf %399, %400 : vector<8x1xf32>
    %402 = arith.mulf %398, %349 : vector<8x1xf32>
    %403 = arith.addf %401, %402 : vector<8x1xf32>
    %404 = arith.mulf %396, %371 : vector<8x1xf32>
    %405 = arith.mulf %397, %372 : vector<8x1xf32>
    %406 = arith.addf %404, %405 : vector<8x1xf32>
    %407 = arith.mulf %398, %373 : vector<8x1xf32>
    %408 = arith.addf %406, %407 : vector<8x1xf32>
    %409 = arith.mulf %396, %376 : vector<8x1xf32>
    %410 = arith.mulf %397, %379 : vector<8x1xf32>
    %411 = arith.addf %409, %410 : vector<8x1xf32>
    %412 = arith.mulf %398, %382 : vector<8x1xf32>
    %413 = arith.addf %411, %412 : vector<8x1xf32>
    %414 = arith.subf %13, %1 : vector<8x1xf32>
    %415 = arith.subf %14, %2 : vector<8x1xf32>
    %416 = arith.subf %15, %3 : vector<8x1xf32>
    %417 = arith.mulf %414, %347 : vector<8x1xf32>
    %418 = arith.mulf %415, %348 : vector<8x1xf32>
    %419 = arith.addf %417, %418 : vector<8x1xf32>
    %420 = arith.mulf %416, %349 : vector<8x1xf32>
    %421 = arith.addf %419, %420 : vector<8x1xf32>
    %422 = arith.mulf %414, %371 : vector<8x1xf32>
    %423 = arith.mulf %415, %372 : vector<8x1xf32>
    %424 = arith.addf %422, %423 : vector<8x1xf32>
    %425 = arith.mulf %416, %373 : vector<8x1xf32>
    %426 = arith.addf %424, %425 : vector<8x1xf32>
    %427 = arith.mulf %414, %376 : vector<8x1xf32>
    %428 = arith.mulf %415, %379 : vector<8x1xf32>
    %429 = arith.addf %427, %428 : vector<8x1xf32>
    %430 = arith.mulf %416, %382 : vector<8x1xf32>
    %431 = arith.addf %429, %430 : vector<8x1xf32>
    %432 = arith.mulf %332, %390 : vector<8x1xf32>
    %433 = math.log %432 : vector<8x1xf32>
    %cst_42 = arith.constant 0.000000e+00 : f32
    %434 = vector.broadcast %cst_42 : f32 to vector<8x1xf32>
    %435 = arith.subf %434, %433 : vector<8x1xf32>
    %cst_43 = arith.constant 8.94782066 : f32
    %436 = vector.broadcast %cst_43 : f32 to vector<8x1xf32>
    %437 = arith.subf %435, %436 : vector<8x1xf32>
    %cst_44 = arith.constant 1.83787704 : f32
    %438 = vector.broadcast %cst_44 : f32 to vector<8x1xf32>
    %439 = arith.subf %437, %438 : vector<8x1xf32>
    %440 = tpu.concatenate %47, %149, %252, %65, %167, %270, %121, %223, %326, %383, %390, %395, %403, %408, %413, %421 in 1 : vector<8x1xf32>, vector<8x1xf32>, vector<8x1xf32>, vector<8x1xf32>, vector<8x1xf32>, vector<8x1xf32>, vector<8x1xf32>, vector<8x1xf32>, vector<8x1xf32>, vector<8x1xf32>, vector<8x1xf32>, vector<8x1xf32>, vector<8x1xf32>, vector<8x1xf32>, vector<8x1xf32>, vector<8x1xf32> -> vector<8x16xf32>
    %441 = tpu.concatenate %426, %431 in 1 : vector<8x1xf32>, vector<8x1xf32> -> vector<8x2xf32>
    %442 = tpu.concatenate %440, %441 in 1 : vector<8x16xf32>, vector<8x2xf32> -> vector<8x18xf32>
    %c0_45 = arith.constant 0 : index
    %c0_46 = arith.constant 0 : index
    %443 = vector.load %arg2[%c0_45, %c0_46] : memref<1x18xf32, #tpu.memory_space<vmem>>, vector<1x18xf32>
    %c0_47 = arith.constant 0 : index
    %c0_48 = arith.constant 0 : index
    %444 = vector.load %arg3[%c0_47, %c0_48] : memref<1x18xf32, #tpu.memory_space<vmem>>, vector<1x18xf32>
    %445 = math.exp %443 : vector<1x18xf32>
    %446 = vector.broadcast %445 : vector<1x18xf32> to vector<8x18xf32>
    %447 = arith.mulf %442, %446 : vector<8x18xf32>
    %448 = vector.broadcast %444 : vector<1x18xf32> to vector<8x18xf32>
    %449 = arith.addf %447, %448 : vector<8x18xf32>
    %cst_49 = arith.constant dense<0.000000e+00> : vector<1xf32>
    %450 = vector.multi_reduction <add>, %443, %cst_49 [1] : vector<1x18xf32> to vector<1xf32>
    %451 = vector.shape_cast %450 : vector<1xf32> to vector<1x1xf32>
    %452 = vector.extract_strided_slice %449 {offsets = [0, 9], sizes = [8, 1], strides = [1, 1]} : vector<8x18xf32> to vector<8x1xf32>
    %453 = vector.extract_strided_slice %449 {offsets = [0, 10], sizes = [8, 1], strides = [1, 1]} : vector<8x18xf32> to vector<8x1xf32>
    %454 = vector.extract_strided_slice %449 {offsets = [0, 11], sizes = [8, 1], strides = [1, 1]} : vector<8x18xf32> to vector<8x1xf32>
    %cst_50 = arith.constant 6.28318548 : f32
    %455 = vector.broadcast %cst_50 : f32 to vector<8x1xf32>
    %456 = arith.mulf %454, %455 : vector<8x1xf32>
    %cst_51 = arith.constant 3.14159274 : f32
    %457 = vector.broadcast %cst_51 : f32 to vector<8x1xf32>
    %458 = arith.subf %456, %457 : vector<8x1xf32>
    %459 = math.cos %458 : vector<8x1xf32>
    %460 = arith.mulf %453, %459 : vector<8x1xf32>
    %461 = math.sin %458 : vector<8x1xf32>
    %462 = arith.mulf %453, %461 : vector<8x1xf32>
    %463 = vector.extract_strided_slice %449 {offsets = [0, 12], sizes = [8, 1], strides = [1, 1]} : vector<8x18xf32> to vector<8x1xf32>
    %464 = vector.extract_strided_slice %449 {offsets = [0, 13], sizes = [8, 1], strides = [1, 1]} : vector<8x18xf32> to vector<8x1xf32>
    %465 = vector.extract_strided_slice %449 {offsets = [0, 14], sizes = [8, 1], strides = [1, 1]} : vector<8x18xf32> to vector<8x1xf32>
    %466 = arith.mulf %347, %463 : vector<8x1xf32>
    %467 = arith.mulf %371, %464 : vector<8x1xf32>
    %468 = arith.addf %466, %467 : vector<8x1xf32>
    %469 = arith.mulf %376, %465 : vector<8x1xf32>
    %470 = arith.addf %468, %469 : vector<8x1xf32>
    %471 = arith.addf %470, %1 : vector<8x1xf32>
    %472 = arith.mulf %348, %463 : vector<8x1xf32>
    %473 = arith.mulf %372, %464 : vector<8x1xf32>
    %474 = arith.addf %472, %473 : vector<8x1xf32>
    %475 = arith.mulf %379, %465 : vector<8x1xf32>
    %476 = arith.addf %474, %475 : vector<8x1xf32>
    %477 = arith.addf %476, %2 : vector<8x1xf32>
    %478 = arith.mulf %349, %463 : vector<8x1xf32>
    %479 = arith.mulf %373, %464 : vector<8x1xf32>
    %480 = arith.addf %478, %479 : vector<8x1xf32>
    %481 = arith.mulf %382, %465 : vector<8x1xf32>
    %482 = arith.addf %480, %481 : vector<8x1xf32>
    %483 = arith.addf %482, %3 : vector<8x1xf32>
    %484 = vector.extract_strided_slice %449 {offsets = [0, 15], sizes = [8, 1], strides = [1, 1]} : vector<8x18xf32> to vector<8x1xf32>
    %485 = vector.extract_strided_slice %449 {offsets = [0, 16], sizes = [8, 1], strides = [1, 1]} : vector<8x18xf32> to vector<8x1xf32>
    %486 = vector.extract_strided_slice %449 {offsets = [0, 17], sizes = [8, 1], strides = [1, 1]} : vector<8x18xf32> to vector<8x1xf32>
    %487 = arith.mulf %347, %484 : vector<8x1xf32>
    %488 = arith.mulf %371, %485 : vector<8x1xf32>
    %489 = arith.addf %487, %488 : vector<8x1xf32>
    %490 = arith.mulf %376, %486 : vector<8x1xf32>
    %491 = arith.addf %489, %490 : vector<8x1xf32>
    %492 = arith.addf %491, %1 : vector<8x1xf32>
    %493 = arith.mulf %348, %484 : vector<8x1xf32>
    %494 = arith.mulf %372, %485 : vector<8x1xf32>
    %495 = arith.addf %493, %494 : vector<8x1xf32>
    %496 = arith.mulf %379, %486 : vector<8x1xf32>
    %497 = arith.addf %495, %496 : vector<8x1xf32>
    %498 = arith.addf %497, %2 : vector<8x1xf32>
    %499 = arith.mulf %349, %484 : vector<8x1xf32>
    %500 = arith.mulf %373, %485 : vector<8x1xf32>
    %501 = arith.addf %499, %500 : vector<8x1xf32>
    %502 = arith.mulf %382, %486 : vector<8x1xf32>
    %503 = arith.addf %501, %502 : vector<8x1xf32>
    %504 = arith.addf %503, %3 : vector<8x1xf32>
    %505 = arith.mulf %452, %347 : vector<8x1xf32>
    %506 = arith.addf %1, %505 : vector<8x1xf32>
    %507 = arith.mulf %452, %348 : vector<8x1xf32>
    %508 = arith.addf %2, %507 : vector<8x1xf32>
    %509 = arith.mulf %452, %349 : vector<8x1xf32>
    %510 = arith.addf %3, %509 : vector<8x1xf32>
    %511 = arith.mulf %460, %347 : vector<8x1xf32>
    %512 = arith.addf %1, %511 : vector<8x1xf32>
    %513 = arith.mulf %462, %371 : vector<8x1xf32>
    %514 = arith.addf %512, %513 : vector<8x1xf32>
    %515 = arith.mulf %460, %348 : vector<8x1xf32>
    %516 = arith.addf %2, %515 : vector<8x1xf32>
    %517 = arith.mulf %462, %372 : vector<8x1xf32>
    %518 = arith.addf %516, %517 : vector<8x1xf32>
    %519 = arith.mulf %460, %349 : vector<8x1xf32>
    %520 = arith.addf %3, %519 : vector<8x1xf32>
    %521 = arith.mulf %462, %373 : vector<8x1xf32>
    %522 = arith.addf %520, %521 : vector<8x1xf32>
    %cst_52 = arith.constant 1.000000e-07 : f32
    %523 = vector.broadcast %cst_52 : f32 to vector<8x1xf32>
    %524 = arith.maximumf %453, %523 : vector<8x1xf32>
    %525 = vector.extract_strided_slice %449 {offsets = [0, 0], sizes = [8, 1], strides = [1, 1]} : vector<8x18xf32> to vector<8x1xf32>
    %526 = vector.extract_strided_slice %449 {offsets = [0, 3], sizes = [8, 1], strides = [1, 1]} : vector<8x18xf32> to vector<8x1xf32>
    %cst_53 = arith.constant 3.14159274 : f32
    %527 = vector.broadcast %cst_53 : f32 to vector<8x1xf32>
    %528 = arith.mulf %526, %527 : vector<8x1xf32>
    %529 = vector.extract_strided_slice %449 {offsets = [0, 6], sizes = [8, 1], strides = [1, 1]} : vector<8x18xf32> to vector<8x1xf32>
    %cst_54 = arith.constant 6.28318548 : f32
    %530 = vector.broadcast %cst_54 : f32 to vector<8x1xf32>
    %531 = arith.mulf %529, %530 : vector<8x1xf32>
    %cst_55 = arith.constant 3.14159274 : f32
    %532 = vector.broadcast %cst_55 : f32 to vector<8x1xf32>
    %533 = arith.subf %531, %532 : vector<8x1xf32>
    %534 = math.sin %528 : vector<8x1xf32>
    %535 = math.cos %528 : vector<8x1xf32>
    %536 = math.sin %533 : vector<8x1xf32>
    %537 = math.cos %533 : vector<8x1xf32>
    %538 = arith.subf %492, %471 : vector<8x1xf32>
    %539 = arith.subf %498, %477 : vector<8x1xf32>
    %540 = arith.subf %504, %483 : vector<8x1xf32>
    %541 = arith.mulf %538, %538 : vector<8x1xf32>
    %542 = arith.mulf %539, %539 : vector<8x1xf32>
    %543 = arith.addf %541, %542 : vector<8x1xf32>
    %544 = arith.mulf %540, %540 : vector<8x1xf32>
    %545 = arith.addf %543, %544 : vector<8x1xf32>
    %cst_56 = arith.constant 1.000000e-07 : f32
    %546 = vector.broadcast %cst_56 : f32 to vector<8x1xf32>
    %547 = arith.maximumf %545, %546 : vector<8x1xf32>
    %548 = math.rsqrt %547 : vector<8x1xf32>
    %549 = arith.mulf %538, %548 : vector<8x1xf32>
    %550 = arith.mulf %539, %548 : vector<8x1xf32>
    %551 = arith.mulf %540, %548 : vector<8x1xf32>
    %552 = arith.subf %1, %492 : vector<8x1xf32>
    %553 = arith.subf %2, %498 : vector<8x1xf32>
    %554 = arith.subf %3, %504 : vector<8x1xf32>
    %555 = arith.mulf %552, %549 : vector<8x1xf32>
    %556 = arith.mulf %553, %550 : vector<8x1xf32>
    %557 = arith.addf %555, %556 : vector<8x1xf32>
    %558 = arith.mulf %554, %551 : vector<8x1xf32>
    %559 = arith.addf %557, %558 : vector<8x1xf32>
    %cst_57 = arith.constant 0.000000e+00 : f32
    %560 = vector.broadcast %cst_57 : f32 to vector<8x1xf32>
    %561 = arith.subf %560, %559 : vector<8x1xf32>
    %562 = arith.mulf %561, %549 : vector<8x1xf32>
    %563 = arith.addf %552, %562 : vector<8x1xf32>
    %564 = arith.mulf %561, %550 : vector<8x1xf32>
    %565 = arith.addf %553, %564 : vector<8x1xf32>
    %566 = arith.mulf %561, %551 : vector<8x1xf32>
    %567 = arith.addf %554, %566 : vector<8x1xf32>
    %568 = arith.mulf %563, %563 : vector<8x1xf32>
    %569 = arith.mulf %565, %565 : vector<8x1xf32>
    %570 = arith.addf %568, %569 : vector<8x1xf32>
    %571 = arith.mulf %567, %567 : vector<8x1xf32>
    %572 = arith.addf %570, %571 : vector<8x1xf32>
    %cst_58 = arith.constant 1.000000e-07 : f32
    %573 = vector.broadcast %cst_58 : f32 to vector<8x1xf32>
    %574 = arith.maximumf %572, %573 : vector<8x1xf32>
    %575 = math.rsqrt %574 : vector<8x1xf32>
    %576 = arith.mulf %563, %575 : vector<8x1xf32>
    %577 = arith.mulf %565, %575 : vector<8x1xf32>
    %578 = arith.mulf %567, %575 : vector<8x1xf32>
    %579 = arith.mulf %550, %578 : vector<8x1xf32>
    %580 = arith.mulf %551, %577 : vector<8x1xf32>
    %581 = arith.subf %579, %580 : vector<8x1xf32>
    %582 = arith.mulf %551, %576 : vector<8x1xf32>
    %583 = arith.mulf %549, %578 : vector<8x1xf32>
    %584 = arith.subf %582, %583 : vector<8x1xf32>
    %585 = arith.mulf %549, %577 : vector<8x1xf32>
    %586 = arith.mulf %550, %576 : vector<8x1xf32>
    %587 = arith.subf %585, %586 : vector<8x1xf32>
    %588 = arith.mulf %535, %549 : vector<8x1xf32>
    %589 = arith.mulf %537, %576 : vector<8x1xf32>
    %590 = arith.mulf %536, %581 : vector<8x1xf32>
    %591 = arith.subf %589, %590 : vector<8x1xf32>
    %592 = arith.mulf %534, %591 : vector<8x1xf32>
    %593 = arith.addf %588, %592 : vector<8x1xf32>
    %594 = arith.mulf %535, %550 : vector<8x1xf32>
    %595 = arith.mulf %537, %577 : vector<8x1xf32>
    %596 = arith.mulf %536, %584 : vector<8x1xf32>
    %597 = arith.subf %595, %596 : vector<8x1xf32>
    %598 = arith.mulf %534, %597 : vector<8x1xf32>
    %599 = arith.addf %594, %598 : vector<8x1xf32>
    %600 = arith.mulf %535, %551 : vector<8x1xf32>
    %601 = arith.mulf %537, %578 : vector<8x1xf32>
    %602 = arith.mulf %536, %587 : vector<8x1xf32>
    %603 = arith.subf %601, %602 : vector<8x1xf32>
    %604 = arith.mulf %534, %603 : vector<8x1xf32>
    %605 = arith.addf %600, %604 : vector<8x1xf32>
    %606 = arith.mulf %525, %593 : vector<8x1xf32>
    %607 = arith.addf %471, %606 : vector<8x1xf32>
    %608 = arith.mulf %525, %599 : vector<8x1xf32>
    %609 = arith.addf %477, %608 : vector<8x1xf32>
    %610 = arith.mulf %525, %605 : vector<8x1xf32>
    %611 = arith.addf %483, %610 : vector<8x1xf32>
    %cst_59 = arith.constant 1.000000e-07 : f32
    %612 = vector.broadcast %cst_59 : f32 to vector<8x1xf32>
    %613 = arith.maximumf %525, %612 : vector<8x1xf32>
    %614 = arith.mulf %613, %613 : vector<8x1xf32>
    %cst_60 = arith.constant 1.000000e-07 : f32
    %615 = vector.broadcast %cst_60 : f32 to vector<8x1xf32>
    %616 = arith.maximumf %534, %615 : vector<8x1xf32>
    %617 = arith.mulf %614, %616 : vector<8x1xf32>
    %618 = arith.mulf %524, %617 : vector<8x1xf32>
    %619 = vector.extract_strided_slice %449 {offsets = [0, 1], sizes = [8, 1], strides = [1, 1]} : vector<8x18xf32> to vector<8x1xf32>
    %620 = vector.extract_strided_slice %449 {offsets = [0, 4], sizes = [8, 1], strides = [1, 1]} : vector<8x18xf32> to vector<8x1xf32>
    %cst_61 = arith.constant 3.14159274 : f32
    %621 = vector.broadcast %cst_61 : f32 to vector<8x1xf32>
    %622 = arith.mulf %620, %621 : vector<8x1xf32>
    %623 = vector.extract_strided_slice %449 {offsets = [0, 7], sizes = [8, 1], strides = [1, 1]} : vector<8x18xf32> to vector<8x1xf32>
    %cst_62 = arith.constant 6.28318548 : f32
    %624 = vector.broadcast %cst_62 : f32 to vector<8x1xf32>
    %625 = arith.mulf %623, %624 : vector<8x1xf32>
    %cst_63 = arith.constant 3.14159274 : f32
    %626 = vector.broadcast %cst_63 : f32 to vector<8x1xf32>
    %627 = arith.subf %625, %626 : vector<8x1xf32>
    %628 = math.sin %622 : vector<8x1xf32>
    %629 = math.cos %622 : vector<8x1xf32>
    %630 = math.sin %627 : vector<8x1xf32>
    %631 = math.cos %627 : vector<8x1xf32>
    %632 = arith.subf %471, %492 : vector<8x1xf32>
    %633 = arith.subf %477, %498 : vector<8x1xf32>
    %634 = arith.subf %483, %504 : vector<8x1xf32>
    %635 = arith.mulf %632, %632 : vector<8x1xf32>
    %636 = arith.mulf %633, %633 : vector<8x1xf32>
    %637 = arith.addf %635, %636 : vector<8x1xf32>
    %638 = arith.mulf %634, %634 : vector<8x1xf32>
    %639 = arith.addf %637, %638 : vector<8x1xf32>
    %cst_64 = arith.constant 1.000000e-07 : f32
    %640 = vector.broadcast %cst_64 : f32 to vector<8x1xf32>
    %641 = arith.maximumf %639, %640 : vector<8x1xf32>
    %642 = math.rsqrt %641 : vector<8x1xf32>
    %643 = arith.mulf %632, %642 : vector<8x1xf32>
    %644 = arith.mulf %633, %642 : vector<8x1xf32>
    %645 = arith.mulf %634, %642 : vector<8x1xf32>
    %646 = arith.subf %506, %471 : vector<8x1xf32>
    %647 = arith.subf %508, %477 : vector<8x1xf32>
    %648 = arith.subf %510, %483 : vector<8x1xf32>
    %649 = arith.mulf %646, %643 : vector<8x1xf32>
    %650 = arith.mulf %647, %644 : vector<8x1xf32>
    %651 = arith.addf %649, %650 : vector<8x1xf32>
    %652 = arith.mulf %648, %645 : vector<8x1xf32>
    %653 = arith.addf %651, %652 : vector<8x1xf32>
    %cst_65 = arith.constant 0.000000e+00 : f32
    %654 = vector.broadcast %cst_65 : f32 to vector<8x1xf32>
    %655 = arith.subf %654, %653 : vector<8x1xf32>
    %656 = arith.mulf %655, %643 : vector<8x1xf32>
    %657 = arith.addf %646, %656 : vector<8x1xf32>
    %658 = arith.mulf %655, %644 : vector<8x1xf32>
    %659 = arith.addf %647, %658 : vector<8x1xf32>
    %660 = arith.mulf %655, %645 : vector<8x1xf32>
    %661 = arith.addf %648, %660 : vector<8x1xf32>
    %662 = arith.mulf %657, %657 : vector<8x1xf32>
    %663 = arith.mulf %659, %659 : vector<8x1xf32>
    %664 = arith.addf %662, %663 : vector<8x1xf32>
    %665 = arith.mulf %661, %661 : vector<8x1xf32>
    %666 = arith.addf %664, %665 : vector<8x1xf32>
    %cst_66 = arith.constant 1.000000e-07 : f32
    %667 = vector.broadcast %cst_66 : f32 to vector<8x1xf32>
    %668 = arith.maximumf %666, %667 : vector<8x1xf32>
    %669 = math.rsqrt %668 : vector<8x1xf32>
    %670 = arith.mulf %657, %669 : vector<8x1xf32>
    %671 = arith.mulf %659, %669 : vector<8x1xf32>
    %672 = arith.mulf %661, %669 : vector<8x1xf32>
    %673 = arith.mulf %644, %672 : vector<8x1xf32>
    %674 = arith.mulf %645, %671 : vector<8x1xf32>
    %675 = arith.subf %673, %674 : vector<8x1xf32>
    %676 = arith.mulf %645, %670 : vector<8x1xf32>
    %677 = arith.mulf %643, %672 : vector<8x1xf32>
    %678 = arith.subf %676, %677 : vector<8x1xf32>
    %679 = arith.mulf %643, %671 : vector<8x1xf32>
    %680 = arith.mulf %644, %670 : vector<8x1xf32>
    %681 = arith.subf %679, %680 : vector<8x1xf32>
    %682 = arith.mulf %629, %643 : vector<8x1xf32>
    %683 = arith.mulf %631, %670 : vector<8x1xf32>
    %684 = arith.mulf %630, %675 : vector<8x1xf32>
    %685 = arith.subf %683, %684 : vector<8x1xf32>
    %686 = arith.mulf %628, %685 : vector<8x1xf32>
    %687 = arith.addf %682, %686 : vector<8x1xf32>
    %688 = arith.mulf %629, %644 : vector<8x1xf32>
    %689 = arith.mulf %631, %671 : vector<8x1xf32>
    %690 = arith.mulf %630, %678 : vector<8x1xf32>
    %691 = arith.subf %689, %690 : vector<8x1xf32>
    %692 = arith.mulf %628, %691 : vector<8x1xf32>
    %693 = arith.addf %688, %692 : vector<8x1xf32>
    %694 = arith.mulf %629, %645 : vector<8x1xf32>
    %695 = arith.mulf %631, %672 : vector<8x1xf32>
    %696 = arith.mulf %630, %681 : vector<8x1xf32>
    %697 = arith.subf %695, %696 : vector<8x1xf32>
    %698 = arith.mulf %628, %697 : vector<8x1xf32>
    %699 = arith.addf %694, %698 : vector<8x1xf32>
    %700 = arith.mulf %619, %687 : vector<8x1xf32>
    %701 = arith.addf %492, %700 : vector<8x1xf32>
    %702 = arith.mulf %619, %693 : vector<8x1xf32>
    %703 = arith.addf %498, %702 : vector<8x1xf32>
    %704 = arith.mulf %619, %699 : vector<8x1xf32>
    %705 = arith.addf %504, %704 : vector<8x1xf32>
    %cst_67 = arith.constant 1.000000e-07 : f32
    %706 = vector.broadcast %cst_67 : f32 to vector<8x1xf32>
    %707 = arith.maximumf %619, %706 : vector<8x1xf32>
    %708 = arith.mulf %707, %707 : vector<8x1xf32>
    %cst_68 = arith.constant 1.000000e-07 : f32
    %709 = vector.broadcast %cst_68 : f32 to vector<8x1xf32>
    %710 = arith.maximumf %628, %709 : vector<8x1xf32>
    %711 = arith.mulf %708, %710 : vector<8x1xf32>
    %712 = arith.mulf %618, %711 : vector<8x1xf32>
    %713 = vector.extract_strided_slice %449 {offsets = [0, 2], sizes = [8, 1], strides = [1, 1]} : vector<8x18xf32> to vector<8x1xf32>
    %714 = vector.extract_strided_slice %449 {offsets = [0, 5], sizes = [8, 1], strides = [1, 1]} : vector<8x18xf32> to vector<8x1xf32>
    %cst_69 = arith.constant 3.14159274 : f32
    %715 = vector.broadcast %cst_69 : f32 to vector<8x1xf32>
    %716 = arith.mulf %714, %715 : vector<8x1xf32>
    %717 = vector.extract_strided_slice %449 {offsets = [0, 8], sizes = [8, 1], strides = [1, 1]} : vector<8x18xf32> to vector<8x1xf32>
    %cst_70 = arith.constant 6.28318548 : f32
    %718 = vector.broadcast %cst_70 : f32 to vector<8x1xf32>
    %719 = arith.mulf %717, %718 : vector<8x1xf32>
    %cst_71 = arith.constant 3.14159274 : f32
    %720 = vector.broadcast %cst_71 : f32 to vector<8x1xf32>
    %721 = arith.subf %719, %720 : vector<8x1xf32>
    %722 = math.sin %716 : vector<8x1xf32>
    %723 = math.cos %716 : vector<8x1xf32>
    %724 = math.sin %721 : vector<8x1xf32>
    %725 = math.cos %721 : vector<8x1xf32>
    %726 = arith.subf %1, %471 : vector<8x1xf32>
    %727 = arith.subf %2, %477 : vector<8x1xf32>
    %728 = arith.subf %3, %483 : vector<8x1xf32>
    %729 = arith.mulf %726, %726 : vector<8x1xf32>
    %730 = arith.mulf %727, %727 : vector<8x1xf32>
    %731 = arith.addf %729, %730 : vector<8x1xf32>
    %732 = arith.mulf %728, %728 : vector<8x1xf32>
    %733 = arith.addf %731, %732 : vector<8x1xf32>
    %cst_72 = arith.constant 1.000000e-07 : f32
    %734 = vector.broadcast %cst_72 : f32 to vector<8x1xf32>
    %735 = arith.maximumf %733, %734 : vector<8x1xf32>
    %736 = math.rsqrt %735 : vector<8x1xf32>
    %737 = arith.mulf %726, %736 : vector<8x1xf32>
    %738 = arith.mulf %727, %736 : vector<8x1xf32>
    %739 = arith.mulf %728, %736 : vector<8x1xf32>
    %740 = arith.subf %492, %1 : vector<8x1xf32>
    %741 = arith.subf %498, %2 : vector<8x1xf32>
    %742 = arith.subf %504, %3 : vector<8x1xf32>
    %743 = arith.mulf %740, %737 : vector<8x1xf32>
    %744 = arith.mulf %741, %738 : vector<8x1xf32>
    %745 = arith.addf %743, %744 : vector<8x1xf32>
    %746 = arith.mulf %742, %739 : vector<8x1xf32>
    %747 = arith.addf %745, %746 : vector<8x1xf32>
    %cst_73 = arith.constant 0.000000e+00 : f32
    %748 = vector.broadcast %cst_73 : f32 to vector<8x1xf32>
    %749 = arith.subf %748, %747 : vector<8x1xf32>
    %750 = arith.mulf %749, %737 : vector<8x1xf32>
    %751 = arith.addf %740, %750 : vector<8x1xf32>
    %752 = arith.mulf %749, %738 : vector<8x1xf32>
    %753 = arith.addf %741, %752 : vector<8x1xf32>
    %754 = arith.mulf %749, %739 : vector<8x1xf32>
    %755 = arith.addf %742, %754 : vector<8x1xf32>
    %756 = arith.mulf %751, %751 : vector<8x1xf32>
    %757 = arith.mulf %753, %753 : vector<8x1xf32>
    %758 = arith.addf %756, %757 : vector<8x1xf32>
    %759 = arith.mulf %755, %755 : vector<8x1xf32>
    %760 = arith.addf %758, %759 : vector<8x1xf32>
    %cst_74 = arith.constant 1.000000e-07 : f32
    %761 = vector.broadcast %cst_74 : f32 to vector<8x1xf32>
    %762 = arith.maximumf %760, %761 : vector<8x1xf32>
    %763 = math.rsqrt %762 : vector<8x1xf32>
    %764 = arith.mulf %751, %763 : vector<8x1xf32>
    %765 = arith.mulf %753, %763 : vector<8x1xf32>
    %766 = arith.mulf %755, %763 : vector<8x1xf32>
    %767 = arith.mulf %738, %766 : vector<8x1xf32>
    %768 = arith.mulf %739, %765 : vector<8x1xf32>
    %769 = arith.subf %767, %768 : vector<8x1xf32>
    %770 = arith.mulf %739, %764 : vector<8x1xf32>
    %771 = arith.mulf %737, %766 : vector<8x1xf32>
    %772 = arith.subf %770, %771 : vector<8x1xf32>
    %773 = arith.mulf %737, %765 : vector<8x1xf32>
    %774 = arith.mulf %738, %764 : vector<8x1xf32>
    %775 = arith.subf %773, %774 : vector<8x1xf32>
    %776 = arith.mulf %723, %737 : vector<8x1xf32>
    %777 = arith.mulf %725, %764 : vector<8x1xf32>
    %778 = arith.mulf %724, %769 : vector<8x1xf32>
    %779 = arith.subf %777, %778 : vector<8x1xf32>
    %780 = arith.mulf %722, %779 : vector<8x1xf32>
    %781 = arith.addf %776, %780 : vector<8x1xf32>
    %782 = arith.mulf %723, %738 : vector<8x1xf32>
    %783 = arith.mulf %725, %765 : vector<8x1xf32>
    %784 = arith.mulf %724, %772 : vector<8x1xf32>
    %785 = arith.subf %783, %784 : vector<8x1xf32>
    %786 = arith.mulf %722, %785 : vector<8x1xf32>
    %787 = arith.addf %782, %786 : vector<8x1xf32>
    %788 = arith.mulf %723, %739 : vector<8x1xf32>
    %789 = arith.mulf %725, %766 : vector<8x1xf32>
    %790 = arith.mulf %724, %775 : vector<8x1xf32>
    %791 = arith.subf %789, %790 : vector<8x1xf32>
    %792 = arith.mulf %722, %791 : vector<8x1xf32>
    %793 = arith.addf %788, %792 : vector<8x1xf32>
    %794 = arith.mulf %713, %781 : vector<8x1xf32>
    %795 = arith.addf %471, %794 : vector<8x1xf32>
    %796 = arith.mulf %713, %787 : vector<8x1xf32>
    %797 = arith.addf %477, %796 : vector<8x1xf32>
    %798 = arith.mulf %713, %793 : vector<8x1xf32>
    %799 = arith.addf %483, %798 : vector<8x1xf32>
    %cst_75 = arith.constant 1.000000e-07 : f32
    %800 = vector.broadcast %cst_75 : f32 to vector<8x1xf32>
    %801 = arith.maximumf %713, %800 : vector<8x1xf32>
    %802 = arith.mulf %801, %801 : vector<8x1xf32>
    %cst_76 = arith.constant 1.000000e-07 : f32
    %803 = vector.broadcast %cst_76 : f32 to vector<8x1xf32>
    %804 = arith.maximumf %722, %803 : vector<8x1xf32>
    %805 = arith.mulf %802, %804 : vector<8x1xf32>
    %806 = arith.mulf %712, %805 : vector<8x1xf32>
    %807 = math.log %806 : vector<8x1xf32>
    %cst_77 = arith.constant 8.94782066 : f32
    %808 = vector.broadcast %cst_77 : f32 to vector<8x1xf32>
    %809 = arith.addf %807, %808 : vector<8x1xf32>
    %cst_78 = arith.constant 1.83787704 : f32
    %810 = vector.broadcast %cst_78 : f32 to vector<8x1xf32>
    %811 = arith.addf %809, %810 : vector<8x1xf32>
    %812 = vector.broadcast %451 : vector<1x1xf32> to vector<8x1xf32>
    %813 = arith.addf %439, %812 : vector<8x1xf32>
    %814 = arith.addf %813, %811 : vector<8x1xf32>
    %cst_79 = arith.constant 0.000000e+00 : f32
    %815 = vector.broadcast %cst_79 : f32 to vector<8x103xf32>
    %816 = tpu.concatenate %1, %2, %3, %506, %508, %510, %514, %518, %522, %471, %477, %483, %492, %498, %504, %607 in 1 : vector<8x1xf32>, vector<8x1xf32>, vector<8x1xf32>, vector<8x1xf32>, vector<8x1xf32>, vector<8x1xf32>, vector<8x1xf32>, vector<8x1xf32>, vector<8x1xf32>, vector<8x1xf32>, vector<8x1xf32>, vector<8x1xf32>, vector<8x1xf32>, vector<8x1xf32>, vector<8x1xf32>, vector<8x1xf32> -> vector<8x16xf32>
    %817 = tpu.concatenate %609, %611, %701, %703, %705, %795, %797, %799, %814, %815 in 1 : vector<8x1xf32>, vector<8x1xf32>, vector<8x1xf32>, vector<8x1xf32>, vector<8x1xf32>, vector<8x1xf32>, vector<8x1xf32>, vector<8x1xf32>, vector<8x1xf32>, vector<8x103xf32> -> vector<8x112xf32>
    %818 = tpu.concatenate %816, %817 in 1 : vector<8x16xf32>, vector<8x112xf32> -> vector<8x128xf32>
    %c0_80 = arith.constant 0 : index
    %c0_81 = arith.constant 0 : index
    %819 = vector.load %arg4[%c0_80, %c0_81] : memref<8x128xf32, #tpu.memory_space<vmem>>, vector<8x128xf32>
    tpu.vector_store %arg4[%c0_80, %c0_81], %818 {strides = array<i32>} : memref<8x128xf32, #tpu.memory_space<vmem>>, vector<8x128xf32>,
    return
  }
  func.func @transform_0(%arg0: i32) -> (i32, i32) {
    %c0_i32 = arith.constant 0 : i32
    %c0_i32_0 = arith.constant 0 : i32
    return %arg0, %c0_i32 : i32, i32
  }
  func.func @transform_1(%arg0: i32) -> (i32, i32) {
    %c0_i32 = arith.constant 0 : i32
    %c0_i32_0 = arith.constant 0 : i32
    %c0_i32_1 = arith.constant 0 : i32
    return %c0_i32, %c0_i32_0 : i32, i32
  }
  func.func @transform_2(%arg0: i32) -> (i32, i32) {
    %c0_i32 = arith.constant 0 : i32
    %c0_i32_0 = arith.constant 0 : i32
    %c0_i32_1 = arith.constant 0 : i32
    return %c0_i32, %c0_i32_0 : i32, i32
  }
  func.func @transform_3(%arg0: i32) -> (i32, i32) {
    %c0_i32 = arith.constant 0 : i32
    %c0_i32_0 = arith.constant 0 : i32
    return %arg0, %c0_i32 : i32, i32
  }
}

</mosaic_0001>

<bundles_post_ra>
// kernel: forward.1
= control target key start
LH: loop header
LB: loop body
LE: loop exit
PB: predicated region body
PF: predicated region fallthrough
CT: control target
= control target key end

     0   :  { %s3503_s14 = smov 119   ;;  %s3504_s15 = smov 3   ;;  %s5522_s0 = inlined_call_operand.vmem [shape: f32[8,24], index: 0, kind: input, shape index: {}]   ;;  %s5523_s2 = inlined_call_operand.vmem [shape: f32[1,18], index: 2, kind: input, shape index: {}]   ;;  %s5524_s1 = inlined_call_operand.vmem [shape: f32[1,18], index: 1, kind: input, shape index: {}]   ;;  %s5525_s3 = inlined_call_operand.vmem [shape: f32[8,128], index: 3, kind: output, shape index: {}]  }
   0x1   :  { %v3574_v0 = vld [vmem:[%s5522_s0] sm:$0xff]  ;;  %s3505_s16 = smov 125   ;;  %s3506_s17 = smov 6  }
   0x2   :  { %813 = vrot.lane.b32.xlu2 %v3574_v0, %s3503_s14  ;;  %20 = vrot.lane.b32.xlu0 %v3574_v0, %s3504_s15  ;;  %s3507_s18 = smov 116   ;;  %s5529_s19 = smov 122  }
   0x3   :  { %423 = vrot.lane.b32.xlu1 %v3574_v0, %s3505_s16  ;;  %s3509_s20 = smov 127   ;;  %s3510_s21 = smov 126  }
   0x4   :  { %s5526_s22 = smov 12   ;;  %s3512_s23 = smov 2  }
   0x5   :  { %s3513_s24 = smov 1   ;;  %s3514_s25 = smov 9  }
   0x6   :  { %s3515_s26 = smov 21   ;;  %s3516_s27 = smov 7  }
   0x7   :  { %s5528_s28 = smov 115   ;;  %s3518_s29 = smov 19  }
   0x8   :  { %s3519_s30 = smov 114   ;;  %s3520_s4 = smov 11  }
   0x9   :  { %s3521_s5 = smov 121   ;;  %s5527_s6 = smov 10  }
   0xa   :  { %16 = vrot.lane.b32.xlu0 %v3574_v0, %s3506_s17  ;;  %173 = vrot.lane.b32.xlu2 %v3574_v0, %s3507_s18  ;;  %s3523_s7 = smov 8   ;;  %s3524_s8 = smov 120  }
   0xb   :  { %554 = vrot.lane.b32.xlu1 %v3574_v0, %s5529_s19  ;;  %s3525_s9 = smov 20   ;;  %s3526_s10 = smov 108  }
   0xc   :  { %s3527_s11 = smov 105   ;;  %s3528_s12 = smov 15  }
   0xd   :  { %s3529_s13 = smov 123  }
  0x5c   :  { %v814_v1 = vpop.permute.xlu2 %813 }
  0x5d   :  { %v3589_v2 = vsub.f32 %v3574_v0, %v814_v1 }
  0x5f   :  { %v827_v3 = vmul.f32 %v3589_v2, %v3589_v2 }
  0x61   :  { %829 = vrot.lane.b32.xlu2 %v827_v3, %s3509_s20 }
  0x64   :  { %v3625_v13 = vpop.permute.xlu2 %173 }
  0x69   :  { %833 = vrot.lane.b32.xlu2 %v827_v3, %s3510_s21 }
  0x74   :  { %v3595_v4 = vpop.permute.xlu0 %20 }
  0x75   :  { %5594 = vst [vmem:[#allocation2_spill] sm:$0xff] %v3595_v4  ;;  %v3599_v5 = vsub.f32 %v3574_v0, %v3595_v4  ;;  %v424_v6 = vpop.permute.xlu1 %423 }
  0x76   :  { %v3606_v8 = vsub.f32 %v3574_v0, %v424_v6 }
  0x77   :  { %v34_v7 = vmul.f32 %v3599_v5, %v3599_v5 }
  0x78   :  { %v427_v11 = vmul.f32 %v3606_v8, %v3606_v8 }
  0x79   :  { %40 = vrot.lane.b32.xlu1 %v34_v7, %s3510_s21  ;;  %36 = vrot.lane.b32.xlu0 %v34_v7, %s3509_s20 }
  0x7c   :  { %v17_v9 = vpop.permute.xlu0 %16 }
  0x7d   :  { %v3609_v10 = vsub.f32 %v3574_v0, %v17_v9  ;;  %v3627_v15 = vpop.permute.xlu1 %554 }
  0x7f   :  { %v3615_v12 = vmul.f32 %v3609_v10, %v3609_v10 }
  0x81   :  { %429 = vrot.lane.b32.xlu1 %v427_v11, %s3509_s20  ;;  %26 = vrot.lane.b32.xlu2 %v3615_v12, %s3509_s20 }
  0x82   :  { %809 = vrot.lane.b32.xlu0 %v3574_v0, %s5526_s22 }
  0x89   :  { %433 = vrot.lane.b32.xlu1 %v427_v11, %s3510_s21  ;;  %30 = vrot.lane.b32.xlu2 %v3615_v12, %s3510_s21 }
  0xbb   :  { %v830_v14 = vpop.permute.xlu2 %829 }
  0xbc   :  { %v832_v17 = vadd.f32 %v830_v14, %v827_v3 }
  0xc3   :  { %v834_v16 = vpop.permute.xlu2 %833 }
  0xc4   :  { %v836_v18 = vadd.f32 %v834_v16, %v832_v17 }
  0xc6   :  { %v848_v19 = vmax.f32 %v836_v18, 1e-07 }
  0xc8   :  { %3447 = vrsqrt.f32 %v848_v19  ;;  %vm855_vm4 = vweird.f32 %v848_v19 }
  0xce   :  { %v3448_v26 = vpop.eup %3447 }
  0xcf   :  { %v850_v27 = vmul.f32 %v3448_v26, %v848_v19  ;;  %vm856_vm3 = vweird.f32 %v3448_v26 }
  0xd0   :  { %vm857_vm5 = vmor %vm855_vm4, %vm856_vm3 }
  0xd1   :  { %v851_v31 = vmul.f32 %v3448_v26, %v850_v27 }
  0xd3   :  { %v852_v37 = vmul.f32 0.5, %v851_v31 }
  0xd5   :  { %v853_v40 = vsub.f32 1.5, %v852_v37 }
  0xd7   :  { %v854_v44 = vmul.f32 %v3448_v26, %v853_v40 }
  0xd9   :  { %v3638_v47 = vsel %vm857_vm5, %v3448_v26, %v854_v44 }
  0xda   :  { %v3664_v53 = vmul.f32 %v3638_v47, %v3589_v2 }
  0xdb   :  { %v3674_v54 = vpop.permute.xlu2 %26 }
  0xe3   :  { %v3676_v55 = vpop.permute.xlu2 %30 }
  0xeb   :  { %v41_v20 = vpop.permute.xlu1 %40  ;;  %v37_v21 = vpop.permute.xlu0 %36 }
  0xec   :  { %v39_v22 = vadd.f32 %v37_v21, %v34_v7 }
  0xee   :  { %v3629_v23 = vadd.f32 %v41_v20, %v39_v22 }
  0xf0   :  { %5595 = vst [vmem:[#allocation3_spill] sm:$0xff] %v3629_v23  ;;  %v55_v24 = vmax.f32 %v3629_v23, 1e-07 }
  0xf2   :  { %3449 = vrsqrt.f32 %v55_v24  ;;  %vm62_vm1 = vweird.f32 %v55_v24 }
  0xf3   :  { %v430_v25 = vpop.permute.xlu1 %429 }
  0xf4   :  { %v432_v30 = vadd.f32 %v430_v25, %v427_v11  ;;  %v810_v58 = vpop.permute.xlu0 %809 }
  0xf8   :  { %v3450_v28 = vpop.eup %3449 }
  0xf9   :  { %v57_v29 = vmul.f32 %v3450_v28, %v55_v24  ;;  %vm63_vm0 = vweird.f32 %v3450_v28 }
  0xfa   :  { %vm64_vm2 = vmor %vm62_vm1, %vm63_vm0 }
  0xfb   :  { %v58_v32 = vmul.f32 %v3450_v28, %v57_v29  ;;  %v434_v33 = vpop.permute.xlu1 %433 }
  0xfc   :  { %v436_v34 = vadd.f32 %v434_v33, %v432_v30  ;;  %v3777_v30 = vsub.f32 %v3574_v0, %v3625_v13 }
  0xfd   :  { %v59_v35 = vmul.f32 0.5, %v58_v32 }
  0xfe   :  { %v437_v36 = vmax.f32 %v436_v34, 1e-07 }
  0xff   :  { %v60_v38 = vsub.f32 1.5, %v59_v35 }
 0x100   :  { %3451 = vrsqrt.f32 %v437_v36  ;;  %vm444_vm7 = vweird.f32 %v437_v36 }
 0x101   :  { %v61_v39 = vmul.f32 %v3450_v28, %v60_v38 }
 0x103   :  { %v3632_v41 = vsel %vm64_vm2, %v3450_v28, %v61_v39 }
 0x104   :  { %5596 = vst [vmem:[#allocation4_spill] sm:$0xff] %v3632_v41  ;;  %169 = vrot.lane.b32.xlu0 %v3632_v41, %s3512_s23  ;;  %165 = vrot.lane.b32.xlu2 %v3632_v41, %s3513_s24  ;;  %v3646_v51 = vmul.f32 %v3632_v41, %v3599_v5 }
 0x106   :  { %v3452_v42 = vpop.eup %3451 }
 0x107   :  { %v439_v43 = vmul.f32 %v3452_v42, %v437_v36  ;;  %vm445_vm6 = vweird.f32 %v3452_v42  ;;  %v3785_v36 = vsub.f32 %v3574_v0, %v3627_v15 }
 0x108   :  { %vm446_vm8 = vmor %vm444_vm7, %vm445_vm6 }
 0x109   :  { %v440_v45 = vmul.f32 %v3452_v42, %v439_v43 }
 0x10b   :  { %v441_v46 = vmul.f32 0.5, %v440_v45 }
 0x10c   :  { %958 = vrot.lane.b32.xlu2 %v3638_v47, %s3513_s24 }
 0x10d   :  { %v442_v48 = vsub.f32 1.5, %v441_v46 }
 0x10f   :  { %v443_v49 = vmul.f32 %v3452_v42, %v442_v48 }
 0x111   :  { %v3642_v50 = vsel %vm446_vm8, %v3452_v42, %v443_v49 }
 0x112   :  { %546 = vrot.lane.b32.xlu1 %v3642_v50, %s3513_s24  ;;  %550 = vrot.lane.b32.xlu0 %v3642_v50, %s3512_s23  ;;  %v3656_v52 = vmul.f32 %v3642_v50, %v3606_v8 }
 0x114   :  { %178 = vrot.lane.b32.xlu2 %v3646_v51, %s3504_s15 }
 0x11a   :  { %962 = vrot.lane.b32.xlu1 %v3638_v47, %s3512_s23  ;;  %559 = vrot.lane.b32.xlu0 %v3656_v52, %s3514_s25 }
 0x122   :  { %967 = vrot.lane.b32.xlu1 %v3664_v53, %s3515_s26  ;;  %223 = vrot.lane.b32.xlu0 %v3646_v51, %s3507_s18 }
 0x12a   :  { %604 = vrot.lane.b32.xlu0 %v3656_v52, %s5529_s19 }
 0x132   :  { %1012 = vrot.lane.b32.xlu0 %v3664_v53, %s5526_s22 }
 0x15e   :  { %v166_v56 = vpop.permute.xlu2 %165 }
 0x15f   :  { %v3679_v57 = vmul.f32 %v166_v56, %v3599_v5 }
 0x161   :  { %183 = vrot.lane.b32.xlu0 %v3679_v57, %s3504_s15  ;;  %205 = vrot.lane.b32.xlu2 %v3679_v57, %s3512_s23 }
 0x166   :  { %v959_v61 = vpop.permute.xlu2 %958 }
 0x167   :  { %v3693_v62 = vmul.f32 %v959_v61, %v3589_v2 }
 0x16e   :  { %v3769_v21 = vpop.permute.xlu2 %178 }
 0x176   :  { %v170_v59 = vpop.permute.xlu0 %169 }
 0x177   :  { %v3686_v60 = vmul.f32 %v170_v59, %v3599_v5 }
 0x179   :  { %214 = vrot.lane.b32.xlu0 %v3686_v60, %s3513_s24  ;;  %193 = vrot.lane.b32.xlu1 %v3686_v60, %s3504_s15 }
 0x181   :  { %972 = vrot.lane.b32.xlu0 %v3693_v62, %s3515_s26 }
 0x184   :  { %v547_v63 = vpop.permute.xlu1 %546  ;;  %v551_v1 = vpop.permute.xlu0 %550 }
 0x185   :  { %v3698_v3 = vmul.f32 %v547_v63, %v3606_v8  ;;  %v3701_v6 = vmul.f32 %v551_v1, %v3606_v8 }
 0x187   :  { %564 = vrot.lane.b32.xlu1 %v3698_v3, %s3514_s25  ;;  %574 = vrot.lane.b32.xlu2 %v3701_v6, %s3514_s25 }
 0x189   :  { %227 = vrot.lane.b32.xlu0 %v3679_v57, %s3507_s18 }
 0x18c   :  { %v963_v7 = vpop.permute.xlu1 %962  ;;  %v3735_v11 = vpop.permute.xlu0 %559 }
 0x18d   :  { %v3710_v9 = vmul.f32 %v963_v7, %v3589_v2 }
 0x18f   :  { %982 = vrot.lane.b32.xlu1 %v3710_v9, %s3515_s26  ;;  %608 = vrot.lane.b32.xlu2 %v3698_v3, %s5529_s19 }
 0x191   :  { %236 = vrot.lane.b32.xlu0 %v3686_v60, %s3507_s18 }
 0x194   :  { %v3743_v14 = vpop.permute.xlu0 %223  ;;  %v3761_v20 = vpop.permute.xlu1 %967 }
 0x197   :  { %1016 = vrot.lane.b32.xlu1 %v3693_v62, %s5526_s22  ;;  %617 = vrot.lane.b32.xlu2 %v3701_v6, %s5529_s19  ;;  %s3536_s19 = smov 4  }
 0x199   :  { %1025 = vrot.lane.b32.xlu0 %v3710_v9, %s5526_s22  ;;  %s3533_s22 = smov 124  }
 0x19c   :  { %v3750_v16 = vpop.permute.xlu0 %604 }
 0x19f   :  { %595 = vrot.lane.b32.xlu1 %v3701_v6, %s3516_s27  ;;  %248 = vrot.lane.b32.xlu2 %v3679_v57, %s5528_s28  ;;  %s3535_s28 = smov 106  }
 0x1a1   :  { %1003 = vrot.lane.b32.xlu0 %v3710_v9, %s3518_s29  ;;  %s3530_s29 = smov 117  }
 0x1a4   :  { %v3752_v17 = vpop.permute.xlu0 %1012 }
 0x1a7   :  { %257 = vrot.lane.b32.xlu1 %v3686_v60, %s3519_s30  ;;  %1037 = vrot.lane.b32.xlu2 %v3693_v62, %s3520_s4 }
 0x1a9   :  { %629 = vrot.lane.b32.xlu0 %v3698_v3, %s3521_s5 }
 0x1af   :  { %1046 = vrot.lane.b32.xlu1 %v3710_v9, %s5527_s6  ;;  %586 = vrot.lane.b32.xlu2 %v3698_v3, %s3523_s7 }
 0x1b1   :  { %638 = vrot.lane.b32.xlu0 %v3701_v6, %s3524_s8 }
 0x1b7   :  { %449 = vrot.lane.b32.xlu1 %v3606_v8, %s3514_s25  ;;  %861 = vrot.lane.b32.xlu2 %v3589_v2, %s3515_s26  ;;  %v3759_v8 = vsub.f32 %v3574_v0, %v810_v58 }
 0x1b9   :  { %994 = vrot.lane.b32.xlu0 %v3693_v62, %s3525_s9  ;;  %v3765_v2 = vmul.f32 %v3759_v8, %v3759_v8  ;;  %s3531_s9 = smov 109  }
 0x1d3   :  { %v184_v18 = vpop.permute.xlu0 %183 }
 0x1d4   :  { %v186_v19 = vmul.f32 %v184_v18, %v3609_v10 }
 0x1d6   :  { %188 = vrot.lane.b32.xlu0 %v186_v19, %s3509_s20 }
 0x1de   :  { %68 = vrot.lane.b32.xlu0 %v3599_v5, %s3504_s15  ;;  %v206_v5 = vpop.permute.xlu2 %205 }
 0x1e6   :  { %819 = vrot.lane.b32.xlu0 %v3765_v2, %s3509_s20  ;;  %v575_v28 = vpop.permute.xlu2 %574 }
 0x1e7   :  { %v577_v37 = vmul.f32 %v575_v28, %v3609_v10 }
 0x1eb   :  { %v194_v22 = vpop.permute.xlu1 %193  ;;  %v215_v24 = vpop.permute.xlu0 %214 }
 0x1ec   :  { %v196_v25 = vmul.f32 %v194_v22, %v3609_v10 }
 0x1ee   :  { %198 = vrot.lane.b32.xlu1 %v196_v25, %s3510_s21  ;;  %v609_v34 = vpop.permute.xlu2 %608 }
 0x1ef   :  { %v611_v13 = vmul.f32 %v609_v34, %v3785_v36 }
 0x1f3   :  { %v973_v26 = vpop.permute.xlu0 %972 }
 0x1f4   :  { %v975_v27 = vmul.f32 %v973_v26, %v3759_v8  ;;  %v181_v26 = vmul.f32 %v3769_v21, %v3609_v10 }
 0x1f6   :  { %977 = vrot.lane.b32.xlu1 %v975_v27, %s3509_s20  ;;  %v618_v15 = vpop.permute.xlu2 %617 }
 0x1f7   :  { %v620_v45 = vmul.f32 %v618_v15, %v3785_v36 }
 0x1f9   :  { %v565_v29 = vpop.permute.xlu1 %564 }
 0x1fa   :  { %v567_v31 = vmul.f32 %v565_v29, %v3609_v10 }
 0x1fb   :  { %v228_v32 = vpop.permute.xlu0 %227 }
 0x1fc   :  { %v230_v33 = vmul.f32 %v228_v32, %v3777_v30  ;;  %569 = vrot.lane.b32.xlu2 %v567_v31, %s3509_s20  ;;  %v562_v31 = vmul.f32 %v3735_v11, %v3609_v10 }
 0x1fe   :  { %232 = vrot.lane.b32.xlu1 %v230_v33, %s3509_s20  ;;  %v249_v46 = vpop.permute.xlu2 %248 }
 0x201   :  { %v983_v35 = vpop.permute.xlu1 %982 }
 0x202   :  { %v985_v40 = vmul.f32 %v983_v35, %v3759_v8 }
 0x203   :  { %v237_v38 = vpop.permute.xlu0 %236 }
 0x204   :  { %579 = vrot.lane.b32.xlu2 %v577_v37, %s3510_s21  ;;  %v239_v0 = vmul.f32 %v237_v38, %v3777_v30 }
 0x206   :  { %613 = vrot.lane.b32.xlu1 %v611_v13, %s3509_s20  ;;  %v3801_v49 = vpop.permute.xlu2 %1037 }
 0x209   :  { %v1017_v39 = vpop.permute.xlu1 %1016 }
 0x20a   :  { %v1019_v42 = vmul.f32 %v1017_v39, %v3759_v8  ;;  %v970_v39 = vmul.f32 %v3761_v20, %v3759_v8 }
 0x20b   :  { %v1026_v43 = vpop.permute.xlu0 %1025 }
 0x20c   :  { %v1028_v44 = vmul.f32 %v1026_v43, %v3759_v8  ;;  %987 = vrot.lane.b32.xlu2 %v985_v40, %s3510_s21  ;;  %1021 = vrot.lane.b32.xlu0 %v1019_v42, %s3509_s20 }
 0x20e   :  { %1030 = vrot.lane.b32.xlu1 %v1028_v44, %s3510_s21  ;;  %v3803_v59 = vpop.permute.xlu2 %586 }
 0x211   :  { %v596_v56 = vpop.permute.xlu1 %595 }
 0x213   :  { %v1004_v48 = vpop.permute.xlu0 %1003 }
 0x214   :  { %241 = vrot.lane.b32.xlu2 %v239_v0, %s3510_s21 }
 0x216   :  { %v3805_v1 = vpop.permute.xlu2 %861 }
 0x219   :  { %v258_v61 = vpop.permute.xlu1 %257 }
 0x21b   :  { %v630_v58 = vpop.permute.xlu0 %629 }
 0x21c   :  { %622 = vrot.lane.b32.xlu2 %v620_v45, %s3510_s21 }
 0x221   :  { %v1047_v7 = vpop.permute.xlu1 %1046 }
 0x223   :  { %v639_v63 = vpop.permute.xlu0 %638 }
 0x229   :  { %v3809_v22 = vpop.permute.xlu1 %449 }
 0x22b   :  { %v3807_v18 = vpop.permute.xlu0 %994 }
 0x248   :  { %v189_v25 = vpop.permute.xlu0 %188 }
 0x249   :  { %v191_v28 = vadd.f32 %v189_v25, %v181_v26 }
 0x250   :  { %v3822_v0 = vpop.permute.xlu0 %68 }
 0x256   :  { %v570_v19 = vpop.permute.xlu2 %569 }
 0x257   :  { %v572_v33 = vadd.f32 %v570_v19, %v562_v31  ;;  %v607_v31 = vmul.f32 %v3750_v16, %v3785_v36 }
 0x25e   :  { %v580_v27 = vpop.permute.xlu2 %579 }
 0x25f   :  { %v582_v35 = vadd.f32 %v580_v27, %v572_v33 }
 0x260   :  { %v199_v29 = vpop.permute.xlu1 %198 }
 0x261   :  { %v3815_v32 = vadd.f32 %v199_v29, %v191_v28  ;;  %v583_v42 = vsub.f32 0.0, %v582_v35  ;;  %v3828_v29 = vpop.permute.xlu0 %819 }
 0x263   :  { %v202_v34 = vsub.f32 0.0, %v3815_v32  ;;  %v598_v45 = vmul.f32 %v596_v56, %v583_v42  ;;  %vm1358_vm12 = vcmp.ne.f32.partialorder %v3815_v32, %v3815_v32  ;;  %vm1354_vm7 = vcmp.lt.s32.totalorder %v3815_v32, 0 }
 0x264   :  { %vm1351_vm8 = vcmp.lt.f32.partialorder %v3815_v32, 0.0 }
 0x265   :  { %v217_v37 = vmul.f32 %v215_v24, %v202_v34  ;;  %v208_v38 = vmul.f32 %v206_v5, %v202_v34  ;;  %v226_v24 = vmul.f32 %v3743_v14, %v3777_v30 }
 0x266   :  { %v988_v13 = vpop.permute.xlu2 %987 }
 0x267   :  { %219 = vrot.lane.b32.xlu1 %v217_v37, %s3512_s23  ;;  %210 = vrot.lane.b32.xlu0 %v208_v38, %s3513_s24  ;;  %v203_v38 = vmul.f32 %v202_v34, %v3769_v21 }
 0x268   :  { %v978_v40 = vpop.permute.xlu1 %977 }
 0x269   :  { %v980_v43 = vadd.f32 %v978_v40, %v970_v39  ;;  %v1015_v39 = vmul.f32 %v3752_v17, %v3759_v8 }
 0x26b   :  { %v990_v44 = vadd.f32 %v988_v13, %v980_v43 }
 0x26d   :  { %v991_v15 = vsub.f32 0.0, %v990_v44 }
 0x26e   :  { %v242_v19 = vpop.permute.xlu2 %241 }
 0x26f   :  { %600 = vrot.lane.b32.xlu1 %v598_v45, %s3512_s23  ;;  %v1006_v5 = vmul.f32 %v1004_v48, %v991_v15 }
 0x270   :  { %v233_v25 = vpop.permute.xlu1 %232 }
 0x271   :  { %v235_v26 = vadd.f32 %v233_v25, %v226_v24  ;;  %1008 = vrot.lane.b32.xlu2 %v1006_v5, %s3512_s23  ;;  %v584_v25 = vmul.f32 %v583_v42, %v3735_v11 }
 0x273   :  { %v244_v27 = vadd.f32 %v242_v19, %v235_v26  ;;  %v589_v19 = vmul.f32 %v3803_v59, %v583_v42  ;;  %v997_v26 = vmul.f32 %v3807_v18, %v991_v15 }
 0x275   :  { %v245_v28 = vsub.f32 0.0, %v244_v27 }
 0x276   :  { %v623_v48 = vpop.permute.xlu2 %622 }
 0x277   :  { %v260_v33 = vmul.f32 %v258_v61, %v245_v28  ;;  %v251_v56 = vmul.f32 %v249_v46, %v245_v28  ;;  %v3841_v46 = vadd.f32 %v203_v38, %v3609_v10 }
 0x278   :  { %v614_v35 = vpop.permute.xlu1 %613 }
 0x279   :  { %v616_v37 = vadd.f32 %v614_v35, %v607_v31  ;;  %262 = vrot.lane.b32.xlu2 %v260_v33, %s3512_s23  ;;  %253 = vrot.lane.b32.xlu0 %v251_v56, %s3513_s24  ;;  %v246_v56 = vmul.f32 %v245_v28, %v3743_v14 }
 0x27b   :  { %v625_v13 = vadd.f32 %v623_v48, %v616_v37  ;;  %v3894_v48 = vadd.f32 %v246_v56, %v3777_v30 }
 0x27d   :  { %v3837_v40 = vsub.f32 0.0, %v625_v13 }
 0x27e   :  { %v1022_v43 = vpop.permute.xlu0 %1021 }
 0x27f   :  { %v1024_v44 = vadd.f32 %v1022_v43, %v1015_v39  ;;  %v632_v61 = vmul.f32 %v630_v58, %v3837_v40  ;;  %v641_v5 = vmul.f32 %v639_v63, %v3837_v40  ;;  %v992_v63 = vmul.f32 %v991_v15, %v3761_v20 }
 0x280   :  { %v1031_v45 = vpop.permute.xlu1 %1030 }
 0x281   :  { %v1033_v24 = vadd.f32 %v1031_v45, %v1024_v44  ;;  %634 = vrot.lane.b32.xlu1 %v632_v61, %s3513_s24  ;;  %324 = vrot.lane.b32.xlu2 %v3841_v46, %s3510_s21 }
 0x283   :  { %v3846_v21 = vsub.f32 0.0, %v1033_v24 }
 0x285   :  { %v1040_v34 = vmul.f32 %v3801_v49, %v3846_v21  ;;  %v1049_v58 = vmul.f32 %v1047_v7, %v3846_v21  ;;  %v3861_v49 = vadd.f32 %v584_v25, %v3609_v10  ;;  %v3867_v7 = vadd.f32 %v992_v63, %v3759_v8 }
 0x287   :  { %1042 = vrot.lane.b32.xlu0 %v1040_v34, %s3513_s24 }
 0x289   :  { %643 = vrot.lane.b32.xlu1 %v641_v5, %s3512_s23 }
 0x28f   :  { %1051 = vrot.lane.b32.xlu0 %v1049_v58, %s3512_s23 }
 0x291   :  { %591 = vrot.lane.b32.xlu1 %v589_v19, %s3513_s24 }
 0x297   :  { %999 = vrot.lane.b32.xlu0 %v997_v26, %s3513_s24 }
 0x299   :  { %705 = vrot.lane.b32.xlu1 %v3861_v49, %s3524_s8 }
 0x29f   :  { %1113 = vrot.lane.b32.xlu0 %v3867_v7, %s3526_s10 }
 0x2cb   :  { %v1009_v11 = vpop.permute.xlu2 %1008 }
 0x2cc   :  { %v3872_v59 = vadd.f32 %v1009_v11, %v3759_v8  ;;  %v627_v11 = vmul.f32 %v3837_v40, %v3750_v16 }
 0x2ce   :  { %1100 = vrot.lane.b32.xlu0 %v3872_v59, %s3527_s11  ;;  %s3532_s11 = smov 118  }
 0x2d3   :  { %v263_v18 = vpop.permute.xlu2 %262 }
 0x2d4   :  { %v265_v42 = vadd.f32 %v263_v18, %v3777_v30  ;;  %v3938_v18 = vadd.f32 %v627_v11, %v3785_v36 }
 0x2d6   :  { %282 = vrot.lane.b32.xlu0 %v265_v42, %s3528_s12 }
 0x2d9   :  { %v220_v20 = vpop.permute.xlu1 %219  ;;  %v211_v33 = vpop.permute.xlu0 %210 }
 0x2da   :  { %v3878_v15 = vadd.f32 %v220_v20, %v3609_v10  ;;  %v3908_v61 = vadd.f32 %v211_v33, %v3609_v10  ;;  %v1035_v33 = vmul.f32 %v3846_v21, %v3752_v17 }
 0x2db   :  { %v325_v63 = vpop.permute.xlu2 %324 }
 0x2dc   :  { %311 = vrot.lane.b32.xlu2 %v3878_v15, %s3529_s13  ;;  %v1218_v5 = vmul.f32 %v3908_v61, %v3908_v61  ;;  %v1224_v58 = vmul.f32 %v3878_v15, %v3878_v15  ;;  %v3948_v56 = vadd.f32 %v1035_v33, %v3759_v8 }
 0x2de   :  { %307 = vrot.lane.b32.xlu0 %v3841_v46, %s3509_s20 }
 0x2e1   :  { %v601_v27 = vpop.permute.xlu1 %600 }
 0x2e2   :  { %v3885_v31 = vadd.f32 %v601_v27, %v3609_v10 }
 0x2e4   :  { %692 = vrot.lane.b32.xlu1 %v3885_v31, %s3530_s29 }
 0x2e6   :  { %1096 = vrot.lane.b32.xlu0 %v3867_v7, %s3531_s9 }
 0x2eb   :  { %v254_v35 = vpop.permute.xlu0 %253 }
 0x2ec   :  { %v256_v37 = vadd.f32 %v254_v35, %v3777_v30  ;;  %v327_v35 = vmul.f32 %v325_v63, %v3679_v57 }
 0x2ee   :  { %267 = vrot.lane.b32.xlu0 %v3894_v48, %s3528_s12  ;;  %272 = vrot.lane.b32.xlu2 %v256_v37, %s3528_s12 }
 0x2f3   :  { %v635_v38 = vpop.permute.xlu1 %634 }
 0x2f4   :  { %v637_v13 = vadd.f32 %v635_v38, %v3785_v36 }
 0x2f6   :  { %653 = vrot.lane.b32.xlu1 %v637_v13, %s3528_s12  ;;  %346 = vrot.lane.b32.xlu0 %v265_v42, %s5527_s6  ;;  %s3534_s6 = smov 13  }
 0x2f9   :  { %v1043_v39 = vpop.permute.xlu0 %1042 }
 0x2fa   :  { %v1045_v28 = vadd.f32 %v1043_v39, %v3759_v8 }
 0x2fb   :  { %v644_v14 = vpop.permute.xlu1 %643 }
 0x2fc   :  { %v646_v43 = vadd.f32 %v644_v14, %v3785_v36 }
 0x2fe   :  { %663 = vrot.lane.b32.xlu2 %v646_v43, %s3528_s12  ;;  %1126 = vrot.lane.b32.xlu0 %v1045_v28, %s3530_s29 }
 0x2ff   :  { %1061 = vrot.lane.b32.xlu1 %v1045_v28, %s3514_s25 }
 0x301   :  { %v1052_v30 = vpop.permute.xlu0 %1051 }
 0x302   :  { %v1054_v45 = vadd.f32 %v1052_v30, %v3759_v8 }
 0x303   :  { %v592_v44 = vpop.permute.xlu1 %591 }
 0x304   :  { %v594_v26 = vadd.f32 %v592_v44, %v3609_v10  ;;  %v3972_v44 = vmul.f32 %v3822_v0, %v3609_v10 }
 0x306   :  { %297 = vrot.lane.b32.xlu2 %v3908_v61, %s3510_s21 }
 0x307   :  { %1071 = vrot.lane.b32.xlu1 %v1054_v45, %s3514_s25 }
 0x309   :  { %v1000_v19 = vpop.permute.xlu0 %999 }
 0x30a   :  { %v1002_v25 = vadd.f32 %v1000_v19, %v3759_v8 }
 0x30b   :  { %v706_v24 = vpop.permute.xlu1 %705 }
 0x30c   :  { %v708_v34 = vmul.f32 %v706_v24, %v3698_v3 }
 0x30e   :  { %688 = vrot.lane.b32.xlu2 %v3861_v49, %s3521_s5  ;;  %710 = vrot.lane.b32.xlu0 %v708_v34, %s3509_s20 }
 0x30f   :  { %1220 = vrot.lane.b32.xlu1 %v1218_v5, %s3509_s20  ;;  %v1217_v5 = vmul.f32 %v3841_v46, %v3841_v46 }
 0x311   :  { %v1114_v27 = vpop.permute.xlu0 %1113 }
 0x312   :  { %v1116_v40 = vmul.f32 %v1114_v27, %v3693_v62 }
 0x316   :  { %1226 = vrot.lane.b32.xlu2 %v1224_v58, %s3510_s21  ;;  %v3986_v58 = vmul.f32 %v3809_v22, %v3609_v10 }
 0x317   :  { %823 = vrot.lane.b32.xlu1 %v3765_v2, %s3510_s21 }
 0x31e   :  { %1086 = vrot.lane.b32.xlu2 %v1002_v25, %s3526_s10 }
 0x31f   :  { %678 = vrot.lane.b32.xlu1 %v594_v26, %s3524_s8 }
 0x326   :  { %701 = vrot.lane.b32.xlu2 %v594_v26, %s3532_s11 }
 0x327   :  { %320 = vrot.lane.b32.xlu1 %v3908_v61, %s3533_s22 }
 0x32e   :  { %337 = vrot.lane.b32.xlu2 %v256_v37, %s3534_s6 }
 0x32f   :  { %1109 = vrot.lane.b32.xlu1 %v1002_v25, %s3535_s28 }
 0x336   :  { %v312_v42 = vpop.permute.xlu2 %311  ;;  %648 = vrot.lane.b32.xlu2 %v3938_v18, %s3528_s12  ;;  %s3542_s12 = smov 112  }
 0x337   :  { %v314_v20 = vmul.f32 %v312_v42, %v3646_v51  ;;  %718 = vrot.lane.b32.xlu1 %v637_v13, %s3516_s27 }
 0x339   :  { %316 = vrot.lane.b32.xlu0 %v314_v20, %s3512_s23 }
 0x33e   :  { %727 = vrot.lane.b32.xlu2 %v646_v43, %s3536_s19 }
 0x33f   :  { %1056 = vrot.lane.b32.xlu1 %v3948_v56, %s3514_s25 }
 0x340   :  { %v1101_v16 = vpop.permute.xlu0 %1100 }
 0x341   :  { %v1103_v36 = vmul.f32 %v1101_v16, %v3664_v53 }
 0x343   :  { %1105 = vrot.lane.b32.xlu0 %v1103_v36, %s3512_s23  ;;  %v1295_v36 = vmul.f32 %v3815_v32, %v3815_v32 }
 0x346   :  { %1118 = vrot.lane.b32.xlu2 %v1116_v40, %s3509_s20  ;;  %v4009_v40 = vand.u32 2147483647, %v3815_v32 }
 0x347   :  { %329 = vrot.lane.b32.xlu1 %v327_v35, %s3509_s20 }
 0x348   :  { %v273_v17 = vpop.permute.xlu2 %272  ;;  %v283_v33 = vpop.permute.xlu0 %282  ;;  %vm1364_vm0 = vcmp.eq.s32.totalorder %v4009_v40, inf }
 0x349   :  { %v275_v21 = vmul.f32 %v273_v17, %v3908_v61 }
 0x34e   :  { %277 = vrot.lane.b32.xlu2 %v275_v21, %s3509_s20 }
 0x356   :  { %v693_v37 = vpop.permute.xlu1 %692 }
 0x357   :  { %v695_v38 = vmul.f32 %v693_v37, %v3656_v52 }
 0x358   :  { %v3963_v13 = vpop.permute.xlu2 %663 }
 0x359   :  { %697 = vrot.lane.b32.xlu1 %v695_v38, %s3512_s23 }
 0x360   :  { %v3966_v28 = vpop.permute.xlu2 %297 }
 0x368   :  { %v654_v39 = vpop.permute.xlu1 %653  ;;  %v3974_v24 = vpop.permute.xlu2 %688 }
 0x369   :  { %v656_v14 = vmul.f32 %v654_v39, %v594_v26 }
 0x36b   :  { %658 = vrot.lane.b32.xlu1 %v656_v14, %s3509_s20 }
 0x370   :  { %v1227_v19 = vpop.permute.xlu2 %1226 }
 0x371   :  { %v1062_v43 = vpop.permute.xlu1 %1061 }
 0x372   :  { %v1064_v30 = vmul.f32 %v1062_v43, %v1002_v25  ;;  %v285_v43 = vmul.f32 %v283_v33, %v3878_v15 }
 0x373   :  { %1135 = vrot.lane.b32.xlu1 %v1054_v45, %s3519_s30 }
 0x374   :  { %1066 = vrot.lane.b32.xlu0 %v1064_v30, %s3509_s20 }
 0x379   :  { %v3976_v34 = vpop.permute.xlu1 %1071 }
 0x37b   :  { %73 = vrot.lane.b32.xlu1 %v3972_v44, %s3509_s20 }
 0x37c   :  { %77 = vrot.lane.b32.xlu0 %v3972_v44, %s3510_s21 }
 0x381   :  { %v1221_v45 = vpop.permute.xlu1 %1220 }
 0x382   :  { %v1223_v0 = vadd.f32 %v1221_v45, %v1217_v5  ;;  %v4044_v5 = vpop.permute.xlu0 %307 }
 0x383   :  { %82 = vrot.lane.b32.xlu1 %v3632_v41, %s3504_s15 }
 0x384   :  { %v1229_v25 = vadd.f32 %v1227_v19, %v1223_v0  ;;  %458 = vrot.lane.b32.xlu0 %v3986_v58, %s3510_s21  ;;  %v1087_v19 = vpop.permute.xlu2 %1086 }
 0x386   :  { %v1230_v26 = vmax.f32 %v1229_v25, 1e-07 }
 0x388   :  { %3453 = vrsqrt.f32 %v1230_v26  ;;  %vm1237_vm10 = vweird.f32 %v1230_v26 }
 0x389   :  { %v3996_v22 = vpop.permute.xlu1 %823 }
 0x38b   :  { %463 = vrot.lane.b32.xlu1 %v3642_v50, %s3514_s25 }
 0x38c   :  { %875 = vrot.lane.b32.xlu0 %v3638_v47, %s3515_s26 }
 0x38e   :  { %v3454_v63 = vpop.eup %3453 }
 0x38f   :  { %v1232_v10 = vmul.f32 %v3454_v63, %v1230_v26  ;;  %vm1238_vm9 = vweird.f32 %v3454_v63  ;;  %v666_v26 = vmul.f32 %v3963_v13, %v3885_v31 }
 0x390   :  { %vm1239_vm11 = vmor %vm1237_vm10, %vm1238_vm9 }
 0x391   :  { %v1233_v11 = vmul.f32 %v3454_v63, %v1232_v10  ;;  %v4011_v35 = vpop.permute.xlu1 %678  ;;  %v1089_v10 = vmul.f32 %v1087_v19, %v3710_v9 }
 0x392   :  { %v681_v30 = vmul.f32 %v4011_v35, %v3701_v6 }
 0x393   :  { %292 = vrot.lane.b32.xlu1 %v3878_v15, %s3533_s22  ;;  %v1234_v42 = vmul.f32 0.5, %v1233_v11 }
 0x395   :  { %v1235_v20 = vsub.f32 1.5, %v1234_v42 }
 0x397   :  { %v1236_v27 = vmul.f32 %v3454_v63, %v1235_v20 }
 0x399   :  { %v1240_v16 = vsel %vm1239_vm11, %v3454_v63, %v1236_v27  ;;  %v4048_v45 = vpop.permute.xlu1 %320  ;;  %v4055_v27 = vpop.permute.xlu0 %1096 }
 0x39a   :  { %v4001_v50 = vmul.f32 %v1240_v16, %v3841_v46  ;;  %v4003_v47 = vmul.f32 %v1240_v16, %v1229_v25  ;;  %1247 = vrot.lane.b32.xlu2 %v1240_v16, %s3512_s23 }
 0x39c   :  { %v1296_v17 = vmul.f32 %v4003_v47, %v4003_v47  ;;  %v4016_v21 = vand.u32 2147483647, %v4003_v47  ;;  %1267 = vrot.lane.b32.xlu1 %v4001_v50, %s3509_s20  ;;  %vm1359_vm13 = vcmp.ne.f32.partialorder %v4003_v47, %v4003_v47  ;;  %vm1356_vm9 = vcmp.eq.f32.partialorder %v4003_v47, 0.0 }
 0x39d   :  { %vm4024_vm14 = vmor %vm1358_vm12, %vm1359_vm13 }
 0x39e   :  { %v4028_v38 = vadd.f32 %v1296_v17, %v1295_v36  ;;  %v1313_v39 = vmin.f32 %v4009_v40, %v4016_v21  ;;  %v1314_v14 = vmax.f32 %v4009_v40, %v4016_v21  ;;  %vm1348_vm15 = vcmp.gt.f32.partialorder %v4016_v21, %v4009_v40 }
 0x39f   :  { %vm1365_vm1 = vcmp.eq.s32.totalorder %v4016_v21, inf }
 0x3a0   :  { %5599 = vst [vmem:[#allocation5_spill] sm:$0xff] %v4028_v38  ;;  %3455 = vrcp.f32 %v1314_v14  ;;  %vm4039_vm2 = vmand %vm1364_vm0, %vm1365_vm1  ;;  %v1326_v11 = vand.u32 2147483648, %v1314_v14  ;;  %v1324_v20 = vand.u32 2147483647, %v1314_v14  ;;  %vm1320_vm4 = vweird.f32 %v1314_v14 }
 0x3a1   :  { %v4057_v17 = vpop.permute.xlu1 %1109 }
 0x3a2   :  { %287 = vrot.lane.b32.xlu2 %v285_v43, %s3510_s21  ;;  %v1327_v36 = vor.u32 1.1754944e-38, %v1326_v11  ;;  %vm1325_vm6 = vcmp.eq.f32.partialorder %v1324_v20, 8.507059e+37  ;;  %v1074_v43 = vmul.f32 %v3976_v34, %v3872_v59  ;;  %v4066_v11 = vpop.permute.xlu2 %701 }
 0x3a4   :  { %1081 = vrot.lane.b32.xlu1 %v3872_v59, %s3535_s28 }
 0x3a6   :  { %v3456_v0 = vpop.eup %3455 }
 0x3a7   :  { %v1316_v25 = vmul.f32 %v3456_v0, %v1314_v14  ;;  %vm1321_vm3 = vweird.f32 %v3456_v0 }
 0x3a8   :  { %vm1322_vm5 = vmor %vm1320_vm4, %vm1321_vm3 }
 0x3a9   :  { %v1317_v63 = vsub.f32 1.0, %v1316_v25 }
 0x3aa   :  { %668 = vrot.lane.b32.xlu2 %v666_v26, %s3510_s21 }
 0x3ab   :  { %v1318_v42 = vmul.f32 %v3456_v0, %v1317_v63 }
 0x3ac   :  { %1091 = vrot.lane.b32.xlu1 %v1089_v10, %s3509_s20  ;;  %v4062_v10 = vpop.permute.xlu0 %267 }
 0x3ad   :  { %v1319_v33 = vadd.f32 %v3456_v0, %v1318_v42  ;;  %v4064_v42 = vpop.permute.xlu1 %718 }
 0x3af   :  { %v1323_v13 = vsel %vm1322_vm5, %v3456_v0, %v1319_v33 }
 0x3b0   :  { %v1328_v19 = vsel %vm1325_vm6, %v1327_v36, %v1323_v13  ;;  %v4075_v13 = vpop.permute.xlu2 %337 }
 0x3b1   :  { %v1329_v25 = vmul.f32 %v1328_v19, %v1313_v39 }
 0x3b2   :  { %1076 = vrot.lane.b32.xlu2 %v1074_v43, %s3510_s21 }
 0x3b3   :  { %v1330_v26 = vmul.f32 %v1329_v25, %v1329_v25 }
 0x3b4   :  { %v4069_v59 = vpop.permute.xlu0 %346 }
 0x3b5   :  { %v1331_v63 = vmul.f32 0.002785687, %v1330_v26  ;;  %v4073_v39 = vpop.permute.xlu1 %1056 }
 0x3b7   :  { %v1332_v4 = vadd.f32 -0.015866, %v1331_v63 }
 0x3b9   :  { %v1333_v14 = vmul.f32 %v1332_v4, %v1330_v26 }
 0x3ba   :  { %1243 = vrot.lane.b32.xlu2 %v1240_v16, %s3513_s24 }
 0x3bb   :  { %v1334_v0 = vadd.f32 0.04247222, %v1333_v14  ;;  %v29_v14 = vadd.f32 %v3674_v54, %v3615_v12 }
 0x3bc   :  { %v4079_v16 = vpop.permute.xlu0 %1126 }
 0x3bd   :  { %v1335_v20 = vmul.f32 %v1334_v0, %v1330_v26  ;;  %v4083_v0 = vpop.permute.xlu1 %329  ;;  %v4088_v41 = vadd.f32 %v3676_v55, %v29_v14 }
 0x3bf   :  { %v1336_v33 = vadd.f32 -0.074975304, %v1335_v20  ;;  %5602 = vst [vmem:[#allocation6_spill] sm:$0xff] %v4088_v41  ;;  %v4099_v54 = vmax.f32 %v4088_v41, 1e-07 }
 0x3c1   :  { %v1337_v34 = vmul.f32 %v1336_v33, %v1330_v26  ;;  %v4085_v33 = vpop.permute.xlu2 %648  ;;  %5603 = vst [vmem:[#allocation7_spill] sm:$0xff] %v4099_v54  ;;  %3457 = vrsqrt.f32 %v4099_v54  ;;  %vm51_vm10 = vweird.f32 %v4099_v54 }
 0x3c2   :  { %1284 = vrot.lane.b32.xlu2 %v4001_v50, %s3510_s21 }
 0x3c3   :  { %v1338_v36 = vadd.f32 0.1064488, %v1337_v34 }
 0x3c5   :  { %v1339_v43 = vmul.f32 %v1338_v36, %v1330_v26  ;;  %v4092_v36 = vmul.f32 %v3805_v1, %v3759_v8 }
 0x3c7   :  { %v1340_v4 = vadd.f32 -0.14207031, %v1339_v43  ;;  %v3458_v21 = vpop.eup %3457 }
 0x3c8   :  { %vm52_vm11 = vweird.f32 %v3458_v21 }
 0x3c9   :  { %v1341_v19 = vmul.f32 %v1340_v4, %v1330_v26  ;;  %v4096_v4 = vpop.permute.xlu0 %710  ;;  %v4102_v55 = vpop.permute.xlu2 %727  ;;  %vm53_vm12 = vmor %vm51_vm10, %vm52_vm11 }
 0x3ca   :  { %454 = vrot.lane.b32.xlu2 %v3986_v58, %s3509_s20 }
 0x3cb   :  { %v1342_v63 = vadd.f32 0.19993454, %v1341_v19  ;;  %v698_v19 = vpop.permute.xlu1 %697 }
 0x3cd   :  { %v1343_v20 = vmul.f32 %v1342_v63, %v1330_v26 }
 0x3cf   :  { %v1344_v34 = vadd.f32 -0.33333147, %v1343_v20 }
 0x3d1   :  { %v1345_v43 = vmul.f32 %v1344_v34, %v1330_v26  ;;  %v4110_v14 = vpop.permute.xlu0 %316  ;;  %v5536_v34 = vmov 0.0  }
 0x3d2   :  { %866 = vrot.lane.b32.xlu2 %v4092_v36, %s3509_s20 }
 0x3d3   :  { %v1346_v12 = vmul.f32 %v1345_v43, %v1329_v25  ;;  %v1355_v43 = vsel %vm1354_vm7, 3.1415927, %v5536_v34  ;;  %v4124_v34 = vpop.permute.xlu2 %1118 }
 0x3d5   :  { %v1347_v63 = vadd.f32 %v1346_v12, %v1329_v25 }
 0x3d7   :  { %v1349_v20 = vsub.f32 1.5707964, %v1347_v63 }
 0x3d9   :  { %v1350_v1 = vsel %vm1348_vm15, %v1349_v20, %v1347_v63  ;;  %v5538_v20 = vmov 0.7853982   ;;  %v1106_v37 = vpop.permute.xlu0 %1105 }
 0x3da   :  { %870 = vrot.lane.b32.xlu2 %v4092_v36, %s3510_s21  ;;  %v1352_v26 = vsub.f32 3.1415927, %v1350_v1  ;;  %v1363_v23 = vsel %vm1351_vm8, 2.3561945, %v5538_v20 }
 0x3dc   :  { %v1353_v25 = vsel %vm1351_vm8, %v1352_v26, %v1350_v1  ;;  %v1369_v1 = vand.u32 2147483648, %v4003_v47  ;;  %v46_v26 = vmul.f32 %v3458_v21, %v4099_v54  ;;  %v278_v47 = vpop.permute.xlu2 %277 }
 0x3dd   :  { %v4115_v12 = vpop.permute.xlu1 %658  ;;  %v1357_v40 = vsel %vm1356_vm9, %v1355_v43, %v1353_v25 }
 0x3de   :  { %v1361_v63 = vsel %vm4024_vm14, nan, %v1357_v40  ;;  %v47_v43 = vmul.f32 %v3458_v21, %v46_v26 }
 0x3df   :  { %v1367_v41 = vsel %vm4039_vm2, %v1363_v23, %v1361_v63 }
 0x3e0   :  { %v1368_v32 = vand.u32 2147483647, %v1367_v41  ;;  %v48_v23 = vmul.f32 0.5, %v47_v43 }
 0x3e2   :  { %673 = vrot.lane.b32.xlu2 %v3885_v31, %s3532_s11  ;;  %v4128_v25 = vor.u32 %v1369_v1, %v1368_v32  ;;  %v49_v63 = vsub.f32 1.5, %v48_v23  ;;  %v691_v31 = vmul.f32 %v3974_v24, %v3701_v6 }
 0x3e4   :  { %v50_v38 = vmul.f32 %v3458_v21, %v49_v63  ;;  %v700_v35 = vsub.f32 %v691_v31, %v698_v19 }
 0x3e5   :  { %v4130_v40 = vpop.permute.xlu1 %1135 }
 0x3e6   :  { %v4135_v41 = vpop.permute.xlu0 %1066  ;;  %v4143_v26 = vsel %vm53_vm12, %v3458_v21, %v50_v38  ;;  %v721_v6 = vmul.f32 %v4064_v42, %v700_v35  ;;  %v300_v21 = vmul.f32 %v3966_v28, %v3686_v60 }
 0x3ea   :  { %683 = vrot.lane.b32.xlu2 %v681_v30, %s3509_s20 }
 0x3ed   :  { %v74_v20 = vpop.permute.xlu1 %73 }
 0x3ee   :  { %v76_v32 = vadd.f32 %v74_v20, %v3972_v44  ;;  %v78_v43 = vpop.permute.xlu0 %77 }
 0x3f0   :  { %v80_v63 = vadd.f32 %v78_v43, %v76_v32 }
 0x3f2   :  { %714 = vrot.lane.b32.xlu2 %v3938_v18, %s3516_s27  ;;  %v1099_v18 = vmul.f32 %v4055_v27, %v3710_v9  ;;  %v270_v9 = vmul.f32 %v4062_v10, %v3841_v46 }
 0x3f4   :  { %v1248_v1 = vpop.permute.xlu2 %1247  ;;  %v1108_v38 = vsub.f32 %v1099_v18, %v1106_v37  ;;  %v280_v37 = vadd.f32 %v278_v47, %v270_v9 }
 0x3f5   :  { %v4146_v30 = vmul.f32 %v1248_v1, %v3878_v15  ;;  %v83_v23 = vpop.permute.xlu1 %82  ;;  %v822_v1 = vadd.f32 %v3828_v29, %v3765_v2 }
 0x3f6   :  { %v85_v54 = vmul.f32 %v83_v23, %v4143_v26  ;;  %v1129_v42 = vmul.f32 %v4079_v16, %v1108_v38 }
 0x3f7   :  { %1271 = vrot.lane.b32.xlu0 %v4146_v30, %s3529_s13  ;;  %v4176_v46 = vadd.f32 %v3996_v22, %v822_v1 }
 0x3f8   :  { %v86_v44 = vmul.f32 %v85_v54, %v80_v63 }
 0x3fa   :  { %v4154_v24 = vclamps-f32 %v86_v44, 0.9999999  ;;  %723 = vrot.lane.b32.xlu2 %v721_v6, %s3509_s20 }
 0x3fc   :  { %v89_v15 = vmul.f32 %v4154_v24, %v4154_v24  ;;  %v288_v19 = vpop.permute.xlu2 %287  ;;  %v4182_v63 = vand.u32 2147483647, %v4154_v24  ;;  %vm150_vm15 = vcmp.ne.f32.partialorder %v4154_v24, %v4154_v24 }
 0x3fd   :  { %v290_v28 = vadd.f32 %v288_v19, %v280_v37 }
 0x3fe   :  { %v90_v20 = vsub.f32 1.0, %v89_v15  ;;  %vm156_vm2 = vcmp.eq.s32.totalorder %v4182_v63, inf }
 0x3ff   :  { %302 = vrot.lane.b32.xlu0 %v300_v21, %s3509_s20 }
 0x400   :  { %3459 = vrsqrt.f32 %v90_v20  ;;  %vm98_vm13 = vcmp.eq.f32.partialorder %v90_v20, inf  ;;  %v101_v23 = vand.u32 2147483648, %v90_v20  ;;  %vm100_vm14 = vcmp.eq.f32.partialorder %v90_v20, 0.0 }
 0x402   :  { %1131 = vrot.lane.b32.xlu2 %v1129_v42, %s3509_s20  ;;  %v323_v42 = vmul.f32 %v4048_v45, %v3646_v51 }
 0x404   :  { %v4166_v27 = vpop.permute.xlu2 %668  ;;  %v332_v37 = vsub.f32 %v323_v42, %v4083_v0 }
 0x406   :  { %v3460_v54 = vpop.eup %3459 }
 0x407   :  { %333 = vrot.lane.b32.xlu0 %v3894_v48, %s3534_s6  ;;  %v92_v31 = vmul.f32 %v3460_v54, %v90_v20  ;;  %v4179_v48 = vmax.f32 %v4176_v46, 1e-07  ;;  %s3539_s6 = smov 5  }
 0x409   :  { %v93_v32 = vmul.f32 %v3460_v54, %v92_v31  ;;  %3461 = vrsqrt.f32 %v4179_v48  ;;  %vm844_vm10 = vweird.f32 %v4179_v48 }
 0x40a   :  { %356 = vrot.lane.b32.xlu2 %v290_v28, %s3510_s21 }
 0x40b   :  { %v94_v35 = vmul.f32 0.5, %v93_v32  ;;  %v464_v32 = vpop.permute.xlu1 %463 }
 0x40c   :  { %v4171_v16 = vpop.permute.xlu2 %1076 }
 0x40d   :  { %v95_v43 = vsub.f32 1.5, %v94_v35 }
 0x40f   :  { %v96_v10 = vmul.f32 %v3460_v54, %v95_v43  ;;  %v3462_v19 = vpop.eup %3461 }
 0x410   :  { %v839_v9 = vmul.f32 %v3462_v19, %v4179_v48  ;;  %vm845_vm9 = vweird.f32 %v3462_v19 }
 0x411   :  { %v97_v47 = vmul.f32 %v96_v10, %v90_v20  ;;  %vm846_vm11 = vmor %vm844_vm10, %vm845_vm9 }
 0x412   :  { %v840_v35 = vmul.f32 %v3462_v19, %v839_v9 }
 0x413   :  { %v99_v6 = vsel %vm98_vm13, %v90_v20, %v97_v47  ;;  %v459_v47 = vpop.permute.xlu0 %458 }
 0x414   :  { %v1244_v44 = vpop.permute.xlu2 %1243  ;;  %v4184_v18 = vsel %vm100_vm14, %v101_v23, %v99_v6  ;;  %v466_v6 = vmul.f32 %v464_v32, %v4143_v26 }
 0x415   :  { %v4187_v2 = vmul.f32 %v1244_v44, %v3908_v61  ;;  %v4190_v29 = vand.u32 2147483647, %v4184_v18  ;;  %vm151_vm0 = vcmp.ne.f32.partialorder %v4184_v18, %v4184_v18  ;;  %vm148_vm9 = vcmp.eq.f32.partialorder %v4184_v18, 0.0 }
 0x416   :  { %vm4196_vm1 = vmor %vm150_vm15, %vm151_vm0 }
 0x417   :  { %1280 = vrot.lane.b32.xlu1 %v4187_v2, %s3533_s22  ;;  %1257 = vrot.lane.b32.xlu0 %v4187_v2, %s3510_s21  ;;  %v106_v61 = vmax.f32 %v4182_v63, %v4190_v29  ;;  %vm157_vm3 = vcmp.eq.s32.totalorder %v4190_v29, inf }
 0x418   :  { %1472 = vrot.lane.b32.xlu2 %v4187_v2, %s3506_s17  ;;  %vm4211_vm4 = vmand %vm156_vm2, %vm157_vm3 }
 0x419   :  { %3463 = vrcp.f32 %v106_v61  ;;  %v118_v28 = vand.u32 2147483648, %v106_v61  ;;  %v116_v45 = vand.u32 2147483647, %v106_v61  ;;  %vm112_vm6 = vweird.f32 %v106_v61 }
 0x41b   :  { %v119_v0 = vor.u32 1.1754944e-38, %v118_v28  ;;  %vm117_vm8 = vcmp.eq.f32.partialorder %v116_v45, 8.507059e+37 }
 0x41c   :  { %v1285_v15 = vpop.permute.xlu2 %1284 }
 0x41d   :  { %v1287_v21 = vmul.f32 %v1285_v15, %v3679_v57  ;;  %v841_v15 = vmul.f32 0.5, %v840_v35 }
 0x41f   :  { %v3464_v20 = vpop.eup %3463  ;;  %1122 = vrot.lane.b32.xlu1 %v3948_v56, %s3530_s29  ;;  %1289 = vrot.lane.b32.xlu0 %v1287_v21, %s3509_s20  ;;  %v349_v56 = vmul.f32 %v4069_v59, %v332_v37  ;;  %v105_v21 = vmin.f32 %v4182_v63, %v4190_v29 }
 0x420   :  { %1481 = vrot.lane.b32.xlu2 %v4146_v30, %s3506_s17  ;;  %v108_v54 = vmul.f32 %v3464_v20, %v106_v61  ;;  %vm113_vm5 = vweird.f32 %v3464_v20 }
 0x421   :  { %vm114_vm7 = vmor %vm112_vm6, %vm113_vm5  ;;  %vm143_vm6 = vcmp.lt.f32.partialorder %v4154_v24, 0.0 }
 0x422   :  { %v109_v31 = vsub.f32 1.0, %v108_v54 }
 0x424   :  { %v455_v1 = vpop.permute.xlu2 %454  ;;  %v110_v43 = vmul.f32 %v3464_v20, %v109_v31  ;;  %v842_v31 = vsub.f32 1.5, %v841_v15 }
 0x425   :  { %v457_v10 = vadd.f32 %v455_v1, %v3986_v58  ;;  %v651_v58 = vmul.f32 %v4085_v33, %v3861_v49 }
 0x426   :  { %v111_v23 = vadd.f32 %v3464_v20, %v110_v43  ;;  %v843_v1 = vmul.f32 %v3462_v19, %v842_v31  ;;  %v1059_v43 = vmul.f32 %v4073_v39, %v3867_v7 }
 0x427   :  { %v461_v44 = vadd.f32 %v459_v47, %v457_v10  ;;  %351 = vrot.lane.b32.xlu1 %v349_v56, %s3513_s24  ;;  %v661_v54 = vadd.f32 %v4115_v12, %v651_v58 }
 0x428   :  { %1381 = vrot.lane.b32.xlu2 %v3679_v57, %s3506_s17  ;;  %v115_v59 = vsel %vm114_vm7, %v3464_v20, %v111_v23  ;;  %v1069_v56 = vadd.f32 %v4135_v41, %v1059_v43  ;;  %v4257_v47 = vsel %vm846_vm11, %v3462_v19, %v843_v1  ;;  %vm146_vm7 = vcmp.lt.s32.totalorder %v4154_v24, 0 }
 0x429   :  { %v467_v61 = vmul.f32 %v466_v6, %v461_v44  ;;  %v120_v42 = vsel %vm117_vm8, %v119_v0, %v115_v59  ;;  %v671_v20 = vadd.f32 %v4166_v27, %v661_v54  ;;  %v876_v27 = vpop.permute.xlu0 %875  ;;  %vm140_vm8 = vcmp.gt.f32.partialorder %v4190_v29, %v4182_v63 }
 0x42a   :  { %v4235_v9 = vmul.f32 %v120_v42, %v105_v21  ;;  %v878_v44 = vmul.f32 %v876_v27, %v4257_v47  ;;  %v1079_v0 = vadd.f32 %v4171_v16, %v1069_v56 }
 0x42b   :  { %v4238_v37 = vclamps-f32 %v467_v61, 0.9999999 }
 0x42c   :  { %v867_v28 = vpop.permute.xlu2 %866  ;;  %v4242_v32 = vmul.f32 %v4235_v9, %v4235_v9 }
 0x42d   :  { %v470_v35 = vmul.f32 %v4238_v37, %v4238_v37  ;;  %v869_v10 = vadd.f32 %v867_v28, %v4092_v36  ;;  %v4273_v56 = vand.u32 2147483647, %v4238_v37  ;;  %vm531_vm14 = vcmp.ne.f32.partialorder %v4238_v37, %v4238_v37 }
 0x42e   :  { %v123_v49 = vmul.f32 0.002785687, %v4242_v32 }
 0x42f   :  { %v471_v33 = vsub.f32 1.0, %v470_v35  ;;  %737 = vrot.lane.b32.xlu1 %v671_v20, %s3524_s8  ;;  %vm537_vm2 = vcmp.eq.s32.totalorder %v4273_v56, inf }
 0x430   :  { %1468 = vrot.lane.b32.xlu2 %v4001_v50, %s3506_s17  ;;  %v124_v12 = vadd.f32 -0.015866, %v123_v49 }
 0x431   :  { %3465 = vrsqrt.f32 %v471_v33  ;;  %vm479_vm12 = vcmp.eq.f32.partialorder %v471_v33, inf  ;;  %vm481_vm13 = vcmp.eq.f32.partialorder %v471_v33, 0.0 }
 0x432   :  { %v125_v45 = vmul.f32 %v124_v12, %v4242_v32  ;;  %v482_v12 = vand.u32 2147483648, %v471_v33 }
 0x434   :  { %v871_v23 = vpop.permute.xlu2 %870  ;;  %v126_v6 = vadd.f32 0.04247222, %v125_v45 }
 0x435   :  { %v873_v7 = vadd.f32 %v871_v23, %v869_v10 }
 0x436   :  { %v127_v39 = vmul.f32 %v126_v6, %v4242_v32 }
 0x437   :  { %v3466_v15 = vpop.eup %3465  ;;  %v879_v21 = vmul.f32 %v878_v44, %v873_v7  ;;  %1145 = vrot.lane.b32.xlu1 %v1079_v0, %s3526_s10  ;;  %s3541_s10 = smov 111  }
 0x438   :  { %1459 = vrot.lane.b32.xlu2 %v3686_v60, %s3514_s25  ;;  %v128_v41 = vadd.f32 -0.074975304, %v127_v39  ;;  %v473_v36 = vmul.f32 %v3466_v15, %v471_v33 }
 0x439   :  { %v4265_v19 = vclamps-f32 %v879_v21, 0.9999999 }
 0x43a   :  { %v129_v59 = vmul.f32 %v128_v41, %v4242_v32  ;;  %v474_v58 = vmul.f32 %v3466_v15, %v473_v36 }
 0x43b   :  { %v882_v16 = vmul.f32 %v4265_v19, %v4265_v19 }
 0x43c   :  { %v130_v61 = vadd.f32 0.1064488, %v129_v59  ;;  %v475_v42 = vmul.f32 0.5, %v474_v58 }
 0x43d   :  { %v883_v54 = vsub.f32 1.0, %v882_v16 }
 0x43e   :  { %v131_v31 = vmul.f32 %v130_v61, %v4242_v32  ;;  %v476_v28 = vsub.f32 1.5, %v475_v42 }
 0x43f   :  { %3467 = vrsqrt.f32 %v883_v54  ;;  %vm891_vm10 = vcmp.eq.f32.partialorder %v883_v54, inf  ;;  %vm893_vm11 = vcmp.eq.f32.partialorder %v883_v54, 0.0 }
 0x440   :  { %v132_v20 = vadd.f32 -0.14207031, %v131_v31  ;;  %v477_v35 = vmul.f32 %v3466_v15, %v476_v28  ;;  %v5612_v31 = vmov 0.0   ;;  %v5613_v28 = vmov 0.7853982  }
 0x442   :  { %v133_v49 = vmul.f32 %v132_v20, %v4242_v32  ;;  %v478_v1 = vmul.f32 %v477_v35, %v471_v33  ;;  %v155_v20 = vsel %vm143_vm6, 2.3561945, %v5613_v28 }
 0x444   :  { %v134_v43 = vadd.f32 0.19993454, %v133_v49  ;;  %v480_v27 = vsel %vm479_vm12, %v471_v33, %v478_v1  ;;  %v4310_v1 = vand.u32 2147483647, %v4265_v19 }
 0x445   :  { %v3468_v45 = vpop.eup %3467  ;;  %v4275_v10 = vsel %vm481_vm13, %v482_v12, %v480_v27  ;;  %v894_v12 = vand.u32 2147483648, %v883_v54  ;;  %vm943_vm13 = vcmp.ne.f32.partialorder %v4265_v19, %v4265_v19 }
 0x446   :  { %v135_v23 = vmul.f32 %v134_v43, %v4242_v32  ;;  %v4279_v6 = vand.u32 2147483647, %v4275_v10  ;;  %vm532_vm15 = vcmp.ne.f32.partialorder %v4275_v10, %v4275_v10  ;;  %v885_v33 = vmul.f32 %v3468_v45, %v883_v54 }
 0x447   :  { %vm4285_vm0 = vmor %vm531_vm14, %vm532_vm15  ;;  %vm949_vm15 = vcmp.eq.s32.totalorder %v4310_v1, inf }
 0x448   :  { %v136_v0 = vadd.f32 -0.33333147, %v135_v23  ;;  %v487_v7 = vmax.f32 %v4273_v56, %v4279_v6  ;;  %vm538_vm3 = vcmp.eq.s32.totalorder %v4279_v6, inf  ;;  %v886_v39 = vmul.f32 %v3468_v45, %v885_v33 }
 0x449   :  { %vm4294_vm5 = vmand %vm537_vm2, %vm538_vm3  ;;  %v161_v23 = vand.u32 2147483648, %v4184_v18 }
 0x44a   :  { %v137_v15 = vmul.f32 %v136_v0, %v4242_v32  ;;  %3469 = vrcp.f32 %v487_v7  ;;  %v887_v41 = vmul.f32 0.5, %v886_v39  ;;  %v147_v32 = vsel %vm146_vm7, 3.1415927, %v5612_v31 }
 0x44b   :  { %v497_v33 = vand.u32 2147483647, %v487_v7  ;;  %v499_v0 = vand.u32 2147483648, %v487_v7  ;;  %vm493_vm2 = vweird.f32 %v487_v7 }
 0x44c   :  { %v138_v36 = vmul.f32 %v137_v15, %v4235_v9  ;;  %v888_v59 = vsub.f32 1.5, %v887_v41 }
 0x44e   :  { %v139_v58 = vadd.f32 %v138_v36, %v4235_v9  ;;  %v889_v16 = vmul.f32 %v3468_v45, %v888_v59 }
 0x450   :  { %v3470_v61 = vpop.eup %3469  ;;  %v141_v42 = vsub.f32 1.5707964, %v139_v58  ;;  %v890_v49 = vmul.f32 %v889_v16, %v883_v54  ;;  %v486_v16 = vmin.f32 %v4273_v56, %v4279_v6 }
 0x451   :  { %v489_v35 = vmul.f32 %v3470_v61, %v487_v7  ;;  %vm494_vm12 = vweird.f32 %v3470_v61 }
 0x452   :  { %v142_v9 = vsel %vm140_vm8, %v141_v42, %v139_v58  ;;  %v892_v45 = vsel %vm891_vm10, %v883_v54, %v890_v49  ;;  %v500_v42 = vor.u32 1.1754944e-38, %v499_v0 }
 0x453   :  { %v144_v43 = vsub.f32 3.1415927, %v142_v9  ;;  %v490_v27 = vsub.f32 1.0, %v489_v35  ;;  %v4313_v39 = vsel %vm893_vm11, %v894_v12, %v892_v45 }
 0x454   :  { %v4318_v15 = vand.u32 2147483647, %v4313_v39  ;;  %vm944_vm14 = vcmp.ne.f32.partialorder %v4313_v39, %v4313_v39 }
 0x455   :  { %v145_v63 = vsel %vm143_vm6, %v144_v43, %v142_v9  ;;  %v491_v29 = vmul.f32 %v3470_v61, %v490_v27  ;;  %vm4331_vm3 = vmor %vm943_vm13, %vm944_vm14  ;;  %vm527_vm13 = vcmp.lt.s32.totalorder %v4238_v37, 0  ;;  %vm524_vm14 = vcmp.lt.f32.partialorder %v4238_v37, 0.0 }
 0x456   :  { %v149_v41 = vsel %vm148_vm9, %v147_v32, %v145_v63  ;;  %v899_v36 = vmax.f32 %v4310_v1, %v4318_v15  ;;  %vm495_vm6 = vmor %vm493_vm2, %vm494_vm12  ;;  %vm950_vm7 = vcmp.eq.s32.totalorder %v4318_v15, inf  ;;  %vm521_vm12 = vcmp.gt.f32.partialorder %v4279_v6, %v4273_v56 }
 0x457   :  { %v153_v24 = vsel %vm4196_vm1, nan, %v149_v41  ;;  %v492_v54 = vadd.f32 %v3470_v61, %v491_v29  ;;  %vm498_vm1 = vcmp.eq.f32.partialorder %v497_v33, 8.507059e+37  ;;  %vm4342_vm8 = vmand %vm949_vm15, %vm950_vm7  ;;  %vm529_vm15 = vcmp.eq.f32.partialorder %v4275_v10, 0.0 }
 0x458   :  { %v159_v58 = vsel %vm4211_vm4, %v155_v20, %v153_v24  ;;  %3471 = vrcp.f32 %v899_v36  ;;  %v909_v63 = vand.u32 2147483647, %v899_v36  ;;  %vm905_vm9 = vweird.f32 %v899_v36 }
 0x459   :  { %v160_v22 = vand.u32 2147483647, %v159_v58  ;;  %v496_v32 = vsel %vm495_vm6, %v3470_v61, %v492_v54  ;;  %v911_v61 = vand.u32 2147483648, %v899_v36  ;;  %vm936_vm2 = vcmp.lt.f32.partialorder %v4265_v19, 0.0 }
 0x45a   :  { %v501_v35 = vsel %vm498_vm1, %v500_v42, %v496_v32  ;;  %vm910_vm11 = vcmp.eq.f32.partialorder %v909_v63, 8.507059e+37  ;;  %vm941_vm6 = vcmp.eq.f32.partialorder %v4313_v39, 0.0 }
 0x45b   :  { %v4346_v38 = vor.u32 %v161_v23, %v160_v22  ;;  %v502_v20 = vmul.f32 %v501_v35, %v486_v16  ;;  %v912_v24 = vor.u32 1.1754944e-38, %v911_v61  ;;  %v898_v23 = vmin.f32 %v4310_v1, %v4318_v15 }
 0x45d   :  { %v503_v49 = vmul.f32 %v502_v20, %v502_v20 }
 0x45e   :  { %v3472_v9 = vpop.eup %3471 }
 0x45f   :  { %v504_v12 = vmul.f32 0.002785687, %v503_v49  ;;  %v901_v43 = vmul.f32 %v3472_v9, %v899_v36  ;;  %vm906_vm4 = vweird.f32 %v3472_v9 }
 0x460   :  { %vm907_vm10 = vmor %vm905_vm9, %vm906_vm4 }
 0x461   :  { %v505_v27 = vadd.f32 -0.015866, %v504_v12  ;;  %v902_v45 = vsub.f32 1.0, %v901_v43  ;;  %v310_v12 = vmul.f32 %v4044_v5, %v3686_v60 }
 0x463   :  { %v506_v0 = vmul.f32 %v505_v27, %v503_v49  ;;  %v903_v33 = vmul.f32 %v3472_v9, %v902_v45  ;;  %v319_v27 = vsub.f32 %v310_v12, %v4110_v14 }
 0x465   :  { %v507_v29 = vadd.f32 0.04247222, %v506_v0  ;;  %v904_v41 = vadd.f32 %v3472_v9, %v903_v33  ;;  %v340_v33 = vmul.f32 %v4075_v13, %v319_v27  ;;  %v4367_v27 = vpop.permute.xlu1 %292 }
 0x467   :  { %v508_v54 = vmul.f32 %v507_v29, %v503_v49  ;;  %v908_v58 = vsel %vm907_vm10, %v3472_v9, %v904_v41 }
 0x468   :  { %v913_v42 = vsel %vm910_vm11, %v912_v24, %v908_v58 }
 0x469   :  { %v1272_v16 = vpop.permute.xlu0 %1271  ;;  %v509_v32 = vadd.f32 -0.074975304, %v508_v54  ;;  %v4351_v35 = vmul.f32 %v913_v42, %v898_v23 }
 0x46a   :  { %v1274_v22 = vmul.f32 %v1272_v16, %v3646_v51 }
 0x46b   :  { %v510_v36 = vmul.f32 %v509_v32, %v503_v49  ;;  %v915_v43 = vmul.f32 %v4351_v35, %v4351_v35 }
 0x46c   :  { %1276 = vrot.lane.b32.xlu0 %v1274_v22, %s3512_s23  ;;  %v704_v22 = vmul.f32 %v4066_v11, %v3656_v52  ;;  %v1112_v52 = vmul.f32 %v4057_v17, %v3664_v53 }
 0x46d   :  { %v511_v9 = vadd.f32 0.1064488, %v510_v36  ;;  %v916_v45 = vmul.f32 0.002785687, %v915_v43  ;;  %v1268_v53 = vpop.permute.xlu1 %1267 }
 0x46e   :  { %v1121_v56 = vsub.f32 %v1112_v52, %v4124_v34  ;;  %v542_v34 = vand.u32 2147483648, %v4275_v10 }
 0x46f   :  { %v512_v0 = vmul.f32 %v511_v9, %v503_v49  ;;  %v917_v61 = vadd.f32 -0.015866, %v916_v45  ;;  %v713_v9 = vsub.f32 %v704_v22, %v4096_v4 }
 0x471   :  { %v513_v63 = vadd.f32 -0.14207031, %v512_v0  ;;  %v918_v29 = vmul.f32 %v917_v61, %v915_v43  ;;  %v4361_v23 = vpop.permute.xlu0 %302 }
 0x473   :  { %v514_v41 = vmul.f32 %v513_v63, %v503_v49  ;;  %v919_v5 = vadd.f32 0.04247222, %v918_v29 }
 0x474   :  { %342 = vrot.lane.b32.xlu0 %v340_v33, %s3509_s20  ;;  %v730_v33 = vmul.f32 %v4102_v55, %v713_v9  ;;  %v528_v55 = vsel %vm527_vm13, 3.1415927, %v5612_v31  ;;  %v948_v9 = vsel %vm936_vm2, 2.3561945, %v5613_v28 }
 0x475   :  { %v515_v24 = vadd.f32 0.19993454, %v514_v41  ;;  %v920_v54 = vmul.f32 %v919_v5, %v915_v43 }
 0x477   :  { %v516_v58 = vmul.f32 %v515_v24, %v503_v49  ;;  %v921_v16 = vadd.f32 -0.074975304, %v920_v54  ;;  %v536_v54 = vsel %vm524_vm14, 2.3561945, %v5613_v28 }
 0x479   :  { %v517_v42 = vadd.f32 -0.33333147, %v516_v58  ;;  %v922_v14 = vmul.f32 %v921_v16, %v915_v43  ;;  %v4370_v61 = vpop.permute.xlu0 %333  ;;  %v1138_v58 = vmul.f32 %v4130_v40, %v1121_v56 }
 0x47b   :  { %v518_v13 = vmul.f32 %v517_v42, %v503_v49  ;;  %v923_v32 = vadd.f32 0.1064488, %v922_v14 }
 0x47c   :  { %1252 = vrot.lane.b32.xlu0 %v4146_v30, %s3533_s22 }
 0x47d   :  { %v519_v12 = vmul.f32 %v518_v13, %v502_v20  ;;  %v924_v36 = vmul.f32 %v923_v32, %v915_v43 }
 0x47f   :  { %v520_v45 = vadd.f32 %v519_v12, %v502_v20  ;;  %v925_v0 = vadd.f32 -0.14207031, %v924_v36  ;;  %v4405_v12 = vld [vmem:[%s5522_s0] sm:$0xff] }
 0x481   :  { %v522_v63 = vsub.f32 1.5707964, %v520_v45  ;;  %v926_v29 = vmul.f32 %v925_v0, %v915_v43 }
 0x483   :  { %v523_v11 = vsel %vm521_vm12, %v522_v63, %v520_v45  ;;  %v927_v4 = vadd.f32 0.19993454, %v926_v29  ;;  %v674_v29 = vpop.permute.xlu2 %673 }
 0x484   :  { %732 = vrot.lane.b32.xlu0 %v730_v33, %s3513_s24  ;;  %v525_v20 = vsub.f32 3.1415927, %v523_v11  ;;  %v954_v33 = vand.u32 2147483648, %v4313_v39 }
 0x485   :  { %v928_v49 = vmul.f32 %v927_v4, %v915_v43 }
 0x486   :  { %v526_v41 = vsel %vm524_vm14, %v525_v20, %v523_v11 }
 0x487   :  { %v530_v6 = vsel %vm529_vm15, %v528_v55, %v526_v41  ;;  %v929_v5 = vadd.f32 -0.33333147, %v928_v49 }
 0x488   :  { %v534_v24 = vsel %vm4285_vm0, nan, %v530_v6  ;;  %vm933_vm0 = vcmp.gt.f32.partialorder %v4318_v15, %v4310_v1  ;;  %v1270_v6 = vmul.f32 %v1268_v53, %v3686_v60 }
 0x489   :  { %v1258_v17 = vpop.permute.xlu0 %1257  ;;  %v540_v16 = vsel %vm4294_vm5, %v536_v54, %v534_v24  ;;  %v930_v42 = vmul.f32 %v929_v5, %v915_v43  ;;  %vm939_vm5 = vcmp.lt.s32.totalorder %v4265_v19, 0  ;;  %v4400_v43 = vpop.permute.xlu1 %1081  ;;  %v295_v54 = vmul.f32 %v4367_v27, %v3679_v57 }
 0x48a   :  { %v1260_v37 = vmul.f32 %v1258_v17, %v3686_v60  ;;  %v541_v14 = vand.u32 2147483647, %v540_v16  ;;  %v940_v36 = vsel %vm939_vm5, 3.1415927, %v5612_v31 }
 0x48b   :  { %v931_v44 = vmul.f32 %v930_v42, %v4351_v35  ;;  %v684_v4 = vpop.permute.xlu2 %683 }
 0x48c   :  { %1140 = vrot.lane.b32.xlu0 %v1138_v58, %s3513_s24  ;;  %1262 = vrot.lane.b32.xlu1 %v1260_v37, %s3509_s20  ;;  %v4394_v22 = vor.u32 %v542_v34, %v541_v14  ;;  %v305_v58 = vsub.f32 %v295_v54, %v4361_v23 }
 0x48d   :  { %v932_v13 = vadd.f32 %v931_v44, %v4351_v35 }
 0x48e   :  { %v336_v16 = vmul.f32 %v4370_v61, %v305_v58 }
 0x48f   :  { %v934_v40 = vsub.f32 1.5707964, %v932_v13 }
 0x491   :  { %v935_v21 = vsel %vm933_vm0, %v934_v40, %v932_v13  ;;  %v1092_v19 = vpop.permute.xlu1 %1091  ;;  %v1290_v52 = vpop.permute.xlu0 %1289 }
 0x492   :  { %v937_v32 = vsub.f32 3.1415927, %v935_v21 }
 0x493   :  { %v715_v20 = vpop.permute.xlu2 %714 }
 0x494   :  { %1373 = vrot.lane.b32.xlu1 %v4405_v12, %s3514_s25  ;;  %v938_v35 = vsel %vm936_vm2, %v937_v32, %v935_v21  ;;  %v676_v21 = vmul.f32 %v674_v29, %v3698_v3 }
 0x495   :  { %v942_v1 = vsel %vm941_vm6, %v940_v36, %v938_v35 }
 0x496   :  { %v946_v15 = vsel %vm4331_vm3, nan, %v942_v1  ;;  %v686_v32 = vsub.f32 %v676_v21, %v684_v4 }
 0x497   :  { %v952_v45 = vsel %vm4342_vm8, %v948_v9, %v946_v15  ;;  %v1084_v9 = vmul.f32 %v4400_v43, %v3693_v62 }
 0x498   :  { %v953_v0 = vand.u32 2147483647, %v952_v45  ;;  %v717_v36 = vmul.f32 %v715_v20, %v686_v32 }
 0x499   :  { %v1281_v59 = vpop.permute.xlu1 %1280  ;;  %v1094_v29 = vsub.f32 %v1084_v9, %v1092_v19 }
 0x49a   :  { %v4418_v63 = vor.u32 %v954_v33, %v953_v0  ;;  %v1283_v11 = vmul.f32 %v1281_v59, %v3646_v51 }
 0x49b   :  { %v724_v49 = vpop.permute.xlu2 %723 }
 0x49c   :  { %1390 = vrot.lane.b32.xlu1 %v3686_v60, %s3506_s17  ;;  %v4425_v7 = vsub.f32 %v1283_v11, %v1290_v52  ;;  %v726_v15 = vadd.f32 %v724_v49, %v717_v36 }
 0x4a1   :  { %v1123_v5 = vpop.permute.xlu1 %1122 }
 0x4a2   :  { %v1125_v4 = vmul.f32 %v1123_v5, %v1094_v29 }
 0x4a3   :  { %v4429_v41 = vpop.permute.xlu2 %1131 }
 0x4a4   :  { %1450 = vrot.lane.b32.xlu1 %v3679_v57, %s3514_s25  ;;  %v1134_v58 = vadd.f32 %v4429_v41, %v1125_v4 }
 0x4a9   :  { %v352_v34 = vpop.permute.xlu1 %351 }
 0x4ab   :  { %v4431_v55 = vpop.permute.xlu2 %356 }
 0x4ac   :  { %1437 = vrot.lane.b32.xlu1 %v4425_v7, %s3523_s7  ;;  %v4448_v44 = vand.u32 2147483647, %v4431_v55 }
 0x4ae   :  { %vm412_vm3 = vcmp.eq.s32.totalorder %v4448_v44, inf }
 0x4b1   :  { %v4471_v35 = vpop.permute.xlu1 %737 }
 0x4b2   :  { %v4476_v3 = vand.u32 2147483647, %v4471_v35 }
 0x4b3   :  { %v4433_v56 = vpop.permute.xlu2 %1472 }
 0x4b4   :  { %vm793_vm4 = vcmp.eq.s32.totalorder %v4476_v3, inf }
 0x4b9   :  { %v4489_v19 = vpop.permute.xlu1 %1145 }
 0x4bb   :  { %v1482_v37 = vpop.permute.xlu2 %1481 }
 0x4bc   :  { %v1484_v42 = vmul.f32 %v1482_v37, %v3759_v8 }
 0x4de   :  { %v1277_v17 = vpop.permute.xlu0 %1276 }
 0x4df   :  { %v4436_v24 = vsub.f32 %v1270_v6, %v1277_v17 }
 0x4e1   :  { %1427 = vrot.lane.b32.xlu2 %v4436_v24, %s3539_s6  ;;  %1494 = vrot.lane.b32.xlu0 %v4436_v24, %s3523_s7 }
 0x4e6   :  { %v343_v53 = vpop.permute.xlu0 %342 }
 0x4e7   :  { %v345_v14 = vadd.f32 %v343_v53, %v336_v16  ;;  %v1475_v16 = vmul.f32 %v4433_v56, %v3759_v8 }
 0x4e9   :  { %v4450_v27 = vadd.f32 %v352_v34, %v345_v14  ;;  %1486 = vrot.lane.b32.xlu2 %v1484_v42, %s3510_s21  ;;  %1503 = vrot.lane.b32.xlu0 %v4425_v7, %s3520_s4  ;;  %v4505_v34 = vand.u32 2147483647, %v4489_v19  ;;  %s3540_s4 = smov 113  }
 0x4eb   :  { %v4456_v23 = vand.u32 2147483647, %v4450_v27  ;;  %vm1201_vm14 = vcmp.eq.s32.totalorder %v4505_v34, inf }
 0x4ed   :  { %v362_v61 = vmax.f32 %v4448_v44, %v4456_v23  ;;  %vm413_vm7 = vcmp.eq.s32.totalorder %v4456_v23, inf  ;;  %v361_v17 = vmin.f32 %v4448_v44, %v4456_v23 }
 0x4ee   :  { %v1253_v13 = vpop.permute.xlu0 %1252  ;;  %vm4462_vm1 = vmand %vm412_vm3, %vm413_vm7 }
 0x4ef   :  { %3473 = vrcp.f32 %v362_v61  ;;  %v374_v52 = vand.u32 2147483648, %v362_v61  ;;  %v372_v62 = vand.u32 2147483647, %v362_v61  ;;  %vm368_vm10 = vweird.f32 %v362_v61 }
 0x4f1   :  { %1399 = vrot.lane.b32.xlu2 %v4001_v50, %s3504_s15  ;;  %1403 = vrot.lane.b32.xlu0 %v4187_v2, %s3504_s15  ;;  %v375_v5 = vor.u32 1.1754944e-38, %v374_v52  ;;  %vm373_vm13 = vcmp.eq.f32.partialorder %v372_v62, 8.507059e+37 }
 0x4f5   :  { %v3474_v1 = vpop.eup %3473 }
 0x4f6   :  { %v364_v45 = vmul.f32 %v3474_v1, %v362_v61  ;;  %v733_v0 = vpop.permute.xlu0 %732  ;;  %vm369_vm8 = vweird.f32 %v3474_v1 }
 0x4f7   :  { %v4478_v33 = vadd.f32 %v733_v0, %v726_v15  ;;  %vm370_vm12 = vmor %vm368_vm10, %vm369_vm8  ;;  %vm396_vm10 = vcmp.gt.f32.partialorder %v4456_v23, %v4448_v44 }
 0x4f8   :  { %v365_v59 = vsub.f32 1.0, %v364_v45 }
 0x4f9   :  { %v4481_v11 = vand.u32 2147483647, %v4478_v33  ;;  %1412 = vrot.lane.b32.xlu0 %v4146_v30, %s3504_s15 }
 0x4fa   :  { %v366_v20 = vmul.f32 %v3474_v1, %v365_v59 }
 0x4fb   :  { %v743_v43 = vmax.f32 %v4476_v3, %v4481_v11  ;;  %vm794_vm9 = vcmp.eq.s32.totalorder %v4481_v11, inf }
 0x4fc   :  { %v367_v49 = vadd.f32 %v3474_v1, %v366_v20  ;;  %vm4491_vm11 = vmand %vm793_vm4, %vm794_vm9 }
 0x4fd   :  { %3475 = vrcp.f32 %v743_v43  ;;  %v755_v0 = vand.u32 2147483648, %v743_v43  ;;  %v753_v4 = vand.u32 2147483647, %v743_v43  ;;  %vm749_vm2 = vweird.f32 %v743_v43 }
 0x4fe   :  { %v371_v54 = vsel %vm370_vm12, %v3474_v1, %v367_v49  ;;  %v1141_v37 = vpop.permute.xlu0 %1140  ;;  %v1263_v56 = vpop.permute.xlu1 %1262  ;;  %v1255_v1 = vmul.f32 %v1253_v13, %v3679_v57  ;;  %vm402_vm12 = vcmp.lt.s32.totalorder %v4431_v55, 0 }
 0x4ff   :  { %v376_v53 = vsel %vm373_vm13, %v375_v5, %v371_v54  ;;  %v4502_v14 = vadd.f32 %v1141_v37, %v1134_v58  ;;  %v756_v62 = vor.u32 1.1754944e-38, %v755_v0  ;;  %vm754_vm3 = vcmp.eq.f32.partialorder %v753_v4, 8.507059e+37 }
 0x500   :  { %v4500_v42 = vmul.f32 %v376_v53, %v361_v17  ;;  %v4525_v29 = vsub.f32 %v1255_v1, %v1263_v56  ;;  %v742_v17 = vmin.f32 %v4476_v3, %v4481_v11  ;;  %vm407_vm13 = vcmp.ne.f32.partialorder %v4450_v27, %v4450_v27 }
 0x501   :  { %1477 = vrot.lane.b32.xlu0 %v1475_v16, %s3509_s20  ;;  %v4513_v41 = vand.u32 2147483647, %v4502_v14 }
 0x502   :  { %v4510_v61 = vmul.f32 %v4500_v42, %v4500_v42 }
 0x503   :  { %v3476_v21 = vpop.eup %3475  ;;  %v1151_v36 = vmax.f32 %v4505_v34, %v4513_v41  ;;  %vm1202_vm15 = vcmp.eq.s32.totalorder %v4513_v41, inf }
 0x504   :  { %v745_v32 = vmul.f32 %v3476_v21, %v743_v43  ;;  %v379_v15 = vmul.f32 0.002785687, %v4510_v61  ;;  %vm4521_vm0 = vmand %vm1201_vm14, %vm1202_vm15  ;;  %vm750_vm5 = vweird.f32 %v3476_v21  ;;  %vm399_vm14 = vcmp.lt.f32.partialorder %v4431_v55, 0.0 }
 0x505   :  { %3477 = vrcp.f32 %v1151_v36  ;;  %vm751_vm6 = vmor %vm749_vm2, %vm750_vm5  ;;  %v1163_v1 = vand.u32 2147483648, %v1151_v36  ;;  %vm1157_vm8 = vweird.f32 %v1151_v36  ;;  %vm406_vm15 = vcmp.ne.f32.partialorder %v4431_v55, %v4431_v55 }
 0x506   :  { %v746_v9 = vsub.f32 1.0, %v745_v32  ;;  %v380_v59 = vadd.f32 -0.015866, %v379_v15  ;;  %vm404_vm5 = vcmp.eq.f32.partialorder %v4450_v27, 0.0  ;;  %vm408_vm2 = vmor %vm406_vm15, %vm407_vm13  ;;  %vm1196_vm13 = vcmp.ne.f32.partialorder %v4502_v14, %v4502_v14 }
 0x507   :  { %vm1193_vm15 = vcmp.eq.f32.partialorder %v4502_v14, 0.0 }
 0x508   :  { %v747_v52 = vmul.f32 %v3476_v21, %v746_v9  ;;  %v381_v13 = vmul.f32 %v380_v59, %v4510_v61  ;;  %v1161_v9 = vand.u32 2147483647, %v1151_v36 }
 0x509   :  { %1490 = vrot.lane.b32.xlu0 %v4525_v29, %s3523_s7 }
 0x50a   :  { %v748_v20 = vadd.f32 %v3476_v21, %v747_v52  ;;  %v382_v49 = vadd.f32 0.04247222, %v381_v13  ;;  %v1164_v13 = vor.u32 1.1754944e-38, %v1163_v1  ;;  %vm1162_vm9 = vcmp.eq.f32.partialorder %v1161_v9, 8.507059e+37 }
 0x50b   :  { %v3478_v5 = vpop.eup %3477 }
 0x50c   :  { %v752_v54 = vsel %vm751_vm6, %v3476_v21, %v748_v20  ;;  %v1153_v37 = vmul.f32 %v3478_v5, %v1151_v36  ;;  %v383_v16 = vmul.f32 %v382_v49, %v4510_v61  ;;  %vm1158_vm7 = vweird.f32 %v3478_v5 }
 0x50d   :  { %v757_v58 = vsel %vm754_vm3, %v756_v62, %v752_v54  ;;  %vm1159_vm4 = vmor %vm1157_vm8, %vm1158_vm7  ;;  %v1150_v20 = vmin.f32 %v4505_v34, %v4513_v41  ;;  %vm777_vm6 = vcmp.gt.f32.partialorder %v4481_v11, %v4476_v3  ;;  %vm783_vm3 = vcmp.lt.s32.totalorder %v4471_v35, 0 }
 0x50e   :  { %v4533_v53 = vmul.f32 %v757_v58, %v742_v17  ;;  %v1154_v32 = vsub.f32 1.0, %v1153_v37  ;;  %v384_v56 = vadd.f32 -0.074975304, %v383_v16  ;;  %vm780_vm7 = vcmp.lt.f32.partialorder %v4471_v35, 0.0 }
 0x50f   :  { %vm787_vm8 = vcmp.ne.f32.partialorder %v4471_v35, %v4471_v35 }
 0x510   :  { %v4537_v43 = vmul.f32 %v4533_v53, %v4533_v53  ;;  %v1155_v15 = vmul.f32 %v3478_v5, %v1154_v32  ;;  %v385_v0 = vmul.f32 %v384_v56, %v4510_v61 }
 0x512   :  { %v760_v21 = vmul.f32 0.002785687, %v4537_v43  ;;  %v1156_v59 = vadd.f32 %v3478_v5, %v1155_v15  ;;  %v386_v52 = vadd.f32 0.1064488, %v385_v0 }
 0x514   :  { %v761_v4 = vadd.f32 -0.015866, %v760_v21  ;;  %v1160_v62 = vsel %vm1159_vm4, %v3478_v5, %v1156_v59  ;;  %v387_v49 = vmul.f32 %v386_v52, %v4510_v61  ;;  %vm785_vm4 = vcmp.eq.f32.partialorder %v4478_v33, 0.0 }
 0x515   :  { %v1165_v54 = vsel %vm1162_vm9, %v1164_v13, %v1160_v62 }
 0x516   :  { %v762_v17 = vmul.f32 %v761_v4, %v4537_v43  ;;  %v4545_v58 = vmul.f32 %v1165_v54, %v1150_v20  ;;  %v388_v37 = vadd.f32 -0.14207031, %v387_v49 }
 0x518   :  { %v763_v16 = vadd.f32 0.04247222, %v762_v17  ;;  %v1167_v36 = vmul.f32 %v4545_v58, %v4545_v58  ;;  %v389_v32 = vmul.f32 %v388_v37, %v4510_v61 }
 0x51a   :  { %v764_v56 = vmul.f32 %v763_v16, %v4537_v43  ;;  %v1168_v1 = vmul.f32 0.002785687, %v1167_v36  ;;  %v390_v15 = vadd.f32 0.19993454, %v389_v32 }
 0x51c   :  { %v765_v5 = vadd.f32 -0.074975304, %v764_v56  ;;  %v1169_v9 = vadd.f32 -0.015866, %v1168_v1  ;;  %v391_v0 = vmul.f32 %v390_v15, %v4510_v61 }
 0x51e   :  { %v766_v21 = vmul.f32 %v765_v5, %v4537_v43  ;;  %v1170_v59 = vmul.f32 %v1169_v9, %v1167_v36  ;;  %v392_v52 = vadd.f32 -0.33333147, %v391_v0 }
 0x520   :  { %v767_v4 = vadd.f32 0.1064488, %v766_v21  ;;  %v1171_v13 = vadd.f32 0.04247222, %v1170_v59  ;;  %v393_v20 = vmul.f32 %v392_v52, %v4510_v61  ;;  %v403_v21 = vsel %vm402_vm12, 3.1415927, %v5612_v31 }
 0x521   :  { %vm1191_vm12 = vcmp.lt.s32.totalorder %v4489_v19, 0 }
 0x522   :  { %v768_v62 = vmul.f32 %v767_v4, %v4537_v43  ;;  %v1172_v49 = vmul.f32 %v1171_v13, %v1167_v36  ;;  %v394_v17 = vmul.f32 %v393_v20, %v4500_v42  ;;  %v411_v4 = vsel %vm399_vm14, 2.3561945, %v5613_v28 }
 0x523   :  { %v1192_v6 = vsel %vm1191_vm12, 3.1415927, %v5612_v31  ;;  %vm5584_vm12 = vcmask 72704  }
 0x524   :  { %v769_v54 = vadd.f32 -0.14207031, %v768_v62  ;;  %v1173_v37 = vadd.f32 -0.074975304, %v1172_v49  ;;  %v395_v16 = vadd.f32 %v394_v17, %v4500_v42 }
 0x526   :  { %v770_v32 = vmul.f32 %v769_v54, %v4537_v43  ;;  %v1174_v56 = vmul.f32 %v1173_v37, %v1167_v36  ;;  %v397_v1 = vsub.f32 1.5707964, %v395_v16  ;;  %v417_v54 = vand.u32 2147483648, %v4450_v27 }
 0x527   :  { %v784_v27 = vsel %vm783_vm3, 3.1415927, %v5612_v31  ;;  %v1374_v31 = vpop.permute.xlu1 %1373  ;;  %vm1586_vm3 = vcmask 15360  }
 0x528   :  { %v771_v15 = vadd.f32 0.19993454, %v770_v32  ;;  %v1175_v61 = vadd.f32 0.1064488, %v1174_v56  ;;  %v398_v5 = vsel %vm396_vm10, %v397_v1, %v395_v16  ;;  %vm1185_vm10 = vcmp.gt.f32.partialorder %v4513_v41, %v4505_v34 }
 0x529   :  { %v400_v0 = vsub.f32 3.1415927, %v398_v5  ;;  %v4621_v45 = vsub.f32 %v4405_v12, %v1374_v31 }
 0x52a   :  { %v772_v9 = vmul.f32 %v771_v15, %v4537_v43  ;;  %v1176_v42 = vmul.f32 %v1175_v61, %v1167_v36 }
 0x52b   :  { %v401_v23 = vsel %vm399_vm14, %v400_v0, %v398_v5  ;;  %v792_v5 = vsel %vm780_vm7, 2.3561945, %v5613_v28  ;;  %vm1188_vm14 = vcmp.lt.f32.partialorder %v4489_v19, 0.0 }
 0x52c   :  { %v773_v44 = vadd.f32 -0.33333147, %v772_v9  ;;  %v1177_v59 = vadd.f32 -0.14207031, %v1176_v42  ;;  %v405_v52 = vsel %vm404_vm5, %v403_v21, %v401_v23  ;;  %v798_v42 = vand.u32 2147483648, %v4478_v33 }
 0x52d   :  { %v409_v20 = vsel %vm408_vm2, nan, %v405_v52  ;;  %v1200_v41 = vsel %vm1188_vm14, 2.3561945, %v5613_v28 }
 0x52e   :  { %v774_v13 = vmul.f32 %v773_v44, %v4537_v43  ;;  %v1178_v62 = vmul.f32 %v1177_v59, %v1167_v36  ;;  %v415_v49 = vsel %vm4462_vm1, %v411_v4, %v409_v20  ;;  %vm788_vm1 = vcmp.ne.f32.partialorder %v4478_v33, %v4478_v33 }
 0x52f   :  { %v416_v17 = vand.u32 2147483647, %v415_v49  ;;  %vm789_vm9 = vmor %vm787_vm8, %vm788_vm1  ;;  %v1206_v4 = vand.u32 2147483648, %v4502_v14  ;;  %v4613_v49 = vpop.permute.xlu2 %1381  ;;  %vm1588_vm1 = vcmask 23552   ;;  %vm1592_vm8 = vcmask 39936  }
 0x530   :  { %v775_v55 = vmul.f32 %v774_v13, %v4533_v53  ;;  %v1179_v37 = vadd.f32 0.19993454, %v1178_v62 }
 0x531   :  { %v4576_v32 = vor.u32 %v417_v54, %v416_v17 }
 0x532   :  { %v776_v16 = vadd.f32 %v775_v55, %v4533_v53  ;;  %v1180_v56 = vmul.f32 %v1179_v37, %v1167_v36  ;;  %v1391_v55 = vpop.permute.xlu1 %1390 }
 0x534   :  { %v778_v1 = vsub.f32 1.5707964, %v776_v16  ;;  %v1181_v43 = vadd.f32 -0.33333147, %v1180_v56  ;;  %v1384_v56 = vmul.f32 %v4613_v49, %v4621_v45 }
 0x536   :  { %v779_v40 = vsel %vm777_vm6, %v778_v1, %v776_v16  ;;  %v1182_v61 = vmul.f32 %v1181_v43, %v1167_v36  ;;  %vm1584_vm6 = vcmask 7168  }
 0x537   :  { %v781_v15 = vsub.f32 3.1415927, %v779_v40  ;;  %v1469_v14 = vpop.permute.xlu2 %1468 }
 0x538   :  { %v1183_v3 = vmul.f32 %v1182_v61, %v4545_v58 }
 0x539   :  { %v782_v53 = vsel %vm780_vm7, %v781_v15, %v779_v40  ;;  %v1393_v40 = vmul.f32 %v1391_v55, %v4621_v45  ;;  %vm1590_vm7 = vcmask 31744  }
 0x53a   :  { %v786_v11 = vsel %vm785_vm4, %v784_v27, %v782_v53  ;;  %v1184_v0 = vadd.f32 %v1183_v3, %v4545_v58  ;;  %v1451_v54 = vpop.permute.xlu1 %1450  ;;  %v5624_v3 = vld [vmem:[#allocation5_spill] sm:$0xff]  ;;  %vm1594_vm4 = vcmask 48128  }
 0x53b   :  { %v790_v9 = vsel %vm789_vm9, nan, %v786_v11  ;;  %v1453_v27 = vmul.f32 %v1451_v54, %v3759_v8  ;;  %v1298_v11 = vmax.f32 %v5624_v3, 1e-07  ;;  %vm1596_vm9 = vcmask 56320  }
 0x53c   :  { %v796_v36 = vsel %vm4491_vm11, %v792_v5, %v790_v9  ;;  %v1186_v35 = vsub.f32 1.5707964, %v1184_v0  ;;  %vm1195_vm11 = vcmp.ne.f32.partialorder %v4489_v19, %v4489_v19 }
 0x53d   :  { %v797_v21 = vand.u32 2147483647, %v796_v36  ;;  %vm1197_vm5 = vmor %vm1195_vm11, %vm1196_vm13  ;;  %3479 = vrsqrt.f32 %v1298_v11  ;;  %vm1308_vm2 = vcmp.eq.f32.partialorder %v1298_v11, 0.0  ;;  %vm5548_vm13 = vcmask 80896  }
 0x53e   :  { %v1187_v44 = vsel %vm1185_vm10, %v1186_v35, %v1184_v0  ;;  %v1471_v0 = vmul.f32 %v1469_v14, %v3759_v8  ;;  %vm5585_vm10 = vcmask 64512   ;;  %vm5546_vm11 = vcmask 97280  }
 0x53f   :  { %v4597_v23 = vor.u32 %v798_v42, %v797_v21  ;;  %v1189_v59 = vsub.f32 3.1415927, %v1187_v44  ;;  %v1460_v1 = vpop.permute.xlu2 %1459 }
 0x540   :  { %v1462_v35 = vmul.f32 %v1460_v1, %v3759_v8 }
 0x541   :  { %v1190_v33 = vsel %vm1188_vm14, %v1189_v59, %v1187_v44  ;;  %v800_v31 = vadd.f32 3.1415927, %v4597_v23  ;;  %vm5547_vm14 = vcmask 89088  }
 0x542   :  { %v1194_v34 = vsel %vm1193_vm15, %v1192_v6, %v1190_v33  ;;  %v1438_v43 = vpop.permute.xlu1 %1437  ;;  %v5625_v6 = vld [vmem:[#allocation6_spill] sm:$0xff]  ;;  %vm5545_vm15 = vcmask 105472  }
 0x543   :  { %v1198_v58 = vsel %vm1197_vm5, nan, %v1194_v34  ;;  %v1440_v15 = vmul.f32 %v1438_v43, %v4621_v45  ;;  %v3480_v44 = vpop.eup %3479  ;;  %v66_v33 = vmul.f32 %v4143_v26, %v5625_v6  ;;  %vm5544_vm5 = vcmask 113664  }
 0x544   :  { %v1204_v52 = vsel %vm4521_vm0, %v1200_v41, %v1198_v58  ;;  %v1300_v59 = vmul.f32 %v3480_v44, %v1298_v11  ;;  %v163_v58 = vmul.f32 0.31830987, %v4346_v38  ;;  %vm1306_vm0 = vcmp.eq.f32.partialorder %v1298_v11, inf }
 0x545   :  { %v1205_v13 = vand.u32 2147483647, %v1204_v52  ;;  %v544_v52 = vmul.f32 0.31830987, %v4394_v22  ;;  %v1309_v22 = vand.u32 2147483648, %v1298_v11 }
 0x546   :  { %v1301_v34 = vmul.f32 %v3480_v44, %v1300_v59 }
 0x547   :  { %v4610_v20 = vor.u32 %v1206_v4, %v1205_v13  ;;  %v1428_v61 = vpop.permute.xlu2 %1427  ;;  %v419_v13 = vadd.f32 3.1415927, %v4576_v32 }
 0x548   :  { %v1430_v5 = vmul.f32 %v1428_v61, %v4621_v45  ;;  %v1302_v41 = vmul.f32 0.5, %v1301_v34 }
 0x54a   :  { %v1303_v4 = vsub.f32 1.5, %v1302_v41 }
 0x54c   :  { %v1304_v26 = vmul.f32 %v3480_v44, %v1303_v4 }
 0x54e   :  { %v1305_v55 = vmul.f32 %v1304_v26, %v1298_v11 }
 0x54f   :  { %v1487_v42 = vpop.permute.xlu2 %1486 }
 0x550   :  { %v1307_v38 = vsel %vm1306_vm0, %v1298_v11, %v1305_v55  ;;  %vm5543_vm0 = vcmask 121856  }
 0x551   :  { %v4662_v54 = vsel %vm1308_vm2, %v1309_v22, %v1307_v38  ;;  %vm5542_vm2 = vcmask 130048  }
 0x553   :  { %v1495_v62 = vpop.permute.xlu0 %1494 }
 0x554   :  { %v1497_v19 = vmul.f32 %v1495_v62, %v3759_v8  ;;  %v420_v62 = vmul.f32 0.15915494, %v419_v13 }
 0x556   :  { %1499 = vrot.lane.b32.xlu1 %v1497_v19, %s3509_s20  ;;  %v801_v19 = vmul.f32 0.15915494, %v800_v31 }
 0x55b   :  { %v1504_v17 = vpop.permute.xlu0 %1503 }
 0x55c   :  { %v1506_v28 = vmul.f32 %v1504_v17, %v3759_v8  ;;  %v5626_v17 = vld [vmem:[#allocation3_spill] sm:$0xff] }
 0x55e   :  { %1377 = vrot.lane.b32.xlu1 %v3646_v51, %s3506_s17  ;;  %1508 = vrot.lane.b32.xlu0 %v1506_v28, %s3510_s21  ;;  %v5627_v28 = vld [vmem:[#allocation4_spill] sm:$0xff] }
 0x55f   :  { %v1293_v14 = vmul.f32 %v5627_v28, %v5626_v17 }
 0x563   :  { %v4623_v37 = vpop.permute.xlu0 %1403 }
 0x564   :  { %v1406_v16 = vmul.f32 %v4623_v37, %v4621_v45 }
 0x566   :  { %1422 = vrot.lane.b32.xlu1 %v4525_v29, %s3539_s6  ;;  %1386 = vrot.lane.b32.xlu0 %v1384_v56, %s3509_s20 }
 0x567   :  { %1408 = vrot.lane.b32.xlu2 %v1406_v16, %s3509_s20 }
 0x56b   :  { %v1413_v12 = vpop.permute.xlu0 %1412 }
 0x56c   :  { %v1415_v53 = vmul.f32 %v1413_v12, %v4621_v45 }
 0x56e   :  { %1395 = vrot.lane.b32.xlu1 %v1393_v40, %s3510_s21  ;;  %1446 = vrot.lane.b32.xlu0 %v3646_v51, %s3514_s25  ;;  %v1400_v40 = vpop.permute.xlu2 %1399 }
 0x56f   :  { %1442 = vrot.lane.b32.xlu2 %v1440_v15, %s3510_s21 }
 0x573   :  { %v1478_v9 = vpop.permute.xlu0 %1477 }
 0x574   :  { %v1480_v36 = vadd.f32 %v1478_v9, %v1471_v0 }
 0x576   :  { %1455 = vrot.lane.b32.xlu1 %v1453_v27, %s3509_s20  ;;  %1417 = vrot.lane.b32.xlu0 %v1415_v53, %s3510_s21  ;;  %v1489_v21 = vadd.f32 %v1487_v42, %v1480_v36  ;;  %v859_v27 = vmul.f32 %v4257_v47, %v4176_v46  ;;  %v956_v36 = vmul.f32 0.31830987, %v4418_v63  ;;  %v1402_v42 = vmul.f32 %v1400_v40, %v4621_v45  ;;  %v1629_v40 = vld [vmem:[%s5524_s1] sm:$0x1] }
 0x577   :  { %1432 = vrot.lane.b32.xlu2 %v1430_v5, %s3509_s20  ;;  %v1208_v46 = vadd.f32 3.1415927, %v4610_v20 }
 0x579   :  { %v1209_v44 = vmul.f32 0.15915494, %v1208_v46 }
 0x57b   :  { %v1491_v32 = vpop.permute.xlu0 %1490 }
 0x57c   :  { %v1493_v16 = vmul.f32 %v1491_v32, %v3759_v8 }
 0x57e   :  { %1464 = vrot.lane.b32.xlu0 %v1462_v35, %s3510_s21  ;;  %1615 = vrot.lane.b32.xlu1 %v1489_v21, %s3507_s18 }
 0x586   :  { %1523 = vrot.lane.b32.xlu0 %v66_v33, %s3540_s4  ;;  %1526 = vrot.lane.b32.xlu1 %v66_v33, %s3541_s10  ;;  %v1371_v33 = vadd.f32 3.1415927, %v4128_v25 }
 0x588   :  { %v1372_v20 = vmul.f32 0.15915494, %v1371_v33  ;;  %v3446_v33 = vld [vmem:[%s5523_s2] ss:$0 sm:$0xff]  ;;  %s5632_s2 = smov 115  }
 0x58e   :  { %1534 = vrot.lane.b32.xlu0 %v163_v58, %s3507_s18  ;;  %1538 = vrot.lane.b32.xlu1 %v544_v52, %s3519_s30 }
 0x596   :  { %1546 = vrot.lane.b32.xlu0 %v420_v62, %s3521_s5  ;;  %1550 = vrot.lane.b32.xlu1 %v801_v19, %s3505_s16 }
 0x59e   :  { %1558 = vrot.lane.b32.xlu0 %v1293_v14, %s3506_s17  ;;  %1561 = vrot.lane.b32.xlu1 %v4662_v54, %s3536_s19 }
 0x5c1   :  { %v1409_v3 = vpop.permute.xlu2 %1408 }
 0x5c2   :  { %v1411_v47 = vadd.f32 %v1409_v3, %v1402_v42 }
 0x5c8   :  { %v1500_v23 = vpop.permute.xlu1 %1499 }
 0x5c9   :  { %v1502_v56 = vadd.f32 %v1500_v23, %v1493_v16  ;;  %v1443_v59 = vpop.permute.xlu2 %1442 }
 0x5d0   :  { %v4668_v1 = vpop.permute.xlu1 %1377  ;;  %v1509_v43 = vpop.permute.xlu0 %1508 }
 0x5d1   :  { %v1511_v12 = vadd.f32 %v1509_v43, %v1502_v56  ;;  %v1380_v53 = vmul.f32 %v4668_v1, %v4621_v45  ;;  %v1433_v4 = vpop.permute.xlu2 %1432 }
 0x5d3   :  { %1619 = vrot.lane.b32.xlu2 %v1511_v12, %s3530_s29 }
 0x5d8   :  { %v1423_v15 = vpop.permute.xlu1 %1422  ;;  %v1387_v61 = vpop.permute.xlu0 %1386 }
 0x5d9   :  { %v1389_v11 = vadd.f32 %v1387_v61, %v1380_v53  ;;  %v1425_v58 = vmul.f32 %v1423_v15, %v4621_v45 }
 0x5db   :  { %1530 = vrot.lane.b32.xlu2 %v859_v27, %s3531_s9  ;;  %v1435_v13 = vadd.f32 %v1433_v4, %v1425_v58  ;;  %s3543_s9 = smov 16   ;;  %v1631_v27 = vmul.f32 1.442695, %v1629_v40 }
 0x5dd   :  { %v1445_v31 = vadd.f32 %v1443_v59, %v1435_v13  ;;  %3481 = vpow2.f32 %v1631_v27 }
 0x5e0   :  { %v1396_v5 = vpop.permute.xlu1 %1395  ;;  %v1447_v9 = vpop.permute.xlu0 %1446 }
 0x5e1   :  { %v1398_v0 = vadd.f32 %v1396_v5, %v1389_v11  ;;  %v1449_v63 = vmul.f32 %v1447_v9, %v3759_v8 }
 0x5e3   :  { %1542 = vrot.lane.b32.xlu2 %v956_v36, %s3542_s12  ;;  %1569 = vrot.lane.b32.xlu0 %v1398_v0, %s3504_s15  ;;  %v3482_v46 = vpop.eup %3481  ;;  %s5629_s12 = smov 122  }
 0x5e4   :  { %v1634_v59 = vperm.slane %v3482_v46, 0 }
 0x5e8   :  { %v1418_v35 = vpop.permute.xlu0 %1417  ;;  %v1456_v6 = vpop.permute.xlu1 %1455 }
 0x5e9   :  { %v1420_v21 = vadd.f32 %v1418_v35, %v1411_v47  ;;  %v1458_v34 = vadd.f32 %v1456_v6, %v1449_v63 }
 0x5eb   :  { %1554 = vrot.lane.b32.xlu2 %v1209_v44, %s3516_s27  ;;  %1573 = vrot.lane.b32.xlu1 %v1420_v21, %s3536_s19 }
 0x5f0   :  { %v1465_v41 = vpop.permute.xlu0 %1464  ;;  %v1616_v26 = vpop.permute.xlu1 %1615 }
 0x5f1   :  { %v1467_v52 = vadd.f32 %v1465_v41, %v1458_v34 }
 0x5f3   :  { %1565 = vrot.lane.b32.xlu2 %v1372_v20, %s3539_s6  ;;  %1581 = vrot.lane.b32.xlu0 %v1467_v52, %s3504_s15 }
 0x5f8   :  { %v1524_v45 = vpop.permute.xlu0 %1523  ;;  %v1527_v62 = vpop.permute.xlu1 %1526 }
 0x5f9   :  { %v1585_v28 = vsel %vm1584_vm6, %v1524_v45, %v1527_v62 }
 0x5fb   :  { %1577 = vrot.lane.b32.xlu2 %v1445_v31, %s3539_s6 }
 0x600   :  { %v1535_v55 = vpop.permute.xlu0 %1534  ;;  %v1539_v38 = vpop.permute.xlu1 %1538 }
 0x608   :  { %v1547_v17 = vpop.permute.xlu0 %1546  ;;  %v1551_v32 = vpop.permute.xlu1 %1550 }
 0x610   :  { %v1559_v12 = vpop.permute.xlu0 %1558  ;;  %v1562_v61 = vpop.permute.xlu1 %1561 }
 0x62d   :  { %v1620_v8 = vpop.permute.xlu2 %1619 }
 0x62e   :  { %v1622_v25 = vsel %vm1584_vm6, %v1616_v26, %v1620_v8 }
 0x62f   :  { %1624 = vrot.lane.b32.xlu1 %v1622_v25, %s3543_s9 }
 0x635   :  { %v1531_v19 = vpop.permute.xlu2 %1530 }
 0x636   :  { %v1587_v14 = vsel %vm1586_vm3, %v1585_v28, %v1531_v19 }
 0x637   :  { %v1589_v23 = vsel %vm1588_vm1, %v1587_v14, %v1535_v55  ;;  %v5555_v14 = vmov 2475754826  }
 0x638   :  { %v1591_v56 = vsel %vm1590_vm7, %v1589_v23, %v1539_v38  ;;  %v5553_v23 = vmov 2131351028  }
 0x63d   :  { %v1543_v22 = vpop.permute.xlu2 %1542 }
 0x63e   :  { %v1593_v43 = vsel %vm1592_vm8, %v1591_v56, %v1543_v22 }
 0x63f   :  { %v1595_v15 = vsel %vm1594_vm4, %v1593_v43, %v1547_v17  ;;  %v5551_v17 = vmov 683565275  }
 0x640   :  { %v1597_v53 = vsel %vm1596_vm9, %v1595_v15, %v1551_v32 }
 0x645   :  { %v1555_v16 = vpop.permute.xlu2 %1554 }
 0x646   :  { %v1599_v3 = vsel %vm5585_vm10, %v1597_v53, %v1555_v16 }
 0x647   :  { %v1601_v9 = vsel %vm5584_vm12, %v1599_v3, %v1559_v12  ;;  %v5557_v12 = vmov 2102212464   ;;  %v5559_v3 = vmov 1326507024  }
 0x648   :  { %v1603_v36 = vsel %vm5548_vm13, %v1601_v9, %v1562_v61  ;;  %v3548_v61 = vmov 920167782  }
 0x64d   :  { %v1566_v11 = vpop.permute.xlu2 %1565 }
 0x64e   :  { %v1605_v42 = vsel %vm5547_vm14, %v1603_v36, %v1566_v11 }
 0x655   :  { %v1570_v5 = vpop.permute.xlu0 %1569  ;;  %v1578_v44 = vpop.permute.xlu2 %1577 }
 0x656   :  { %v1607_v47 = vsel %vm5546_vm11, %v1605_v42, %v1570_v5 }
 0x65d   :  { %v1574_v0 = vpop.permute.xlu1 %1573 }
 0x65e   :  { %v1609_v35 = vsel %vm5545_vm15, %v1607_v47, %v1574_v0 }
 0x65f   :  { %v1611_v6 = vsel %vm5544_vm5, %v1609_v35, %v1578_v44 }
 0x665   :  { %v1582_v21 = vpop.permute.xlu0 %1581 }
 0x666   :  { %v1613_v63 = vsel %vm5543_vm0, %v1611_v6, %v1582_v21 }
 0x6a1   :  { %v1625_v34 = vpop.permute.xlu1 %1624 }
 0x6a2   :  { %v1628_v41 = vsel %vm5542_vm2, %v1613_v63, %v1625_v34 }
 0x6a3   :  { %v1636_v58 = vmul.f32 %v1634_v59, %v1628_v41 }
 0x6a5   :  { %v4712_v52 = vadd.f32 %v3446_v33, %v1636_v58 }
 0x6a7   :  { %2011 = vrot.lane.b32.xlu1 %v4712_v52, %s3529_s13  ;;  %1967 = vrot.lane.b32.xlu0 %v4712_v52, %s3503_s14  ;;  %v4719_v20 = vmul.f32 3.1415927, %v4712_v52 }
 0x6a8   :  { %1994 = vrot.lane.b32.xlu2 %v4712_v52, %s5629_s12 }
 0x6a9   :  { %5628 = vst [vmem:[#allocation5_spill] sm:$0xff] %v4719_v20  ;;  %v2155_v4 = vand.u32 2147483647, %v4719_v20  ;;  %v2158_v13 = vand.u32 2139095040, %v4719_v20  ;;  %vm2298_vm13 = vweird.f32 %v4719_v20 }
 0x6ab   :  { %v2159_v31 = vshrl.u32 %v2158_v13, 23  ;;  %v2162_v8 = vand.u32 8388607, %v2155_v4 }
 0x6ad   :  { %v3392_v26 = vadd.s32 4294967169, %v2159_v31  ;;  %v2163_v45 = vor.u32 8388608, %v2162_v8 }
 0x6af   :  { %2030 = vrot.lane.b32.xlu1 %v4712_v52, %s3507_s18  ;;  %1990 = vrot.lane.b32.xlu0 %v4712_v52, %s3524_s8  ;;  %v2165_v25 = vadd.s32 1, %v3392_v26  ;;  %v4733_v38 = vshll.u32 %v2163_v45, 8 }
 0x6b0   :  { %2020 = vrot.lane.b32.xlu2 %v4712_v52, %s3530_s29 }
 0x6b1   :  { %vm2166_vm2 = vcmp.gt.s32.totalorder %v2165_v25, 0  ;;  %v2204_v36 = vand.u32 65535, %v4733_v38  ;;  %v2205_v26 = vshrl.u32 %v4733_v38, 16 }
 0x6b2   :  { %v2167_v62 = vsel %vm2166_vm2, %v2165_v25, 0 }
 0x6b3   :  { %v2169_v19 = vand.u32 31, %v2167_v62  ;;  %v2168_v22 = vshrl.u32 %v2167_v62, 5 }
 0x6b5   :  { %v2170_v55 = vsub.s32 32, %v2169_v19  ;;  %v2172_v28 = vshll.u32 %v5551_v17, %v2169_v19  ;;  %v2175_v32 = vshll.u32 %v5555_v14, %v2169_v19  ;;  %v2178_v16 = vshll.u32 %v5553_v23, %v2169_v19 }
 0x6b6   :  { %v2181_v40 = vshll.u32 %v5557_v12, %v2169_v19  ;;  %v2184_v53 = vshll.u32 %v3548_v61, %v2169_v19  ;;  %vm2187_vm2 = vcmp.lt.s32.totalorder %v2168_v22, 1  ;;  %vm2189_vm0 = vcmp.lt.s32.totalorder %v2168_v22, 3 }
 0x6b7   :  { %1980 = vrot.lane.b32.xlu1 %v4712_v52, %s3532_s11  ;;  %2071 = vrot.lane.b32.xlu0 %v4712_v52, %s3519_s30  ;;  %v2173_v56 = vshrl.u32 %v5555_v14, %v2170_v55  ;;  %v2176_v43 = vshrl.u32 %v5553_v23, %v2170_v55  ;;  %v2179_v15 = vshrl.u32 %v5557_v12, %v2170_v55  ;;  %vm2190_vm5 = vcmp.lt.s32.totalorder %v2168_v22, 4 }
 0x6b8   :  { %1971 = vrot.lane.b32.xlu2 %v4712_v52, %s3521_s5  ;;  %v2182_v27 = vshrl.u32 %v3548_v61, %v2170_v55  ;;  %v2185_v11 = vshrl.u32 %v5559_v3, %v2170_v55  ;;  %v2171_v5 = vshrl.u32 %v5551_v17, %v2170_v55  ;;  %vm2188_vm15 = vcmp.lt.s32.totalorder %v2168_v22, 2 }
 0x6b9   :  { %v2174_v9 = vor.u32 %v2173_v56, %v2172_v28  ;;  %v2177_v0 = vor.u32 %v2176_v43, %v2175_v32  ;;  %v2180_v42 = vor.u32 %v2179_v15, %v2178_v16 }
 0x6ba   :  { %v2183_v46 = vor.u32 %v2182_v27, %v2181_v40  ;;  %v2186_v47 = vor.u32 %v2185_v11, %v2184_v53  ;;  %v5549_v11 = vmov 0  }
 0x6bb   :  { %v2191_v35 = vsel %vm2187_vm2, %v2171_v5, %v2174_v9  ;;  %v2195_v21 = vsel %vm2187_vm2, %v2174_v9, %v2177_v0  ;;  %v2192_v44 = vsel %vm2190_vm5, %v2180_v42, 2102212464  ;;  %v2199_v6 = vsel %vm2187_vm2, %v2177_v0, %v2180_v42 }
 0x6bc   :  { %v2196_v59 = vsel %vm2190_vm5, %v2183_v46, 920167782  ;;  %v2200_v63 = vsel %vm2190_vm5, %v2186_v47, 1326507024  ;;  %v2193_v33 = vsel %vm2189_vm0, %v2177_v0, %v2192_v44 }
 0x6bd   :  { %v2197_v34 = vsel %vm2189_vm0, %v2180_v42, %v2196_v59  ;;  %v2201_v41 = vsel %vm2189_vm0, %v2183_v46, %v2200_v63  ;;  %v2194_v58 = vsel %vm2188_vm15, %v2191_v35, %v2193_v33 }
 0x6be   :  { %v2198_v13 = vsel %vm2188_vm15, %v2195_v21, %v2197_v34  ;;  %v2202_v31 = vsel %vm2188_vm15, %v2199_v6, %v2201_v41 }
 0x6bf   :  { %v2206_v8 = vand.u32 65535, %v2202_v31  ;;  %v2207_v25 = vshrl.u32 %v2202_v31, 16  ;;  %v2228_v45 = vand.u32 65535, %v2198_v13  ;;  %v2229_v62 = vshrl.u32 %v2198_v13, 16 }
 0x6c1   :  { %v2209_v19 = vmul.u32 %v2207_v25, %v2204_v36  ;;  %v2210_v55 = vmul.u32 %v2206_v8, %v2205_v26  ;;  %v2231_v28 = vmul.u32 %v2229_v62, %v2204_v36  ;;  %v2232_v32 = vmul.u32 %v2228_v45, %v2205_v26 }
 0x6c2   :  { %v2208_v16 = vmul.u32 %v2206_v8, %v2204_v36  ;;  %v2211_v43 = vmul.u32 %v2207_v25, %v2205_v26  ;;  %v2230_v22 = vmul.u32 %v2228_v45, %v2204_v36  ;;  %v2233_v53 = vmul.u32 %v2229_v62, %v2205_v26 }
 0x6c3   :  { %v2212_v56 = vshll.u32 %v2209_v19, 16  ;;  %v2234_v40 = vshll.u32 %v2231_v28, 16  ;;  %v2214_v15 = vshll.u32 %v2210_v55, 16  ;;  %v2236_v9 = vshll.u32 %v2232_v32, 16 }
 0x6c4   :  { %v2213_v36 = vshrl.u32 %v2209_v19, 16  ;;  %v2235_v59 = vshrl.u32 %v2231_v28, 16  ;;  %v2215_v63 = vshrl.u32 %v2210_v55, 16  ;;  %v2237_v34 = vshrl.u32 %v2232_v32, 16 }
 0x6c5   :  { %vm2216_vm5 = vc.u32 %v2208_v16, %v2212_v56  ;;  %v2218_v27 = vadd.s32 %v2212_v56, %v2208_v16  ;;  %vm2238_vm15 = vc.u32 %v2230_v22, %v2234_v40  ;;  %v2240_v0 = vadd.s32 %v2234_v40, %v2230_v22 }
 0x6c6   :  { %v2217_v5 = vsel %vm2216_vm5, 1, %v5549_v11  ;;  %v2239_v46 = vsel %vm2238_vm15, 1, %v5549_v11  ;;  %v2248_v45 = vmul.u32 %v4733_v38, %v2194_v58 }
 0x6c7   :  { %v2219_v42 = vadd.s32 %v2217_v5, %v2211_v43  ;;  %vm2220_vm0 = vc.u32 %v2218_v27, %v2214_v15  ;;  %v2241_v35 = vadd.s32 %v2239_v46, %v2233_v53  ;;  %vm2242_vm2 = vc.u32 %v2240_v0, %v2236_v9 }
 0x6c8   :  { %v2221_v47 = vsel %vm2220_vm0, 1, %v5549_v11  ;;  %v2243_v44 = vsel %vm2242_vm2, 1, %v5549_v11  ;;  %v2244_v31 = vadd.s32 %v2240_v0, %v2236_v9  ;;  %vm2157_vm2 = vcmp.lt.s32.totalorder %v4719_v20, 0 }
 0x6c9   :  { %v2223_v21 = vadd.s32 %v2221_v47, %v2219_v42  ;;  %v2245_v6 = vadd.s32 %v2243_v44, %v2241_v35 }
 0x6cb   :  { %v2224_v33 = vadd.s32 %v2223_v21, %v2213_v36  ;;  %v2246_v41 = vadd.s32 %v2245_v6, %v2235_v59 }
 0x6cd   :  { %v2225_v13 = vadd.s32 %v2224_v33, %v2215_v63  ;;  %v2247_v26 = vadd.s32 %v2246_v41, %v2237_v34 }
 0x6cf   :  { %v2249_v8 = vadd.s32 %v2244_v31, %v2225_v13  ;;  %vm2250_vm5 = vc.u32 %v2225_v13, %v2244_v31  ;;  %v2251_v25 = vadd.s32 1, %v2247_v26 }
 0x6d1   :  { %v2252_v62 = vsel %vm2250_vm5, %v2251_v25, %v2247_v26  ;;  %vm2156_vm5 = vcmp.le.f32.partialorder %v2155_v4, 0.7853982 }
 0x6d2   :  { %v2253_v16 = vadd.s32 %v2252_v62, %v2248_v45 }
 0x6d4   :  { %v2254_v19 = vadd.s32 536870912, %v2253_v16 }
 0x6d6   :  { %v2255_v56 = vshrl.u32 %v2254_v19, 30 }
 0x6d8   :  { %v2256_v43 = vshll.u32 %v2255_v56, 30  ;;  %v2279_v21 = vsub.s32 4, %v2255_v56 }
 0x6da   :  { %v2257_v22 = vsub.s32 %v2253_v16, %v2256_v43  ;;  %v2280_v63 = vsel %vm2157_vm2, %v2279_v21, %v2255_v56 }
 0x6db   :  { %v2282_v41 = vsel %vm2156_vm5, 0, %v2280_v63 }
 0x6dc   :  { %vm2258_vm15 = vcmp.lt.s32.totalorder %v2257_v22, 0  ;;  %v2259_v28 = vsub.s32 0, %v2257_v22  ;;  %v2299_v25 = vadd.s32 3, %v2282_v41 }
 0x6de   :  { %v2260_v55 = vsel %vm2258_vm15, %v2259_v28, %v2257_v22  ;;  %v2300_v43 = vand.u32 3, %v2299_v25 }
 0x6df   :  { %v2261_v40 = vclz %v2260_v55 }
 0x6e0   :  { %vm2305_vm15 = vcmp.eq.s32.totalorder %v2300_v43, 2  ;;  %vm2301_vm11 = vcmp.lt.s32.totalorder %v2300_v43, 2 }
 0x6e1   :  { %v3393_v32 = vadd.s32 4294967294, %v2261_v40 }
 0x6e3   :  { %vm3394_vm0 = vcmp.lt.s32.totalorder %v3393_v32, 0 }
 0x6e4   :  { %v2264_v15 = vsel %vm3394_vm0, 0, %v3393_v32 }
 0x6e5   :  { %v2265_v27 = vsub.s32 32, %v2264_v15  ;;  %v2269_v53 = vsub.s32 4294967266, %v2264_v15  ;;  %v2266_v5 = vshll.u32 %v2257_v22, %v2264_v15  ;;  %v2454_v22 = vand.u32 3, %v2282_v41 }
 0x6e7   :  { %v2267_v9 = vshrl.u32 %v2249_v8, %v2265_v27  ;;  %v2270_v0 = vadd.s32 127, %v2269_v53  ;;  %vm2459_vm0 = vcmp.eq.s32.totalorder %v2454_v22, 2  ;;  %vm2455_vm14 = vcmp.lt.s32.totalorder %v2454_v22, 2 }
 0x6e9   :  { %v2268_v42 = vor.u32 %v2267_v9, %v2266_v5  ;;  %v2271_v38 = vshll.u32 %v2270_v0, 23 }
 0x6eb   :  { %v2272_v58 = vor.u32 4788187, %v2271_v38  ;;  %v2275_v47 = vcvt.s32.f32 %v2268_v42 }
 0x6ed   :  { %v2273_v46 = vand.u32 2147483647, %v2272_v58 }
 0x6ef   :  { %v2276_v35 = vmul.f32 %v2275_v47, %v2273_v46 }
 0x6f1   :  { %v2277_v36 = vxor.u32 2147483648, %v2276_v35 }
 0x6f3   :  { %v2278_v44 = vsel %vm2157_vm2, %v2277_v36, %v2276_v35  ;;  %vm2302_vm2 = vcmp.eq.s32.totalorder %v2300_v43, 0 }
 0x6f4   :  { %v2281_v59 = vsel %vm2156_vm5, %v4719_v20, %v2278_v44  ;;  %vm2456_vm5 = vcmp.eq.s32.totalorder %v2454_v22, 0 }
 0x6f5   :  { %v2283_v6 = vmul.f32 %v2281_v59, %v2281_v59 }
 0x6f7   :  { %v2284_v33 = vmul.f32 -0.001358992, %v2283_v6  ;;  %v2291_v34 = vmul.f32 -0.00019511016, %v2283_v6 }
 0x6f9   :  { %v2285_v13 = vadd.f32 0.041655596, %v2284_v33  ;;  %v2292_v31 = vadd.f32 0.008332121, %v2291_v34 }
 0x6fb   :  { %v2286_v26 = vmul.f32 %v2285_v13, %v2283_v6  ;;  %v2293_v8 = vmul.f32 %v2292_v31, %v2283_v6 }
 0x6fd   :  { %v2287_v45 = vadd.f32 -0.4999988, %v2286_v26  ;;  %v2294_v62 = vadd.f32 -0.16666654, %v2293_v8 }
 0x6ff   :  { %v2288_v16 = vmul.f32 %v2287_v45, %v2283_v6  ;;  %v2295_v19 = vmul.f32 %v2294_v62, %v2283_v6 }
 0x701   :  { %v2289_v28 = vadd.f32 1.0, %v2288_v16  ;;  %v2296_v55 = vadd.f32 1.0, %v2295_v19 }
 0x702   :  { %v1995_v4 = vpop.permute.xlu2 %1994 }
 0x703   :  { %v1997_v40 = vmul.f32 %v1995_v4, %v4187_v2  ;;  %v2297_v56 = vmul.f32 %v2296_v55, %v2281_v59  ;;  %v2306_v32 = vxor.u32 2147483648, %v2289_v28 }
 0x705   :  { %1999 = vrot.lane.b32.xlu2 %v1997_v40, %s3505_s16  ;;  %v2303_v15 = vxor.u32 2147483648, %v2297_v56  ;;  %v2307_v27 = vsel %vm2305_vm15, %v2306_v32, %v2297_v56  ;;  %v2461_v53 = vsel %vm2459_vm0, %v2306_v32, %v2297_v56 }
 0x707   :  { %v2304_v5 = vsel %vm2302_vm2, %v2289_v28, %v2303_v15  ;;  %v2458_v9 = vsel %vm2456_vm5, %v2289_v28, %v2303_v15  ;;  %v5633_v28 = vld [vmem:[#allocation2_spill] sm:$0xff] }
 0x708   :  { %v4766_v0 = vsel %vm2301_vm11, %v2304_v5, %v2307_v27  ;;  %v2462_v42 = vsel %vm2455_vm14, %v2458_v9, %v2461_v53 }
 0x709   :  { %5630 = vst [vmem:[#allocation6_spill] sm:$0xff] %v4766_v0  ;;  %v4770_v58 = vsel %vm2298_vm13, nan, %v2462_v42 }
 0x70a   :  { %v2021_v38 = vpop.permute.xlu2 %2020  ;;  %5631 = vst [vmem:[#allocation3_spill] sm:$0xff] %v4770_v58 }
 0x70b   :  { %v2023_v46 = vmul.f32 %v2021_v38, %v4425_v7  ;;  %v2050_v56 = vmul.f32 %v2021_v38, %v3679_v57 }
 0x70d   :  { %2025 = vrot.lane.b32.xlu2 %v2023_v46, %s3512_s23 }
 0x712   :  { %v1972_v33 = vpop.permute.xlu2 %1971 }
 0x713   :  { %v1974_v41 = vmul.f32 %v1972_v33, %v4001_v50 }
 0x719   :  { %v2012_v47 = vpop.permute.xlu1 %2011  ;;  %v1968_v35 = vpop.permute.xlu0 %1967 }
 0x71a   :  { %v2014_v36 = vmul.f32 %v2012_v47, %v4146_v30  ;;  %v2003_v21 = vmul.f32 %v1968_v35, %v4436_v24  ;;  %v2051_v6 = vmul.f32 %v1968_v35, %v4187_v2 }
 0x71c   :  { %2016 = vrot.lane.b32.xlu1 %v2014_v36, %s3505_s16  ;;  %2005 = vrot.lane.b32.xlu0 %v2003_v21, %s3509_s20 }
 0x721   :  { %v4778_v44 = vpop.permute.xlu1 %2030  ;;  %v1991_v59 = vpop.permute.xlu0 %1990 }
 0x722   :  { %v2057_v63 = vmul.f32 %v4778_v44, %v4436_v24  ;;  %v2065_v13 = vmul.f32 %v1991_v59, %v4146_v30  ;;  %v1993_v25 = vmul.f32 %v1991_v59, %v3679_v57 }
 0x724   :  { %2053 = vrot.lane.b32.xlu1 %v2051_v6, %s3505_s16  ;;  %2040 = vrot.lane.b32.xlu0 %v4712_v52, %s5632_s2 }
 0x725   :  { %2059 = vrot.lane.b32.xlu2 %v2057_v63, %s3509_s20 }
 0x729   :  { %v2072_v34 = vpop.permute.xlu0 %2071  ;;  %v1981_v2 = vpop.permute.xlu1 %1980 }
 0x72a   :  { %v2074_v31 = vmul.f32 %v2072_v34, %v4425_v7  ;;  %v1983_v24 = vmul.f32 %v1981_v2, %v4525_v29  ;;  %v2034_v26 = vmul.f32 %v1981_v2, %v4001_v50  ;;  %v2010_v7 = vmul.f32 %v1972_v33, %v3686_v60 }
 0x72b   :  { %v2064_v46 = vmul.f32 %v1981_v2, %v3686_v60 }
 0x72c   :  { %2067 = vrot.lane.b32.xlu0 %v2065_v13, %s3505_s16  ;;  %1976 = vrot.lane.b32.xlu1 %v1974_v41, %s3505_s16  ;;  %v1970_v41 = vmul.f32 %v1968_v35, %v3646_v51 }
 0x72d   :  { %2076 = vrot.lane.b32.xlu2 %v2074_v31, %s3512_s23 }
 0x734   :  { %1985 = vrot.lane.b32.xlu0 %v1983_v24, %s3509_s20 }
 0x73c   :  { %2036 = vrot.lane.b32.xlu0 %v2034_v26, %s3505_s16 }
 0x75f   :  { %v2000_v8 = vpop.permute.xlu2 %1999 }
 0x760   :  { %v2002_v45 = vadd.f32 %v2000_v8, %v1993_v25 }
 0x767   :  { %v2026_v62 = vpop.permute.xlu2 %2025 }
 0x77f   :  { %v2060_v32 = vpop.permute.xlu2 %2059 }
 0x787   :  { %v2077_v59 = vpop.permute.xlu2 %2076 }
 0x78e   :  { %v2017_v16 = vpop.permute.xlu1 %2016  ;;  %v2006_v19 = vpop.permute.xlu0 %2005 }
 0x78f   :  { %v2019_v43 = vadd.f32 %v2017_v16, %v2010_v7  ;;  %v2008_v22 = vadd.f32 %v2006_v19, %v2002_v45  ;;  %v4860_v45 = vld [vmem:[%s5522_s0] sm:$0xff] }
 0x791   :  { %v2028_v4 = vadd.f32 %v2026_v62, %v2019_v43  ;;  %v4800_v55 = vadd.f32 %v2008_v22, %v5633_v28 }
 0x793   :  { %5634 = vst [vmem:[#allocation4_spill] sm:$0xff] %v4800_v55  ;;  %v4803_v40 = vadd.f32 %v2028_v4, %v5633_v28  ;;  %2780 = vrot.lane.b32.xlu1 %v4800_v55, %s3505_s16  ;;  %v2033_v4 = vmul.f32 %v4778_v44, %v3646_v51 }
 0x795   :  { %5635 = vst [vmem:[#allocation2_spill] sm:$0xff] %v4803_v40  ;;  %2785 = vrot.lane.b32.xlu2 %v4803_v40, %s3505_s16 }
 0x796   :  { %v2054_v15 = vpop.permute.xlu1 %2053  ;;  %v2041_v27 = vpop.permute.xlu0 %2040 }
 0x797   :  { %v2056_v53 = vadd.f32 %v2054_v15, %v2050_v56  ;;  %v2043_v9 = vmul.f32 %v2041_v27, %v4525_v29 }
 0x799   :  { %v2062_v5 = vadd.f32 %v2060_v32, %v2056_v53 }
 0x79b   :  { %v4812_v42 = vadd.f32 %v2062_v5, %v5633_v28  ;;  %2045 = vrot.lane.b32.xlu1 %v2043_v9, %s3509_s20 }
 0x79d   :  { %5636 = vst [vmem:[#allocation8_spill] sm:$0xff] %v4812_v42  ;;  %v4818_v38 = vsub.f32 %v4812_v42, %v4800_v55  ;;  %v4822_v47 = vsub.f32 %v4800_v55, %v4812_v42 }
 0x79e   :  { %v2068_v36 = vpop.permute.xlu0 %2067  ;;  %v1977_v33 = vpop.permute.xlu1 %1976 }
 0x79f   :  { %v2070_v21 = vadd.f32 %v2068_v36, %v2064_v46  ;;  %v2468_v29 = vmul.f32 %v4818_v38, %v4818_v38  ;;  %v2741_v63 = vmul.f32 %v4822_v47, %v4822_v47  ;;  %v1979_v13 = vadd.f32 %v1977_v33, %v1970_v41 }
 0x7a1   :  { %v2079_v6 = vadd.f32 %v2077_v59, %v2070_v21  ;;  %2470 = vrot.lane.b32.xlu2 %v2468_v29, %s3509_s20 }
 0x7a3   :  { %v4830_v34 = vadd.f32 %v2079_v6, %v5633_v28  ;;  %2743 = vrot.lane.b32.xlu1 %v2741_v63, %s3509_s20 }
 0x7a5   :  { %5637 = vst [vmem:[#allocation9_spill] sm:$0xff] %v4830_v34  ;;  %v4836_v31 = vsub.f32 %v4830_v34, %v4803_v40  ;;  %v4848_v35 = vsub.f32 %v4803_v40, %v4830_v34 }
 0x7a6   :  { %v1986_v2 = vpop.permute.xlu0 %1985 }
 0x7a7   :  { %v1988_v24 = vadd.f32 %v1986_v2, %v1979_v13  ;;  %v2474_v26 = vmul.f32 %v4836_v31, %v4836_v31  ;;  %v2747_v25 = vmul.f32 %v4848_v35, %v4848_v35 }
 0x7a9   :  { %v4841_v8 = vadd.f32 %v1988_v24, %v5633_v28  ;;  %2476 = vrot.lane.b32.xlu2 %v2474_v26, %s3510_s21 }
 0x7ab   :  { %5638 = vst [vmem:[#allocation10_spill] sm:$0xff] %v4841_v8  ;;  %2775 = vrot.lane.b32.xlu0 %v4841_v8, %s3505_s16 }
 0x7ae   :  { %v2037_v22 = vpop.permute.xlu0 %2036 }
 0x7af   :  { %v2039_v56 = vadd.f32 %v2037_v22, %v2033_v4 }
 0x7b3   :  { %2749 = vrot.lane.b32.xlu0 %v2747_v25, %s3510_s21 }
 0x7bb   :  { %2087 = vrot.lane.b32.xlu0 %v3679_v57, %s3539_s6 }
 0x7ef   :  { %v4855_v7 = vpop.permute.xlu2 %2785 }
 0x7f0   :  { %v4864_v62 = vsub.f32 %v4860_v45, %v4855_v7 }
 0x7f2   :  { %v3012_v16 = vmul.f32 %v4864_v62, %v4864_v62 }
 0x7f4   :  { %3014 = vrot.lane.b32.xlu2 %v3012_v16, %s3510_s21 }
 0x7fb   :  { %v2471_v32 = vpop.permute.xlu2 %2470 }
 0x803   :  { %v2477_v36 = vpop.permute.xlu2 %2476 }
 0x805   :  { %v4869_v19 = vpop.permute.xlu1 %2780 }
 0x806   :  { %v4873_v57 = vsub.f32 %v4860_v45, %v4869_v19 }
 0x808   :  { %v3006_v43 = vmul.f32 %v4873_v57, %v4873_v57 }
 0x80a   :  { %3008 = vrot.lane.b32.xlu1 %v3006_v43, %s3509_s20 }
 0x80d   :  { %v2046_v15 = vpop.permute.xlu1 %2045 }
 0x80e   :  { %v2048_v27 = vadd.f32 %v2046_v15, %v2039_v56 }
 0x810   :  { %v4881_v53 = vadd.f32 %v2048_v27, %v5633_v28 }
 0x812   :  { %5639 = vst [vmem:[#allocation11_spill] sm:$0xff] %v4881_v53  ;;  %2096 = vrot.lane.b32.xlu1 %v3686_v60, %s3536_s19  ;;  %v2464_v5 = vsub.f32 %v4881_v53, %v4841_v8  ;;  %v2737_v29 = vsub.f32 %v4841_v8, %v4881_v53 }
 0x814   :  { %v2467_v9 = vmul.f32 %v2464_v5, %v2464_v5  ;;  %v2740_v6 = vmul.f32 %v2737_v29, %v2737_v29 }
 0x815   :  { %v2744_v63 = vpop.permute.xlu1 %2743 }
 0x816   :  { %v2473_v46 = vadd.f32 %v2471_v32, %v2467_v9  ;;  %v2746_v13 = vadd.f32 %v2744_v63, %v2740_v6 }
 0x818   :  { %v2479_v21 = vadd.f32 %v2477_v36, %v2473_v46 }
 0x81a   :  { %v2480_v44 = vmax.f32 %v2479_v21, 1e-07 }
 0x81c   :  { %3483 = vrsqrt.f32 %v2480_v44  ;;  %vm2487_vm11 = vweird.f32 %v2480_v44 }
 0x81d   :  { %v4889_v59 = vpop.permute.xlu0 %2775 }
 0x81e   :  { %v3002_v63 = vsub.f32 %v4860_v45, %v4889_v59 }
 0x822   :  { %v3484_v33 = vpop.eup %3483 }
 0x823   :  { %v2482_v41 = vmul.f32 %v3484_v33, %v2480_v44  ;;  %vm2488_vm14 = vweird.f32 %v3484_v33 }
 0x824   :  { %vm2489_vm15 = vmor %vm2487_vm11, %vm2488_vm14 }
 0x825   :  { %v2750_v2 = vpop.permute.xlu0 %2749  ;;  %v2483_v24 = vmul.f32 %v3484_v33, %v2482_v41 }
 0x826   :  { %v2752_v26 = vadd.f32 %v2750_v2, %v2746_v13 }
 0x827   :  { %v2484_v25 = vmul.f32 0.5, %v2483_v24 }
 0x828   :  { %v2753_v16 = vmax.f32 %v2752_v26, 1e-07 }
 0x829   :  { %v2485_v43 = vsub.f32 1.5, %v2484_v25 }
 0x82a   :  { %3485 = vrsqrt.f32 %v2753_v16  ;;  %vm2760_vm2 = vweird.f32 %v2753_v16 }
 0x82b   :  { %v2486_v22 = vmul.f32 %v3484_v33, %v2485_v43 }
 0x82d   :  { %v2490_v4 = vsel %vm2489_vm15, %v3484_v33, %v2486_v22  ;;  %v3005_v33 = vmul.f32 %v3002_v63, %v3002_v63 }
 0x82e   :  { %2497 = vrot.lane.b32.xlu1 %v2490_v4, %s3512_s23  ;;  %v4892_v56 = vmul.f32 %v2490_v4, %v2464_v5  ;;  %2493 = vrot.lane.b32.xlu2 %v2490_v4, %s3513_s24  ;;  %v2088_v5 = vpop.permute.xlu0 %2087 }
 0x82f   :  { %v2090_v6 = vmul.f32 %v2088_v5, %v4712_v52 }
 0x830   :  { %5640 = vst [vmem:[#allocation12_spill] sm:$0xff] %v4892_v56  ;;  %v3486_v32 = vpop.eup %3485 }
 0x831   :  { %v2755_v15 = vmul.f32 %v3486_v32, %v2753_v16  ;;  %vm2761_vm0 = vweird.f32 %v3486_v32 }
 0x832   :  { %vm2762_vm5 = vmor %vm2760_vm2, %vm2761_vm0 }
 0x833   :  { %v2756_v27 = vmul.f32 %v3486_v32, %v2755_v15 }
 0x835   :  { %v2757_v9 = vmul.f32 0.5, %v2756_v27 }
 0x837   :  { %v2758_v46 = vsub.f32 1.5, %v2757_v9 }
 0x839   :  { %v2759_v36 = vmul.f32 %v3486_v32, %v2758_v46 }
 0x83b   :  { %v2763_v21 = vsel %vm2762_vm5, %v3486_v32, %v2759_v36 }
 0x83c   :  { %2766 = vrot.lane.b32.xlu0 %v2763_v21, %s3513_s24  ;;  %v4896_v44 = vmul.f32 %v2763_v21, %v2737_v29  ;;  %2770 = vrot.lane.b32.xlu2 %v2763_v21, %s3512_s23 }
 0x83e   :  { %5641 = vst [vmem:[#allocation13_spill] sm:$0xff] %v4896_v44 }
 0x844   :  { %2092 = vrot.lane.b32.xlu2 %v2090_v6, %s3524_s8 }
 0x84c   :  { %2512 = vrot.lane.b32.xlu2 %v4830_v34, %s3505_s16 }
 0x84e   :  { %v3015_v2 = vpop.permute.xlu2 %3014 }
 0x87c   :  { %v3009_v41 = vpop.permute.xlu1 %3008 }
 0x87d   :  { %v3011_v13 = vadd.f32 %v3009_v41, %v3005_v33 }
 0x87f   :  { %v3017_v24 = vadd.f32 %v3015_v2, %v3011_v13 }
 0x881   :  { %v3018_v29 = vmax.f32 %v3017_v24, 1e-07 }
 0x883   :  { %3487 = vrsqrt.f32 %v3018_v29  ;;  %vm3025_vm11 = vweird.f32 %v3018_v29 }
 0x884   :  { %v2097_v15 = vpop.permute.xlu1 %2096 }
 0x885   :  { %v2099_v27 = vmul.f32 %v2097_v15, %v4712_v52 }
 0x888   :  { %v2494_v9 = vpop.permute.xlu2 %2493 }
 0x889   :  { %v3488_v26 = vpop.eup %3487  ;;  %v4915_v21 = vmul.f32 %v2494_v9, %v4818_v38  ;;  %v2081_v38 = vmul.f32 %v4712_v52, %v4668_v1 }
 0x88a   :  { %v3020_v25 = vmul.f32 %v3488_v26, %v3018_v29  ;;  %vm3026_vm14 = vweird.f32 %v3488_v26 }
 0x88b   :  { %vm3027_vm15 = vmor %vm3025_vm11, %vm3026_vm14 }
 0x88c   :  { %v3021_v16 = vmul.f32 %v3488_v26, %v3020_v25 }
 0x88e   :  { %v3022_v43 = vmul.f32 0.5, %v3021_v16 }
 0x890   :  { %v3023_v22 = vsub.f32 1.5, %v3022_v43 }
 0x892   :  { %v3024_v4 = vmul.f32 %v3488_v26, %v3023_v22 }
 0x894   :  { %v3028_v32 = vsel %vm3027_vm15, %v3488_v26, %v3024_v4 }
 0x895   :  { %3035 = vrot.lane.b32.xlu1 %v3028_v32, %s3512_s23  ;;  %3031 = vrot.lane.b32.xlu0 %v3028_v32, %s3513_s24  ;;  %v4957_v16 = vmul.f32 %v3028_v32, %v3002_v63 }
 0x896   :  { %v2771_v5 = vpop.permute.xlu2 %2770 }
 0x897   :  { %v4922_v6 = vmul.f32 %v2771_v5, %v4848_v35  ;;  %5646 = vst [vmem:[#allocation18_spill] sm:$0xff] %v4957_v16  ;;  %v4992_v5 = vsub.f32 %v4830_v34, %v5633_v28 }
 0x899   :  { %5643 = vst [vmem:[#allocation15_spill] sm:$0xff] %v4922_v6 }
 0x89d   :  { %2101 = vrot.lane.b32.xlu1 %v2099_v27, %s3521_s5  ;;  %2507 = vrot.lane.b32.xlu0 %v4812_v42, %s3505_s16 }
 0x89e   :  { %v2093_v35 = vpop.permute.xlu2 %2092 }
 0x8a0   :  { %v2498_v46 = vpop.permute.xlu1 %2497 }
 0x8a1   :  { %v4912_v36 = vmul.f32 %v2498_v46, %v4836_v31 }
 0x8a3   :  { %5642 = vst [vmem:[#allocation14_spill] sm:$0xff] %v4912_v36  ;;  %2532 = vrot.lane.b32.xlu2 %v4912_v36, %s3505_s16 }
 0x8a5   :  { %2522 = vrot.lane.b32.xlu0 %v4915_v21, %s3505_s16 }
 0x8a6   :  { %v2513_v41 = vpop.permute.xlu2 %2512 }
 0x8a7   :  { %v4939_v13 = vsub.f32 %v4860_v45, %v2513_v41  ;;  %v5003_v41 = vsub.f32 %v4812_v42, %v5633_v28  ;;  %v5655_v42 = vmov 683565275  }
 0x8ad   :  { %2805 = vrot.lane.b32.xlu0 %v4922_v6, %s3505_s16 }
 0x8ae   :  { %v2767_v33 = vpop.permute.xlu0 %2766 }
 0x8af   :  { %v4927_v31 = vmul.f32 %v2767_v33, %v4822_v47 }
 0x8b1   :  { %2795 = vrot.lane.b32.xlu1 %v4927_v31, %s3505_s16 }
 0x8b5   :  { %2083 = vrot.lane.b32.xlu0 %v2081_v38, %s3503_s14 }
 0x8bd   :  { %2790 = vrot.lane.b32.xlu0 %v4896_v44, %s3505_s16 }
 0x8c5   :  { %2817 = vrot.lane.b32.xlu0 %v4927_v31, %s3533_s22 }
 0x8fd   :  { %v2533_v47 = vpop.permute.xlu2 %2532 }
 0x8fe   :  { %v2535_v2 = vmul.f32 %v2533_v47, %v4939_v13 }
 0x900   :  { %2537 = vrot.lane.b32.xlu0 %v2535_v2, %s3510_s21 }
 0x907   :  { %v3036_v24 = vpop.permute.xlu1 %3035  ;;  %v3032_v1 = vpop.permute.xlu0 %3031 }
 0x908   :  { %v4944_v29 = vmul.f32 %v3036_v24, %v4864_v62  ;;  %v4947_v26 = vmul.f32 %v3032_v1, %v4873_v57  ;;  %v4962_v57 = vadd.f32 %v4860_v45, %v2093_v35 }
 0x90a   :  { %5644 = vst [vmem:[#allocation16_spill] sm:$0xff] %v4944_v29  ;;  %3058 = vrot.lane.b32.xlu2 %v4944_v29, %s3504_s15  ;;  %3048 = vrot.lane.b32.xlu1 %v4947_v26, %s3504_s15  ;;  %v4968_v22 = vsub.f32 %v4962_v57, %v4869_v19 }
 0x90b   :  { %5645 = vst [vmem:[#allocation17_spill] sm:$0xff] %v4947_v26 }
 0x90c   :  { %5647 = vst [vmem:[#allocation19_spill] sm:$0xff] %v4962_v57 }
 0x90f   :  { %v2508_v25 = vpop.permute.xlu0 %2507  ;;  %v2102_v62 = vpop.permute.xlu1 %2101 }
 0x910   :  { %v4972_v63 = vadd.f32 %v4860_v45, %v2102_v62  ;;  %v4975_v32 = vsub.f32 %v4860_v45, %v2508_v25 }
 0x912   :  { %2517 = vrot.lane.b32.xlu2 %v4892_v56, %s3505_s16  ;;  %2502 = vrot.lane.b32.xlu1 %v4881_v53, %s3505_s16  ;;  %5648 = vst [vmem:[#allocation20_spill] sm:$0xff] %v4972_v63  ;;  %v4981_v46 = vsub.f32 %v4972_v63, %v4855_v7 }
 0x917   :  { %v2523_v43 = vpop.permute.xlu0 %2522 }
 0x918   :  { %v2525_v27 = vmul.f32 %v2523_v43, %v4975_v32 }
 0x91a   :  { %3043 = vrot.lane.b32.xlu1 %v4957_v16, %s3504_s15  ;;  %v5657_v16 = vmov 0  }
 0x91f   :  { %v2806_v9 = vpop.permute.xlu0 %2805 }
 0x920   :  { %v2808_v19 = vmul.f32 %v2806_v9, %v4981_v46 }
 0x922   :  { %2544 = vrot.lane.b32.xlu1 %v4915_v21, %s3533_s22 }
 0x923   :  { %v2796_v4 = vpop.permute.xlu1 %2795 }
 0x924   :  { %v2798_v15 = vmul.f32 %v2796_v4, %v4968_v22 }
 0x926   :  { %2800 = vrot.lane.b32.xlu2 %v2798_v15, %s3509_s20 }
 0x927   :  { %v2084_v38 = vpop.permute.xlu0 %2083 }
 0x928   :  { %v5007_v24 = vadd.f32 %v4860_v45, %v2084_v38 }
 0x92a   :  { %2527 = vrot.lane.b32.xlu1 %v2525_v27, %s3509_s20  ;;  %5650 = vst [vmem:[#allocation22_spill] sm:$0xff] %v5007_v24  ;;  %v5014_v62 = vsub.f32 %v5007_v24, %v4889_v59 }
 0x92e   :  { %2810 = vrot.lane.b32.xlu2 %v2808_v19, %s3510_s21 }
 0x92f   :  { %v5010_v25 = vpop.permute.xlu0 %2790 }
 0x930   :  { %v2793_v4 = vmul.f32 %v5010_v25, %v5014_v62 }
 0x932   :  { %2553 = vrot.lane.b32.xlu1 %v4912_v36, %s3529_s13 }
 0x93a   :  { %3079 = vrot.lane.b32.xlu1 %v4944_v29, %s3513_s24 }
 0x964   :  { %v4994_v33 = vpop.permute.xlu2 %3058 }
 0x965   :  { %5649 = vst [vmem:[#allocation21_spill] sm:$0xff] %v4994_v33  ;;  %v3061_v7 = vmul.f32 %v4994_v33, %v4992_v5 }
 0x967   :  { %3063 = vrot.lane.b32.xlu2 %v3061_v7, %s3510_s21  ;;  %v2818_v7 = vpop.permute.xlu0 %2817 }
 0x96c   :  { %v2518_v35 = vpop.permute.xlu2 %2517 }
 0x96f   :  { %2826 = vrot.lane.b32.xlu2 %v4922_v6, %s3529_s13 }
 0x97c   :  { %v3049_v47 = vpop.permute.xlu1 %3048 }
 0x97d   :  { %v3051_v2 = vmul.f32 %v3049_v47, %v5003_v41 }
 0x97f   :  { %3053 = vrot.lane.b32.xlu0 %v3051_v2, %s3509_s20 }
 0x980   :  { %v2801_v1 = vpop.permute.xlu2 %2800 }
 0x981   :  { %v2803_v15 = vadd.f32 %v2801_v1, %v2793_v4  ;;  %v2538_v4 = vpop.permute.xlu0 %2537 }
 0x984   :  { %v2503_v43 = vpop.permute.xlu1 %2502 }
 0x985   :  { %v2505_v2 = vsub.f32 %v4860_v45, %v2503_v43 }
 0x987   :  { %3070 = vrot.lane.b32.xlu0 %v4947_v26, %s3512_s23  ;;  %v2520_v11 = vmul.f32 %v2518_v35, %v2505_v2 }
 0x988   :  { %v2811_v27 = vpop.permute.xlu2 %2810 }
 0x989   :  { %v2813_v9 = vadd.f32 %v2811_v27, %v2803_v15 }
 0x98b   :  { %v5020_v19 = vsub.f32 0.0, %v2813_v9 }
 0x98c   :  { %v5022_v38 = vpop.permute.xlu1 %3043 }
 0x98d   :  { %v2820_v47 = vmul.f32 %v2818_v7, %v5020_v19  ;;  %v1645_v7 = vmul.f32 6.2831855, %v4712_v52 }
 0x98f   :  { %2822 = vrot.lane.b32.xlu0 %v2820_v47, %s3513_s24  ;;  %v5032_v47 = vadd.f32 -3.1415927, %v1645_v7 }
 0x991   :  { %v1650_v43 = vand.u32 2139095040, %v5032_v47  ;;  %v5656_v34 = vand.u32 2147483647, %v5032_v47 }
 0x993   :  { %v1654_v55 = vand.u32 8388607, %v5656_v34 }
 0x994   :  { %v2545_v59 = vpop.permute.xlu1 %2544 }
 0x99c   :  { %v2528_v17 = vpop.permute.xlu1 %2527 }
 0x99d   :  { %v2530_v1 = vadd.f32 %v2528_v17, %v2520_v11  ;;  %v1651_v17 = vshrl.u32 %v1650_v43, 23  ;;  %v5652_v43 = vmov 2102212464  }
 0x99f   :  { %v2540_v23 = vadd.f32 %v2538_v4, %v2530_v1  ;;  %v3386_v11 = vadd.s32 4294967169, %v1651_v17 }
 0x9a1   :  { %v2541_v14 = vsub.f32 0.0, %v2540_v23  ;;  %v1657_v1 = vadd.s32 1, %v3386_v11  ;;  %v5653_v11 = vmov 2475754826  }
 0x9a3   :  { %v2547_v12 = vmul.f32 %v2545_v59, %v2541_v14  ;;  %v2542_v15 = vmul.f32 %v2541_v14, %v2518_v35  ;;  %vm1658_vm0 = vcmp.gt.s32.totalorder %v1657_v1, 0 }
 0x9a4   :  { %v2554_v27 = vpop.permute.xlu1 %2553  ;;  %v1659_v35 = vsel %vm1658_vm0, %v1657_v1, 0 }
 0x9a5   :  { %v2556_v9 = vmul.f32 %v2554_v27, %v2541_v14  ;;  %2549 = vrot.lane.b32.xlu2 %v2547_v12, %s3513_s24  ;;  %v5028_v3 = vadd.f32 %v2542_v15, %v2505_v2  ;;  %v1661_v59 = vand.u32 31, %v1659_v35  ;;  %v5651_v15 = vmov 1326507024  }
 0x9a6   :  { %v5046_v7 = vshrl.u32 %v1659_v35, 5 }
 0x9a7   :  { %2558 = vrot.lane.b32.xlu1 %v2556_v9, %s3512_s23  ;;  %v5039_v2 = vsub.s32 32, %v1661_v59  ;;  %v1673_v17 = vshll.u32 %v5652_v43, %v1661_v59  ;;  %v1676_v63 = vshll.u32 %v3548_v61, %v1661_v59  ;;  %v1667_v9 = vshll.u32 %v5653_v11, %v1661_v59 }
 0x9a8   :  { %vm1682_vm2 = vcmp.lt.s32.totalorder %v5046_v7, 4  ;;  %vm1679_vm5 = vcmp.lt.s32.totalorder %v5046_v7, 1  ;;  %vm1681_vm14 = vcmp.lt.s32.totalorder %v5046_v7, 3  ;;  %vm1680_vm11 = vcmp.lt.s32.totalorder %v5046_v7, 2 }
 0x9a9   :  { %v1674_v4 = vshrl.u32 %v3548_v61, %v5039_v2  ;;  %v1677_v27 = vshrl.u32 %v5651_v15, %v5039_v2  ;;  %v1665_v1 = vshrl.u32 %v5653_v11, %v5039_v2  ;;  %v1671_v57 = vshrl.u32 %v5652_v43, %v5039_v2 }
 0x9aa   :  { %v1664_v15 = vshll.u32 %v5655_v42, %v1661_v59 }
 0x9ab   :  { %v1675_v8 = vor.u32 %v1674_v4, %v1673_v17  ;;  %v1678_v24 = vor.u32 %v1677_v27, %v1676_v63  ;;  %v1655_v63 = vor.u32 8388608, %v1654_v55 }
 0x9ac   :  { %v5061_v40 = vor.u32 %v1665_v1, %v1664_v15  ;;  %v3080_v6 = vpop.permute.xlu1 %3079 }
 0x9ad   :  { %v1688_v61 = vsel %vm1682_vm2, %v1675_v8, 920167782  ;;  %v1692_v4 = vsel %vm1682_vm2, %v1678_v24, 1326507024 }
 0x9ae   :  { %v1693_v24 = vsel %vm1681_vm14, %v1675_v8, %v1692_v4 }
 0x9c1   :  { %v5035_v23 = vpop.permute.xlu2 %3063 }
 0x9c9   :  { %v2827_v14 = vpop.permute.xlu2 %2826 }
 0x9ca   :  { %v2829_v12 = vmul.f32 %v2827_v14, %v5020_v19  ;;  %v5654_v14 = vmov 2131351028  }
 0x9cb   :  { %v1670_v35 = vshll.u32 %v5654_v14, %v1661_v59 }
 0x9cc   :  { %2831 = vrot.lane.b32.xlu2 %v2829_v12, %s3512_s23  ;;  %v1668_v12 = vshrl.u32 %v5654_v14, %v5039_v2 }
 0x9cd   :  { %v5065_v58 = vor.u32 %v1671_v57, %v1670_v35 }
 0x9ce   :  { %v5063_v33 = vor.u32 %v1668_v12, %v1667_v9  ;;  %v5092_v9 = vshll.u32 %v1655_v63, 8  ;;  %v5098_v63 = vsub.f32 %v4881_v53, %v5633_v28 }
 0x9cf   :  { %v1689_v57 = vsel %vm1681_vm14, %v5065_v58, %v1688_v61 }
 0x9d0   :  { %v1687_v34 = vsel %vm1679_vm5, %v5061_v40, %v5063_v33  ;;  %v1691_v59 = vsel %vm1679_vm5, %v5063_v33, %v5065_v58  ;;  %v1696_v11 = vand.u32 65535, %v5092_v9  ;;  %v1697_v8 = vshrl.u32 %v5092_v9, 16 }
 0x9d1   :  { %v1690_v55 = vsel %vm1680_vm11, %v1687_v34, %v1689_v57  ;;  %v1694_v27 = vsel %vm1680_vm11, %v1691_v59, %v1693_v24 }
 0x9d2   :  { %v1721_v43 = vshrl.u32 %v1690_v55, 16  ;;  %v1699_v17 = vshrl.u32 %v1694_v27, 16  ;;  %v1720_v12 = vand.u32 65535, %v1690_v55  ;;  %v1698_v15 = vand.u32 65535, %v1694_v27 }
 0x9d3   :  { %v3046_v55 = vmul.f32 %v5022_v38, %v5098_v63 }
 0x9d4   :  { %v1723_v1 = vmul.u32 %v1721_v43, %v1696_v11  ;;  %v1701_v14 = vmul.u32 %v1699_v17, %v1696_v11  ;;  %v1722_v4 = vmul.u32 %v1720_v12, %v1696_v11  ;;  %v1724_v20 = vmul.u32 %v1720_v12, %v1697_v8 }
 0x9d5   :  { %v1700_v34 = vmul.u32 %v1698_v15, %v1696_v11  ;;  %v1702_v57 = vmul.u32 %v1698_v15, %v1697_v8  ;;  %v1725_v12 = vmul.u32 %v1721_v43, %v1697_v8  ;;  %v1703_v15 = vmul.u32 %v1699_v17, %v1697_v8 }
 0x9d6   :  { %v1726_v35 = vshll.u32 %v1723_v1, 16  ;;  %v1704_v61 = vshll.u32 %v1701_v14, 16  ;;  %v1728_v27 = vshll.u32 %v1724_v20, 16  ;;  %v1729_v17 = vshrl.u32 %v1724_v20, 16 }
 0x9d7   :  { %v1706_v36 = vshll.u32 %v1702_v57, 16 }
 0x9d8   :  { %vm1730_vm15 = vc.u32 %v1722_v4, %v1726_v35  ;;  %v1732_v59 = vadd.s32 %v1726_v35, %v1722_v4  ;;  %vm1708_vm0 = vc.u32 %v1700_v34, %v1704_v61  ;;  %v1710_v24 = vadd.s32 %v1704_v61, %v1700_v34 }
 0x9d9   :  { %v1731_v26 = vsel %vm1730_vm15, 1, %v5657_v16  ;;  %v1709_v11 = vsel %vm1708_vm0, 1, %v5657_v16 }
 0x9da   :  { %vm1734_vm12 = vc.u32 %v1732_v59, %v1728_v27  ;;  %vm1712_vm10 = vc.u32 %v1710_v24, %v1706_v36  ;;  %v1733_v35 = vadd.s32 %v1731_v26, %v1725_v12  ;;  %v1711_v4 = vadd.s32 %v1709_v11, %v1703_v15 }
 0x9db   :  { %v1735_v61 = vsel %vm1734_vm12, 1, %v5657_v16  ;;  %v1713_v53 = vsel %vm1712_vm10, 1, %v5657_v16  ;;  %v1727_v36 = vshrl.u32 %v1723_v1, 16  ;;  %v1707_v24 = vshrl.u32 %v1702_v57, 16 }
 0x9dc   :  { %v1715_v56 = vadd.s32 %v1713_v53, %v1711_v4  ;;  %v1684_v53 = vsel %vm1682_vm2, %v5065_v58, 2102212464 }
 0x9dd   :  { %v1685_v58 = vsel %vm1681_vm14, %v5063_v33, %v1684_v53 }
 0x9f1   :  { %v3054_v0 = vpop.permute.xlu0 %3053 }
 0x9f2   :  { %v3056_v29 = vadd.f32 %v3054_v0, %v3046_v55  ;;  %v1737_v0 = vadd.s32 %v1735_v61, %v1733_v35 }
 0x9f4   :  { %v3066_v28 = vadd.f32 %v5035_v23, %v3056_v29  ;;  %v1705_v29 = vshrl.u32 %v1701_v14, 16  ;;  %v1738_v26 = vadd.s32 %v1737_v0, %v1727_v36 }
 0x9f6   :  { %v5106_v34 = vsub.f32 0.0, %v3066_v28  ;;  %v1716_v23 = vadd.s32 %v1715_v56, %v1705_v29  ;;  %v5658_v29 = vld [vmem:[#allocation7_spill] sm:$0xff] }
 0x9f8   :  { %v3082_v44 = vmul.f32 %v3080_v6, %v5106_v34  ;;  %v1739_v6 = vadd.s32 %v1738_v26, %v1729_v17  ;;  %v1717_v1 = vadd.s32 %v1716_v23, %v1707_v24 }
 0x9f9   :  { %v3071_v55 = vpop.permute.xlu0 %3070 }
 0x9fa   :  { %v3073_v43 = vmul.f32 %v3071_v55, %v5106_v34  ;;  %3084 = vrot.lane.b32.xlu1 %v3082_v44, %s3512_s23  ;;  %v1663_v44 = vshrl.u32 %v5655_v42, %v5039_v2  ;;  %v1743_v42 = vadd.s32 1, %v1739_v6 }
 0x9fc   :  { %3075 = vrot.lane.b32.xlu0 %v3073_v43, %s3513_s24  ;;  %v1683_v56 = vsel %vm1679_vm5, %v1663_v44, %v5061_v40  ;;  %vm1649_vm5 = vcmp.lt.s32.totalorder %v5032_v47, 0 }
 0x9ff   :  { %v2550_v8 = vpop.permute.xlu2 %2549 }
 0xa00   :  { %v5114_v16 = vadd.f32 %v2550_v8, %v4975_v32  ;;  %v1736_v32 = vadd.s32 %v1732_v59, %v1728_v27 }
 0xa01   :  { %v2823_v11 = vpop.permute.xlu0 %2822 }
 0xa02   :  { %v2563_v14 = vmul.f32 %v5114_v16, %v5114_v16  ;;  %v5124_v20 = vadd.f32 %v2823_v11, %v4968_v22  ;;  %vm1742_vm10 = vc.u32 %v1717_v1, %v1736_v32  ;;  %v1686_v22 = vsel %vm1680_vm11, %v1683_v56, %v1685_v58 }
 0xa03   :  { %v1744_v2 = vsel %vm1742_vm10, %v1743_v42, %v1739_v6  ;;  %v1740_v40 = vmul.u32 %v5092_v9, %v1686_v22  ;;  %v1741_v53 = vadd.s32 %v1736_v32, %v1717_v1  ;;  %v5659_v22 = vand.u32 2147483647, %v5032_v47 }
 0xa04   :  { %v2836_v57 = vmul.f32 %v5124_v20, %v5124_v20  ;;  %2565 = vrot.lane.b32.xlu2 %v2563_v14, %s3509_s20  ;;  %vm1641_vm11 = vcmask 139264  }
 0xa05   :  { %v1745_v12 = vadd.s32 %v1744_v2, %v1740_v40  ;;  %vm5159_vm14 = vcmp.le.f32.partialorder %v5659_v22, 0.7853982 }
 0xa06   :  { %2838 = vrot.lane.b32.xlu0 %v2836_v57, %s3509_s20 }
 0xa07   :  { %v1746_v15 = vadd.s32 536870912, %v1745_v12 }
 0xa09   :  { %v1747_v28 = vshrl.u32 %v1746_v15, 30 }
 0xa0b   :  { %v1748_v33 = vshll.u32 %v1747_v28, 30 }
 0xa0d   :  { %v1749_v35 = vsub.s32 %v1745_v12, %v1748_v33  ;;  %v2562_v12 = vmul.f32 %v5028_v3, %v5028_v3 }
 0xa0f   :  { %v1751_v61 = vsub.s32 0, %v1749_v35  ;;  %vm1750_vm12 = vcmp.lt.s32.totalorder %v1749_v35, 0 }
 0xa11   :  { %v1752_v7 = vsel %vm1750_vm12, %v1751_v61, %v1749_v35 }
 0xa12   :  { %v1753_v55 = vclz %v1752_v7 }
 0xa14   :  { %v3387_v36 = vadd.s32 4294967294, %v1753_v55  ;;  %v1771_v55 = vsub.s32 4, %v1747_v28 }
 0xa16   :  { %vm3388_vm2 = vcmp.lt.s32.totalorder %v3387_v36, 0 }
 0xa17   :  { %v1756_v23 = vsel %vm3388_vm2, 0, %v3387_v36 }
 0xa18   :  { %v1761_v17 = vsub.s32 4294967266, %v1756_v23  ;;  %v1757_v24 = vsub.s32 32, %v1756_v23  ;;  %v1758_v11 = vshll.u32 %v1749_v35, %v1756_v23  ;;  %v1772_v23 = vsel %vm1649_vm5, %v1771_v55, %v1747_v28 }
 0xa19   :  { %v2559_v59 = vpop.permute.xlu1 %2558 }
 0xa1a   :  { %v5140_v27 = vadd.f32 %v2559_v59, %v4939_v13  ;;  %v802_v13 = vmax.f32 %v4275_v10, 1e-07  ;;  %v1762_v8 = vadd.s32 127, %v1761_v17  ;;  %v1759_v6 = vshrl.u32 %v1741_v53, %v1757_v24 }
 0xa1c   :  { %v2569_v4 = vmul.f32 %v5140_v27, %v5140_v27  ;;  %v803_v26 = vmul.f32 %v802_v13, %v5658_v29  ;;  %v1760_v14 = vor.u32 %v1759_v6, %v1758_v11 }
 0xa1e   :  { %2571 = vrot.lane.b32.xlu1 %v2569_v4, %s3510_s21  ;;  %v1767_v58 = vcvt.s32.f32 %v1760_v14  ;;  %v1210_v14 = vmax.f32 %v4313_v39, 1e-07  ;;  %v2815_v39 = vmul.f32 %v5020_v19, %v5010_v25 }
 0xa20   :  { %v1211_v22 = vmul.f32 %v1210_v14, %v4179_v48 }
 0xa26   :  { %v2832_v0 = vpop.permute.xlu2 %2831 }
 0xa27   :  { %v5146_v9 = vadd.f32 %v2832_v0, %v4981_v46  ;;  %v1763_v46 = vshll.u32 %v1762_v8, 23 }
 0xa29   :  { %v2842_v43 = vmul.f32 %v5146_v9, %v5146_v9  ;;  %v1764_v44 = vor.u32 4788187, %v1763_v46  ;;  %v1774_v46 = vsel %vm5159_vm14, 0, %v1772_v23 }
 0xa2a   :  { %v1950_v28 = vadd.s32 3, %v1774_v46 }
 0xa2b   :  { %2844 = vrot.lane.b32.xlu2 %v2842_v43, %s3510_s21  ;;  %v1765_v56 = vand.u32 2147483647, %v1764_v44 }
 0xa2d   :  { %v1768_v57 = vmul.f32 %v1767_v58, %v1765_v56  ;;  %v1791_v56 = vand.u32 3, %v1774_v46 }
 0xa2f   :  { %v1769_v42 = vxor.u32 2147483648, %v1768_v57  ;;  %vm1793_vm15 = vcmp.eq.s32.totalorder %v1791_v56, 0  ;;  %vm1796_vm0 = vcmp.eq.s32.totalorder %v1791_v56, 2  ;;  %vm1792_vm12 = vcmp.lt.s32.totalorder %v1791_v56, 2 }
 0xa31   :  { %v1770_v10 = vsel %vm1649_vm5, %v1769_v42, %v1768_v57  ;;  %v3501_v42 = vld [vmem:[%s5524_s1] sm:$0x1]  ;;  %s5671_s1 = smov 10  }
 0xa32   :  { %v1773_v1 = vsel %vm5159_vm14, %v5032_v47, %v1770_v10  ;;  %v1642_v10 = vsel %vm1641_vm11, %v3501_v42, 0.0  ;;  %vm1790_vm14 = vweird.f32 %v5032_v47 }
 0xa33   :  { %805 = vrot.lane.b32.xlu2 %v803_v26, %s3505_s16  ;;  %v1775_v32 = vmul.f32 %v1773_v1, %v1773_v1 }
 0xa35   :  { %v1783_v40 = vmul.f32 -0.00019511016, %v1775_v32  ;;  %v1776_v35 = vmul.f32 -0.001358992, %v1775_v32 }
 0xa37   :  { %v1784_v33 = vadd.f32 0.008332121, %v1783_v40  ;;  %v1777_v61 = vadd.f32 0.041655596, %v1776_v35 }
 0xa39   :  { %v1785_v4 = vmul.f32 %v1784_v33, %v1775_v32  ;;  %v1778_v0 = vmul.f32 %v1777_v61, %v1775_v32 }
 0xa3b   :  { %v1786_v7 = vadd.f32 -0.16666654, %v1785_v4  ;;  %v1779_v13 = vadd.f32 -0.4999988, %v1778_v0 }
 0xa3d   :  { %v1787_v43 = vmul.f32 %v1786_v7, %v1775_v32  ;;  %v1780_v6 = vmul.f32 %v1779_v13, %v1775_v32 }
 0xa3f   :  { %v1788_v8 = vadd.f32 1.0, %v1787_v43  ;;  %v1781_v44 = vadd.f32 1.0, %v1780_v6 }
 0xa41   :  { %v1797_v57 = vxor.u32 2147483648, %v1781_v44 }
 0xa5c   :  { %1643 = vadd.xlane.f32.xlu2 %v1642_v10 }
 0xa5e   :  { %v2566_v15 = vpop.permute.xlu2 %2565 }
 0xa5f   :  { %v5168_v59 = vadd.f32 %v2566_v15, %v2562_v12  ;;  %v2816_v12 = vadd.f32 %v2815_v39, %v5014_v62 }
 0xa61   :  { %v2835_v19 = vmul.f32 %v2816_v12, %v2816_v12 }
 0xa6c   :  { %v3085_v36 = vpop.permute.xlu1 %3084 }
 0xa6d   :  { %v5171_v26 = vadd.f32 %v3085_v36, %v4992_v5  ;;  %v1789_v5 = vmul.f32 %v1788_v8, %v1773_v1 }
 0xa6e   :  { %v3076_v17 = vpop.permute.xlu0 %3075 }
 0xa6f   :  { %v3095_v24 = vmul.f32 %v5171_v26, %v5171_v26  ;;  %v5178_v53 = vadd.f32 %v3076_v17, %v5003_v41  ;;  %v1794_v58 = vxor.u32 2147483648, %v1789_v5  ;;  %v1951_v41 = vand.u32 3, %v1950_v28 }
 0xa70   :  { %v1798_v1 = vsel %vm1796_vm0, %v1797_v57, %v1789_v5 }
 0xa71   :  { %v3089_v11 = vmul.f32 %v5178_v53, %v5178_v53  ;;  %3097 = vrot.lane.b32.xlu1 %v3095_v24, %s3510_s21  ;;  %v1795_v2 = vsel %vm1793_vm15, %v1781_v44, %v1794_v58  ;;  %vm1953_vm10 = vcmp.eq.s32.totalorder %v1951_v41, 0  ;;  %vm1956_vm2 = vcmp.eq.s32.totalorder %v1951_v41, 2 }
 0xa72   :  { %v1955_v32 = vsel %vm1953_vm10, %v1781_v44, %v1794_v58  ;;  %v1799_v40 = vsel %vm1792_vm12, %v1795_v2, %v1798_v1  ;;  %vm1952_vm5 = vcmp.lt.s32.totalorder %v1951_v41, 2  ;;  %v3068_v44 = vmul.f32 %v5106_v34, %v5022_v38 }
 0xa73   :  { %3091 = vrot.lane.b32.xlu0 %v3089_v11, %s3509_s20  ;;  %v5198_v15 = vsel %vm1790_vm14, nan, %v1799_v40 }
 0xa74   :  { %v5222_v14 = vadd.f32 %v3068_v44, %v5098_v63 }
 0xa76   :  { %v3088_v58 = vmul.f32 %v5222_v14, %v5222_v14 }
 0xa78   :  { %v2839_v25 = vpop.permute.xlu0 %2838 }
 0xa79   :  { %1513 = vrot.lane.b32.xlu1 %v4662_v54, %s3514_s25  ;;  %v1958_v54 = vsel %vm1956_vm2, %v1797_v57, %v1789_v5  ;;  %v2841_v35 = vadd.f32 %v2839_v25, %v2835_v19  ;;  %v421_v57 = vmax.f32 %v4184_v18, 1e-07 }
 0xa7a   :  { %v1959_v48 = vsel %vm1952_vm5, %v1955_v32, %v1958_v54 }
 0xa7b   :  { %1213 = vrot.lane.b32.xlu0 %v1211_v22, %s5629_s12  ;;  %v5202_v33 = vsel %vm1790_vm14, nan, %v1959_v48  ;;  %v422_v39 = vmul.f32 %v421_v57, %v5658_v29 }
 0xa81   :  { %1802 = vrot.lane.b32.xlu1 %v5198_v15, %s3509_s20 }
 0xa83   :  { %1962 = vrot.lane.b32.xlu0 %v5202_v33, %s3509_s20 }
 0xa85   :  { %v2845_v4 = vpop.permute.xlu2 %2844 }
 0xa86   :  { %v2847_v62 = vadd.f32 %v2845_v4, %v2841_v35 }
 0xa88   :  { %v2848_v61 = vmax.f32 %v2847_v62, 1e-07 }
 0xa89   :  { %2105 = vrot.lane.b32.xlu1 %v3646_v51, %s3516_s27 }
 0xa8a   :  { %3489 = vrsqrt.f32 %v2848_v61  ;;  %vm2855_vm15 = vweird.f32 %v2848_v61 }
 0xa8d   :  { %v806_v22 = vpop.permute.xlu2 %805 }
 0xa8e   :  { %v808_v1 = vmul.f32 %v806_v22, %v422_v39 }
 0xa90   :  { %v3490_v47 = vpop.eup %3489  ;;  %v2572_v7 = vpop.permute.xlu1 %2571 }
 0xa91   :  { %v2850_v0 = vmul.f32 %v3490_v47, %v2848_v61  ;;  %v2574_v55 = vadd.f32 %v2572_v7, %v5168_v59  ;;  %2114 = vrot.lane.b32.xlu1 %v4001_v50, %s3536_s19  ;;  %vm2856_vm11 = vweird.f32 %v3490_v47 }
 0xa92   :  { %vm2857_vm0 = vmor %vm2855_vm15, %vm2856_vm11 }
 0xa93   :  { %v2851_v43 = vmul.f32 %v3490_v47, %v2850_v0  ;;  %v2575_v36 = vmax.f32 %v2574_v55, 1e-07 }
 0xa95   :  { %v2852_v13 = vmul.f32 0.5, %v2851_v43  ;;  %3491 = vrsqrt.f32 %v2575_v36  ;;  %vm2582_vm12 = vweird.f32 %v2575_v36 }
 0xa97   :  { %v2853_v23 = vsub.f32 1.5, %v2852_v13 }
 0xa99   :  { %v2854_v17 = vmul.f32 %v3490_v47, %v2853_v23 }
 0xa9b   :  { %v3492_v8 = vpop.eup %3491  ;;  %v2858_v51 = vsel %vm2857_vm0, %v3490_v47, %v2854_v17  ;;  %vm5688_vm0 = vcmask 80896  }
 0xa9c   :  { %v2577_v24 = vmul.f32 %v3492_v8, %v2575_v36  ;;  %2861 = vrot.lane.b32.xlu1 %v2858_v51, %s3513_s24  ;;  %v5212_v11 = vmul.f32 %v2858_v51, %v2816_v12  ;;  %vm2583_vm10 = vweird.f32 %v3492_v8 }
 0xa9d   :  { %vm2584_vm2 = vmor %vm2582_vm12, %vm2583_vm10  ;;  %vm5689_vm10 = vcmask 89088  }
 0xa9e   :  { %v2578_v46 = vmul.f32 %v3492_v8, %v2577_v24 }
 0xaa0   :  { %v2579_v6 = vmul.f32 0.5, %v2578_v46 }
 0xaa2   :  { %v2580_v59 = vsub.f32 1.5, %v2579_v6 }
 0xaa4   :  { %2902 = vrot.lane.b32.xlu1 %v5212_v11, %s3536_s19  ;;  %v2581_v50 = vmul.f32 %v3492_v8, %v2580_v59 }
 0xaa6   :  { %v2585_v5 = vsel %vm2584_vm2, %v3492_v8, %v2581_v50 }
 0xaa7   :  { %v5217_v28 = vmul.f32 %v2585_v5, %v5028_v3 }
 0xacf   :  { %v5255_v43 = vpop.xlane.xlu2 %1643 }
 0xae3   :  { %v3098_v56 = vpop.permute.xlu1 %3097 }
 0xae5   :  { %v3092_v41 = vpop.permute.xlu0 %3091 }
 0xae6   :  { %v3094_v42 = vadd.f32 %v3092_v41, %v3088_v58 }
 0xae8   :  { %v3100_v10 = vadd.f32 %v3098_v56, %v3094_v42  ;;  %v5662_v42 = vld [vmem:[#allocation12_spill] sm:$0xff] }
 0xaea   :  { %v3101_v3 = vmax.f32 %v3100_v10, 1e-07 }
 0xaeb   :  { %v1514_v2 = vpop.permute.xlu1 %1513 }
 0xaec   :  { %3493 = vrsqrt.f32 %v3101_v3  ;;  %vm3108_vm14 = vweird.f32 %v3101_v3 }
 0xaed   :  { %v1214_v38 = vpop.permute.xlu0 %1213 }
 0xaee   :  { %v1216_v34 = vmul.f32 %v1214_v38, %v808_v1  ;;  %v5664_v38 = vld [vmem:[#allocation15_spill] sm:$0xff] }
 0xaf0   :  { %v5228_v63 = vmul.f32 %v1514_v2, %v1216_v34  ;;  %v5663_v2 = vld [vmem:[#allocation13_spill] sm:$0xff] }
 0xaf2   :  { %v3494_v32 = vpop.eup %3493 }
 0xaf3   :  { %v3103_v40 = vmul.f32 %v3494_v32, %v3101_v3  ;;  %v1803_v12 = vpop.permute.xlu1 %1802  ;;  %vm3109_vm5 = vweird.f32 %v3494_v32 }
 0xaf4   :  { %v1805_v18 = vmul.f32 %v1803_v12, %v4712_v52  ;;  %vm3110_vm11 = vmor %vm3108_vm14, %vm3109_vm5  ;;  %v5665_v12 = vld [vmem:[#allocation16_spill] sm:$0xff] }
 0xaf5   :  { %v3104_v54 = vmul.f32 %v3494_v32, %v3103_v40  ;;  %v1963_v62 = vpop.permute.xlu0 %1962 }
 0xaf6   :  { %v5234_v61 = vmul.f32 %v1963_v62, %v4712_v52  ;;  %v2123_v0 = vmul.f32 %v1805_v18, %v4613_v49 }
 0xaf7   :  { %v3105_v48 = vmul.f32 0.5, %v3104_v54 }
 0xaf9   :  { %v3106_v25 = vsub.f32 1.5, %v3105_v48  ;;  %v5666_v48 = vld [vmem:[#allocation17_spill] sm:$0xff] }
 0xafb   :  { %v2106_v19 = vpop.permute.xlu1 %2105  ;;  %v3107_v35 = vmul.f32 %v3494_v32, %v3106_v25 }
 0xafc   :  { %v2108_v29 = vmul.f32 %v2106_v19, %v1805_v18 }
 0xafd   :  { %v3111_v4 = vsel %vm3110_vm11, %v3494_v32, %v3107_v35  ;;  %v5667_v35 = vld [vmem:[#allocation18_spill] sm:$0xff] }
 0xafe   :  { %3114 = vrot.lane.b32.xlu1 %v3111_v4, %s3513_s24  ;;  %2110 = vrot.lane.b32.xlu0 %v2108_v29, %s3532_s11  ;;  %v3112_v50 = vmul.f32 %v3111_v4, %v5222_v14 }
 0xb03   :  { %v2115_v47 = vpop.permute.xlu1 %2114 }
 0xb04   :  { %v2117_v7 = vmul.f32 %v2115_v47, %v5234_v61 }
 0xb06   :  { %2135 = vrot.lane.b32.xlu1 %v3686_v60, %s3539_s6  ;;  %2592 = vrot.lane.b32.xlu0 %v2585_v5, %s3512_s23  ;;  %v2129_v60 = vmul.f32 %v5234_v61, %v4623_v37 }
 0xb07   :  { %2119 = vrot.lane.b32.xlu2 %v2117_v7, %s3532_s11 }
 0xb0e   :  { %2612 = vrot.lane.b32.xlu1 %v5217_v28, %s3539_s6  ;;  %2865 = vrot.lane.b32.xlu0 %v2858_v51, %s3512_s23  ;;  %v2862_v49 = vpop.permute.xlu1 %2861 }
 0xb0f   :  { %2125 = vrot.lane.b32.xlu2 %v2123_v0, %s3503_s14  ;;  %v2864_v6 = vmul.f32 %v2862_v49, %v5124_v20 }
 0xb16   :  { %2588 = vrot.lane.b32.xlu0 %v2585_v5, %s3513_s24  ;;  %v2903_v55 = vpop.permute.xlu1 %2902 }
 0xb1e   :  { %2629 = vrot.lane.b32.xlu0 %v5217_v28, %s3536_s19 }
 0xb26   :  { %3118 = vrot.lane.b32.xlu0 %v3111_v4, %s3512_s23 }
 0xb2e   :  { %2131 = vrot.lane.b32.xlu0 %v2129_v60, %s3503_s14 }
 0xb36   :  { %2144 = vrot.lane.b32.xlu0 %v4146_v30, %s3512_s23 }
 0xb61   :  { %v2120_v17 = vpop.permute.xlu2 %2119 }
 0xb70   :  { %v2111_v36 = vpop.permute.xlu0 %2110  ;;  %v3115_v13 = vpop.permute.xlu1 %3114 }
 0xb71   :  { %v2113_v23 = vadd.f32 %v4860_v45, %v2111_v36  ;;  %v3117_v20 = vmul.f32 %v3115_v13, %v5178_v53 }
 0xb73   :  { %v5258_v8 = vadd.f32 %v2120_v17, %v2113_v23 }
 0xb78   :  { %v2593_v51 = vpop.permute.xlu0 %2592  ;;  %v2136_v24 = vpop.permute.xlu1 %2135 }
 0xb79   :  { %v2595_v37 = vmul.f32 %v2593_v51, %v5140_v27  ;;  %v2138_v46 = vmul.f32 %v2136_v24, %v1805_v18 }
 0xb7b   :  { %2616 = vrot.lane.b32.xlu1 %v2595_v37, %s3513_s24  ;;  %2140 = vrot.lane.b32.xlu2 %v2138_v46, %s3524_s8 }
 0xb80   :  { %v2866_v30 = vpop.permute.xlu0 %2865  ;;  %v2613_v56 = vpop.permute.xlu1 %2612 }
 0xb81   :  { %v2868_v59 = vmul.f32 %v2866_v30, %v5146_v9 }
 0xb83   :  { %2889 = vrot.lane.b32.xlu0 %v2868_v59, %s3513_s24  ;;  %2875 = vrot.lane.b32.xlu1 %v2864_v6, %s3536_s19 }
 0xb88   :  { %v2589_v45 = vpop.permute.xlu0 %2588 }
 0xb89   :  { %v2591_v5 = vmul.f32 %v2589_v45, %v5114_v16  ;;  %v2905_v16 = vmul.f32 %v2903_v55, %v4927_v31  ;;  %v5668_v55 = vld [vmem:[#allocation14_spill] sm:$0xff] }
 0xb8a   :  { %v2615_v51 = vmul.f32 %v2613_v56, %v5668_v55 }
 0xb8b   :  { %2870 = vrot.lane.b32.xlu0 %v2868_v59, %s3512_s23  ;;  %3155 = vrot.lane.b32.xlu1 %v3112_v50, %s3510_s21 }
 0xb8c   :  { %2625 = vrot.lane.b32.xlu2 %v2591_v5, %s3512_s23 }
 0xb90   :  { %v2630_v27 = vpop.permute.xlu0 %2629 }
 0xb91   :  { %v2632_v14 = vmul.f32 %v2630_v27, %v4915_v21 }
 0xb93   :  { %2602 = vrot.lane.b32.xlu1 %v2591_v5, %s3536_s19 }
 0xb94   :  { %3128 = vrot.lane.b32.xlu2 %v3117_v20, %s3510_s21 }
 0xb98   :  { %v3119_v9 = vpop.permute.xlu0 %3118 }
 0xb99   :  { %v3121_v44 = vmul.f32 %v3119_v9, %v5171_v26  ;;  %v5288_v26 = vpop.permute.xlu2 %2125 }
 0xb9b   :  { %3142 = vrot.lane.b32.xlu0 %v3121_v44, %s3529_s13  ;;  %3123 = vrot.lane.b32.xlu1 %v3121_v44, %s3533_s22 }
 0xb9c   :  { %2634 = vrot.lane.b32.xlu2 %v2632_v14, %s3509_s20  ;;  %v5669_v14 = vld [vmem:[#allocation6_spill] sm:$0xff] }
 0xb9d   :  { %v5336_v56 = vsel %vm2298_vm13, nan, %v5669_v14  ;;  %v5379_v14 = vmax.f32 %v4712_v52, 1e-07  ;;  %vm5684_vm13 = vcmask 64512  }
 0xba0   :  { %v5290_v53 = vpop.permute.xlu0 %2131 }
 0xba3   :  { %2885 = vrot.lane.b32.xlu0 %v5212_v11, %s3539_s6 }
 0xba4   :  { %2898 = vrot.lane.b32.xlu2 %v2864_v6, %s3512_s23 }
 0xba8   :  { %v5294_v41 = vpop.permute.xlu0 %2144 }
 0xbab   :  { %3138 = vrot.lane.b32.xlu0 %v3112_v50, %s3509_s20 }
 0xbac   :  { %2907 = vrot.lane.b32.xlu2 %v2905_v16, %s3509_s20  ;;  %v2725_v16 = vmul.f32 %v5379_v14, %v5379_v14 }
 0xbb3   :  { %2659 = vrot.lane.b32.xlu0 %v2591_v5, %s3539_s6 }
 0xbb4   :  { %3151 = vrot.lane.b32.xlu2 %v3117_v20, %s3533_s22 }
 0xbd5   :  { %v5292_v58 = vpop.permute.xlu2 %2140 }
 0xbe6   :  { %v2626_v22 = vpop.permute.xlu2 %2625 }
 0xbe7   :  { %v2628_v62 = vmul.f32 %v2626_v22, %v5662_v42 }
 0xbed   :  { %v2617_v57 = vpop.permute.xlu1 %2616 }
 0xbee   :  { %v2619_v10 = vmul.f32 %v2617_v57, %v5662_v42  ;;  %v3129_v32 = vpop.permute.xlu2 %3128  ;;  %v2726_v57 = vmax.f32 %v5336_v56, 1e-07 }
 0xbef   :  { %v3131_v54 = vmul.f32 %v3129_v32, %v5665_v12 }
 0xbf0   :  { %2621 = vrot.lane.b32.xlu1 %v2619_v10, %s3512_s23 }
 0xbf5   :  { %v2890_v39 = vpop.permute.xlu0 %2889  ;;  %v2876_v3 = vpop.permute.xlu1 %2875 }
 0xbf6   :  { %v2892_v1 = vmul.f32 %v2890_v39, %v5663_v2  ;;  %v2878_v34 = vmul.f32 %v2876_v3, %v5664_v38  ;;  %v2635_v4 = vpop.permute.xlu2 %2634 }
 0xbf7   :  { %v2637_v47 = vsub.f32 %v2628_v62, %v2635_v4 }
 0xbf8   :  { %2894 = vrot.lane.b32.xlu0 %v2892_v1, %s3512_s23  ;;  %2880 = vrot.lane.b32.xlu1 %v2878_v34, %s3509_s20 }
 0xbfd   :  { %v3156_v40 = vpop.permute.xlu1 %3155  ;;  %v2871_v18 = vpop.permute.xlu0 %2870 }
 0xbfe   :  { %v3158_v25 = vmul.f32 %v3156_v40, %v5666_v48  ;;  %v2873_v30 = vmul.f32 %v2871_v18, %v4927_v31 }
 0xc00   :  { %3133 = vrot.lane.b32.xlu1 %v3131_v54, %s3509_s20  ;;  %3160 = vrot.lane.b32.xlu2 %v3158_v25, %s3509_s20 }
 0xc05   :  { %v2603_v49 = vpop.permute.xlu1 %2602 }
 0xc06   :  { %v2605_v36 = vmul.f32 %v2603_v49, %v5668_v55 }
 0xc08   :  { %2915 = vrot.lane.b32.xlu1 %v5212_v11, %s3516_s27  ;;  %2679 = vrot.lane.b32.xlu2 %v2595_v37, %s3536_s19  ;;  %v2899_v11 = vpop.permute.xlu2 %2898 }
 0xc09   :  { %v2901_v0 = vmul.f32 %v2899_v11, %v5663_v2 }
 0xc0d   :  { %v3143_v19 = vpop.permute.xlu0 %3142  ;;  %v3124_v17 = vpop.permute.xlu1 %3123 }
 0xc0e   :  { %v3145_v29 = vmul.f32 %v3143_v19, %v5667_v35  ;;  %v3126_v27 = vmul.f32 %v3124_v17, %v5666_v48 }
 0xc10   :  { %3147 = vrot.lane.b32.xlu0 %v3145_v29, %s3512_s23  ;;  %2597 = vrot.lane.b32.xlu1 %v2595_v37, %s3512_s23  ;;  %v2908_v7 = vpop.permute.xlu2 %2907 }
 0xc11   :  { %2952 = vrot.lane.b32.xlu2 %v2868_v59, %s3539_s6  ;;  %v2910_v60 = vsub.f32 %v2901_v0, %v2908_v7 }
 0xc15   :  { %v2886_v13 = vpop.permute.xlu0 %2885 }
 0xc18   :  { %2684 = vrot.lane.b32.xlu0 %v2637_v47, %s3504_s15  ;;  %3188 = vrot.lane.b32.xlu1 %v3117_v20, %s3536_s19 }
 0xc19   :  { %3168 = vrot.lane.b32.xlu2 %v3112_v50, %s3539_s6 }
 0xc1d   :  { %v3139_v23 = vpop.permute.xlu0 %3138 }
 0xc1e   :  { %v3141_v22 = vmul.f32 %v3139_v23, %v5665_v12 }
 0xc20   :  { %2932 = vrot.lane.b32.xlu0 %v2864_v6, %s3506_s17  ;;  %3205 = vrot.lane.b32.xlu1 %v3121_v44, %s3504_s15  ;;  %v2888_v6 = vmul.f32 %v2886_v13, %v5664_v38  ;;  %v3152_v44 = vpop.permute.xlu2 %3151 }
 0xc21   :  { %v3154_v34 = vmul.f32 %v3152_v44, %v5667_v35 }
 0xc25   :  { %v2660_v24 = vpop.permute.xlu0 %2659 }
 0xc28   :  { %2957 = vrot.lane.b32.xlu0 %v2910_v60, %s3536_s19 }
 0xc30   :  { %2607 = vrot.lane.b32.xlu0 %v2605_v36, %s3509_s20 }
 0xc5a   :  { %v3161_v10 = vpop.permute.xlu2 %3160 }
 0xc5b   :  { %v3163_v40 = vsub.f32 %v3154_v34, %v3161_v10 }
 0xc62   :  { %v2622_v37 = vpop.permute.xlu1 %2621  ;;  %v2680_v1 = vpop.permute.xlu2 %2679 }
 0xc63   :  { %v2624_v46 = vsub.f32 %v2615_v51, %v2622_v37  ;;  %v2682_v54 = vmul.f32 %v2680_v1, %v5198_v15 }
 0xc65   :  { %2664 = vrot.lane.b32.xlu1 %v2624_v46, %s3513_s24 }
 0xc6a   :  { %v2895_v59 = vpop.permute.xlu0 %2894  ;;  %v2881_v45 = vpop.permute.xlu1 %2880 }
 0xc6b   :  { %v2897_v50 = vsub.f32 %v2888_v6, %v2895_v59  ;;  %v2883_v5 = vsub.f32 %v2873_v30, %v2881_v45  ;;  %v2953_v29 = vpop.permute.xlu2 %2952 }
 0xc6c   :  { %v2955_v62 = vmul.f32 %v2953_v29, %v5198_v15 }
 0xc6d   :  { %2937 = vrot.lane.b32.xlu1 %v2897_v50, %s3512_s23  ;;  %2920 = vrot.lane.b32.xlu2 %v2883_v5, %s3504_s15 }
 0xc72   :  { %v3134_v20 = vpop.permute.xlu1 %3133 }
 0xc73   :  { %v3136_v9 = vsub.f32 %v3126_v27, %v3134_v20 }
 0xc75   :  { %2655 = vrot.lane.b32.xlu1 %v4915_v21, %s3509_s20  ;;  %3173 = vrot.lane.b32.xlu0 %v3136_v9, %s3516_s27 }
 0xc7a   :  { %v2916_v19 = vpop.permute.xlu1 %2915 }
 0xc7b   :  { %v2918_v36 = vmul.f32 %v2916_v19, %v5198_v15 }
 0xc7d   :  { %2728 = vrot.lane.b32.xlu0 %v2726_v57, %s3505_s16 }
 0xc82   :  { %v3148_v39 = vpop.permute.xlu0 %3147  ;;  %v2598_v7 = vpop.permute.xlu1 %2597 }
 0xc83   :  { %v3150_v3 = vsub.f32 %v3141_v22, %v3148_v39  ;;  %v2600_v0 = vmul.f32 %v2598_v7, %v4915_v21  ;;  %v2662_v21 = vmul.f32 %v2660_v24, %v5198_v15 }
 0xc85   :  { %3193 = vrot.lane.b32.xlu2 %v3150_v3, %s3506_s17  ;;  %2675 = vrot.lane.b32.xlu0 %v5668_v55, %s3510_s21 }
 0xc8a   :  { %v2685_v32 = vpop.permute.xlu0 %2684  ;;  %v3189_v49 = vpop.permute.xlu1 %3188 }
 0xc8b   :  { %v2687_v25 = vmul.f32 %v2685_v32, %v5202_v33  ;;  %v3191_v30 = vmul.f32 %v3189_v49, %v5198_v15 }
 0xc8d   :  { %v2688_v18 = vsub.f32 %v2682_v54, %v2687_v25  ;;  %3210 = vrot.lane.b32.xlu2 %v3163_v40, %s3523_s7  ;;  %v5672_v54 = vld [vmem:[#allocation3_spill] sm:$0xff] }
 0xc8f   :  { %2690 = vrot.lane.b32.xlu1 %v2688_v18, %s3505_s16 }
 0xc92   :  { %v2933_v12 = vpop.permute.xlu0 %2932  ;;  %v3206_v23 = vpop.permute.xlu1 %3205 }
 0xc93   :  { %v2935_v6 = vmul.f32 %v2933_v12, %v5198_v15  ;;  %v3208_v22 = vmul.f32 %v3206_v23, %v5198_v15 }
 0xc95   :  { %2911 = vrot.lane.b32.xlu2 %v5663_v2, %s3513_s24 }
 0xc97   :  { %2639 = vrot.lane.b32.xlu1 %v5217_v28, %s3506_s17  ;;  %v3169_v28 = vpop.permute.xlu2 %3168 }
 0xc98   :  { %v3171_v27 = vmul.f32 %v3169_v28, %v5198_v15 }
 0xc9a   :  { %v2958_v4 = vpop.permute.xlu0 %2957 }
 0xc9b   :  { %v2960_v47 = vmul.f32 %v2958_v4, %v5202_v33 }
 0xc9d   :  { %v2961_v11 = vsub.f32 %v2955_v62, %v2960_v47  ;;  %2948 = vrot.lane.b32.xlu2 %v5664_v38, %s3509_s20 }
 0xc9f   :  { %2963 = vrot.lane.b32.xlu0 %v2961_v11, %s3505_s16 }
 0xca2   :  { %v2608_v60 = vpop.permute.xlu0 %2607 }
 0xca3   :  { %v2610_v2 = vsub.f32 %v2600_v0, %v2608_v60 }
 0xca5   :  { %2644 = vrot.lane.b32.xlu2 %v2610_v2, %s3512_s23 }
 0xca7   :  { %3164 = vrot.lane.b32.xlu0 %v5667_v35, %s3539_s6 }
 0xcc7   :  { %v2921_v55 = vpop.permute.xlu2 %2920 }
 0xcc8   :  { %v2923_v13 = vmul.f32 %v2921_v55, %v5202_v33 }
 0xcca   :  { %v2924_v38 = vsub.f32 %v2918_v36, %v2923_v13 }
 0xccc   :  { %2926 = vrot.lane.b32.xlu0 %v2924_v38, %s3505_s16 }
 0xcd7   :  { %v2665_v17 = vpop.permute.xlu1 %2664 }
 0xcd8   :  { %v2667_v51 = vmul.f32 %v2665_v17, %v5202_v33 }
 0xcda   :  { %v2668_v37 = vsub.f32 %v2662_v21, %v2667_v51 }
 0xcdc   :  { %2670 = vrot.lane.b32.xlu2 %v2668_v37, %s3505_s16 }
 0xcdf   :  { %v3194_v35 = vpop.permute.xlu2 %3193  ;;  %v2938_v46 = vpop.permute.xlu1 %2937 }
 0xce0   :  { %v3196_v59 = vmul.f32 %v3194_v35, %v5202_v33  ;;  %v2940_v45 = vmul.f32 %v2938_v46, %v5202_v33  ;;  %v2931_v35 = vmul.f32 %v4927_v31, %v5672_v54 }
 0xce2   :  { %v3197_v50 = vsub.f32 %v3191_v30, %v3196_v59  ;;  %v2941_v5 = vsub.f32 %v2935_v6, %v2940_v45 }
 0xce4   :  { %3199 = vrot.lane.b32.xlu0 %v3197_v50, %s3505_s16  ;;  %3184 = vrot.lane.b32.xlu2 %v5666_v48, %s3536_s19 }
 0xce5   :  { %2943 = vrot.lane.b32.xlu1 %v2941_v5, %s3505_s16 }
 0xce7   :  { %v3174_v24 = vpop.permute.xlu0 %3173  ;;  %v3211_v9 = vpop.permute.xlu2 %3210 }
 0xce8   :  { %v3176_v20 = vmul.f32 %v3174_v24, %v5202_v33  ;;  %v3213_v57 = vmul.f32 %v3211_v9, %v5202_v33  ;;  %v2656_v1 = vpop.permute.xlu1 %2655 }
 0xce9   :  { %v2658_v49 = vmul.f32 %v2656_v1, %v5672_v54 }
 0xcea   :  { %v3177_v44 = vsub.f32 %v3171_v27, %v3176_v20  ;;  %v3214_v39 = vsub.f32 %v3208_v22, %v3213_v57  ;;  %v5673_v27 = vld [vmem:[#allocation21_spill] sm:$0xff] }
 0xceb   :  { %v3204_v31 = vmul.f32 %v5673_v27, %v5672_v54 }
 0xced   :  { %3179 = vrot.lane.b32.xlu1 %v3177_v44, %s3505_s16 }
 0xcef   :  { %v2729_v48 = vpop.permute.xlu0 %2728  ;;  %v2912_v3 = vpop.permute.xlu2 %2911 }
 0xcf0   :  { %v2731_v10 = vmul.f32 %v2729_v48, %v2725_v16  ;;  %v2914_v36 = vmul.f32 %v2912_v3, %v5672_v54 }
 0xcf2   :  { %2998 = vrot.lane.b32.xlu0 %v2731_v10, %s3514_s25  ;;  %2733 = vrot.lane.b32.xlu2 %v2731_v10, %s5671_s1 }
 0xcf5   :  { %3216 = vrot.lane.b32.xlu1 %v3214_v39, %s3505_s16 }
 0xcf7   :  { %v2949_v34 = vpop.permute.xlu2 %2948  ;;  %v2676_v32 = vpop.permute.xlu0 %2675 }
 0xcf8   :  { %v2678_v25 = vmul.f32 %v2676_v32, %v5672_v54  ;;  %v2951_v7 = vmul.f32 %v2949_v34, %v5672_v54 }
 0xcfd   :  { %3251 = vrot.lane.b32.xlu1 %v2731_v10, %s3523_s7 }
 0xcff   :  { %v2645_v19 = vpop.permute.xlu2 %2644 }
 0xd00   :  { %v2647_v4 = vmul.f32 %v2645_v19, %v5202_v33  ;;  %v2147_v19 = vmul.f32 %v5294_v41, %v5234_v61 }
 0xd01   :  { %v2691_v40 = vpop.permute.xlu1 %2690 }
 0xd02   :  { %v2693_v18 = vmul.f32 %v2691_v40, %v5336_v56 }
 0xd04   :  { %v2694_v12 = vadd.f32 %v2693_v18, %v2678_v25 }
 0xd06   :  { %2716 = vrot.lane.b32.xlu0 %v2694_v12, %s3505_s16 }
 0xd09   :  { %v2640_v29 = vpop.permute.xlu1 %2639 }
 0xd0a   :  { %v2642_v62 = vmul.f32 %v2640_v29, %v5198_v15 }
 0xd0c   :  { %v2648_v47 = vsub.f32 %v2642_v62, %v2647_v4 }
 0xd0e   :  { %2650 = vrot.lane.b32.xlu1 %v2648_v47, %s3505_s16 }
 0xd11   :  { %v2964_v11 = vpop.permute.xlu0 %2963 }
 0xd12   :  { %v2966_v0 = vmul.f32 %v2964_v11, %v5336_v56 }
 0xd14   :  { %v2967_v60 = vadd.f32 %v2966_v0, %v2951_v7 }
 0xd16   :  { %2989 = vrot.lane.b32.xlu0 %v2967_v60, %s3505_s16 }
 0xd19   :  { %v3165_v2 = vpop.permute.xlu0 %3164 }
 0xd1a   :  { %v3167_v45 = vmul.f32 %v3165_v2, %v5672_v54 }
 0xd36   :  { %v2671_v28 = vpop.permute.xlu2 %2670 }
 0xd37   :  { %v2673_v55 = vmul.f32 %v2671_v28, %v5336_v56 }
 0xd39   :  { %v2674_v33 = vadd.f32 %v2673_v55, %v2658_v49  ;;  %v5674_v49 = vld [vmem:[#allocation2_spill] sm:$0xff] }
 0xd3b   :  { %2706 = vrot.lane.b32.xlu2 %v2674_v33, %s3505_s16 }
 0xd3e   :  { %v2927_v15 = vpop.permute.xlu0 %2926  ;;  %v3185_v23 = vpop.permute.xlu2 %3184 }
 0xd3f   :  { %v2929_v13 = vmul.f32 %v2927_v15, %v5336_v56  ;;  %v3187_v21 = vmul.f32 %v3185_v23, %v5672_v54  ;;  %v5675_v15 = vld [vmem:[#allocation4_spill] sm:$0xff] }
 0xd41   :  { %v2930_v38 = vadd.f32 %v2929_v13, %v2914_v36 }
 0xd43   :  { %2969 = vrot.lane.b32.xlu1 %v2930_v38, %s3505_s16  ;;  %v5676_v38 = vld [vmem:[#allocation9_spill] sm:$0xff] }
 0xd4c   :  { %v2734_v9 = vpop.permute.xlu2 %2733 }
 0xd4d   :  { %v2736_v57 = vmul.f32 %v2734_v9, %v5379_v14  ;;  %v2638_v14 = vmul.f32 %v5662_v42, %v5672_v54 }
 0xd56   :  { %v3200_v17 = vpop.permute.xlu0 %3199 }
 0xd57   :  { %v3202_v51 = vmul.f32 %v3200_v17, %v5336_v56  ;;  %v2944_v37 = vpop.permute.xlu1 %2943 }
 0xd58   :  { %v2946_v46 = vmul.f32 %v2944_v37, %v5336_v56 }
 0xd59   :  { %v3203_v30 = vadd.f32 %v3202_v51, %v3187_v21  ;;  %v5677_v51 = vld [vmem:[#allocation22_spill] sm:$0xff] }
 0xd5a   :  { %v2947_v6 = vadd.f32 %v2946_v46, %v2931_v35  ;;  %v5678_v35 = vld [vmem:[#allocation8_spill] sm:$0xff] }
 0xd5b   :  { %3232 = vrot.lane.b32.xlu0 %v3203_v30, %s3505_s16 }
 0xd5c   :  { %2979 = vrot.lane.b32.xlu2 %v2947_v6, %s3505_s16  ;;  %v5679_v6 = vld [vmem:[#allocation10_spill] sm:$0xff] }
 0xd5f   :  { %v3180_v59 = vpop.permute.xlu1 %3179 }
 0xd60   :  { %v3182_v50 = vmul.f32 %v3180_v59, %v5336_v56 }
 0xd62   :  { %v3183_v5 = vadd.f32 %v3182_v50, %v3167_v45  ;;  %v5680_v45 = vld [vmem:[#allocation11_spill] sm:$0xff] }
 0xd64   :  { %3222 = vrot.lane.b32.xlu2 %v3183_v5, %s3505_s16  ;;  %v2999_v16 = vpop.permute.xlu0 %2998 }
 0xd65   :  { %v3001_v48 = vmul.f32 %v2999_v16, %v2736_v57 }
 0xd67   :  { %v3217_v24 = vpop.permute.xlu1 %3216 }
 0xd68   :  { %v3219_v20 = vmul.f32 %v3217_v24, %v5336_v56 }
 0xd6a   :  { %v3220_v44 = vadd.f32 %v3219_v20, %v3204_v31 }
 0xd6c   :  { %3242 = vrot.lane.b32.xlu1 %v3220_v44, %s3505_s16 }
 0xd6f   :  { %v3252_v10 = vpop.permute.xlu1 %3251 }
 0xd70   :  { %v3254_v22 = vmul.f32 %v3252_v10, %v3001_v48  ;;  %v5681_v48 = vld [vmem:[#allocation20_spill] sm:$0xff] }
 0xd72   :  { %3495 = vlog2.f32 %v3254_v22 }
 0xd73   :  { %3497 = vlog2.f32 %v5228_v63  ;;  %v3259_v63 = vperm.slane %v5255_v43, 0  ;;  %v3502_v43 = vld [vmem:[%s5522_s0] sm:$0xff]  ;;  %s5683_s0 = smov 12  }
 0xd74   :  { %v2143_v22 = vadd.f32 %v3502_v43, %v5292_v58  ;;  %v2128_v58 = vadd.f32 %v3502_v43, %v5288_v26 }
 0xd78   :  { %v2717_v39 = vpop.permute.xlu0 %2716  ;;  %v3496_v47 = vpop.eup %3495 }
 0xd79   :  { %v2719_v3 = vmul.f32 %v2717_v39, %v4712_v52  ;;  %v3256_v41 = vmul.f32 0.6931472, %v3496_v47  ;;  %v3498_v30 = vpop.eup %3497 }
 0xd7b   :  { %2721 = vrot.lane.b32.xlu0 %v2719_v3, %s3539_s6  ;;  %v3257_v7 = vadd.f32 8.947821, %v3256_v41 }
 0xd7d   :  { %v3258_v0 = vadd.f32 1.837877, %v3257_v7 }
 0xd80   :  { %v2651_v32 = vpop.permute.xlu1 %2650 }
 0xd81   :  { %v2653_v40 = vmul.f32 %v2651_v32, %v5336_v56 }
 0xd83   :  { %v2654_v25 = vadd.f32 %v2653_v40, %v2638_v14  ;;  %v5682_v40 = vld [vmem:[#allocation19_spill] sm:$0xff] }
 0xd88   :  { %v2990_v1 = vpop.permute.xlu0 %2989 }
 0xd89   :  { %v2992_v34 = vmul.f32 %v2990_v1, %v4712_v52 }
 0xd8b   :  { %2994 = vrot.lane.b32.xlu0 %v2992_v34, %s3536_s19 }
 0xd93   :  { %2696 = vrot.lane.b32.xlu0 %v2654_v25, %s3505_s16 }
 0xd95   :  { %v2707_v18 = vpop.permute.xlu2 %2706 }
 0xd96   :  { %v2709_v12 = vmul.f32 %v2707_v18, %v4712_v52  ;;  %v2134_v18 = vadd.f32 %v5290_v53, %v2128_v58 }
 0xd98   :  { %2711 = vrot.lane.b32.xlu2 %v2709_v12, %s3536_s19 }
 0xd9b   :  { %2149 = vrot.lane.b32.xlu0 %v2147_v19, %s3524_s8 }
 0xdb5   :  { %v2970_v29 = vpop.permute.xlu1 %2969 }
 0xdb6   :  { %v2980_v4 = vpop.permute.xlu2 %2979  ;;  %v2972_v56 = vmul.f32 %v2970_v29, %v4712_v52 }
 0xdb7   :  { %v2982_v62 = vmul.f32 %v2980_v4, %v4712_v52 }
 0xdb8   :  { %2974 = vrot.lane.b32.xlu1 %v2972_v56, %s3512_s23 }
 0xdb9   :  { %2984 = vrot.lane.b32.xlu2 %v2982_v62, %s3504_s15 }
 0xdbe   :  { %v3223_v42 = vpop.permute.xlu2 %3222 }
 0xdbf   :  { %v3225_v54 = vmul.f32 %v3223_v42, %v4712_v52 }
 0xdc1   :  { %3227 = vrot.lane.b32.xlu1 %v3225_v54, %s3513_s24 }
 0xdcd   :  { %v3233_v61 = vpop.permute.xlu0 %3232 }
 0xdce   :  { %v3235_v11 = vmul.f32 %v3233_v61, %v4712_v52 }
 0xdd0   :  { %3237 = vrot.lane.b32.xlu2 %v3235_v11, %s3512_s23 }
 0xdd8   :  { %3262 = vrot.lane.b32.xlu2 %v3258_v0, %s3539_s6 }
 0xdde   :  { %v3243_v60 = vpop.permute.xlu1 %3242 }
 0xddf   :  { %v3245_v2 = vmul.f32 %v3243_v60, %v4712_v52 }
 0xde1   :  { %3247 = vrot.lane.b32.xlu1 %v3245_v2, %s3504_s15 }
 0xded   :  { %v2722_v28 = vpop.permute.xlu0 %2721 }
 0xdee   :  { %v2724_v55 = vadd.f32 %v2722_v28, %v5674_v49 }
 0xdf0   :  { %3330 = vrot.lane.b32.xlu2 %v2724_v55, %s3533_s22 }
 0xdf2   :  { %v2712_v33 = vpop.permute.xlu2 %2711 }
 0xdf3   :  { %v2714_v36 = vadd.f32 %v2712_v33, %v5675_v15 }
 0xdf5   :  { %3326 = vrot.lane.b32.xlu1 %v2714_v36, %s3533_s22 }
 0xdfd   :  { %v2995_v13 = vpop.permute.xlu0 %2994 }
 0xdfe   :  { %v2997_v23 = vadd.f32 %v2995_v13, %v5676_v38 }
 0xe00   :  { %3342 = vrot.lane.b32.xlu2 %v2997_v23, %s3509_s20 }
 0xe05   :  { %v2697_v17 = vpop.permute.xlu0 %2696 }
 0xe06   :  { %v2699_v21 = vmul.f32 %v2697_v17, %v4712_v52  ;;  %v1518_v52 = vmul.f32 0.6931472, %v3498_v30 }
 0xe08   :  { %2701 = vrot.lane.b32.xlu2 %v2699_v21, %s3504_s15  ;;  %v1519_v59 = vsub.f32 0.0, %v1518_v52 }
 0xe0a   :  { %v3383_v50 = vadd.f32 -8.947821, %v1519_v59 }
 0xe0d   :  { %v2150_v10 = vpop.permute.xlu0 %2149 }
 0xe0e   :  { %v2152_v39 = vadd.f32 %v2150_v10, %v2143_v22 }
 0xe10   :  { %3267 = vrot.lane.b32.xlu2 %v5677_v51, %s3504_s15 }
 0xe13   :  { %v2985_v37 = vpop.permute.xlu2 %2984 }
 0xe14   :  { %v2987_v46 = vadd.f32 %v2985_v37, %v5678_v35 }
 0xe16   :  { %3338 = vrot.lane.b32.xlu1 %v2987_v46, %s3509_s20 }
 0xe18   :  { %3279 = vrot.lane.b32.xlu2 %v5258_v8, %s3506_s17  ;;  %v3384_v8 = vadd.f32 -1.837877, %v3383_v50 }
 0xe1a   :  { %v3260_v20 = vadd.f32 %v3384_v8, %v3259_v63 }
 0xe20   :  { %3290 = vrot.lane.b32.xlu2 %v5679_v6, %s3506_s17 }
 0xe28   :  { %3299 = vrot.lane.b32.xlu2 %v5680_v45, %s3514_s25 }
 0xe2a   :  { %v3238_v5 = vpop.permute.xlu2 %3237  ;;  %v2975_v24 = vpop.permute.xlu1 %2974 }
 0xe2b   :  { %v3240_v27 = vadd.f32 %v3238_v5, %v5675_v15  ;;  %v2977_v31 = vadd.f32 %v2975_v24, %v5680_v45 }
 0xe2d   :  { %3350 = vrot.lane.b32.xlu1 %v3240_v27, %s3512_s23  ;;  %3334 = vrot.lane.b32.xlu0 %v2977_v31, %s3509_s20 }
 0xe32   :  { %v3263_v9 = vpop.permute.xlu2 %3262 }
 0xe33   :  { %v3265_v44 = vadd.f32 %v3263_v9, %v3260_v20  ;;  %v3228_v16 = vpop.permute.xlu1 %3227 }
 0xe34   :  { %v3230_v57 = vadd.f32 %v3228_v16, %v5679_v6 }
 0xe35   :  { %3358 = vrot.lane.b32.xlu1 %v3265_v44, %s3521_s5 }
 0xe36   :  { %3346 = vrot.lane.b32.xlu0 %v3230_v57, %s3512_s23 }
 0xe3d   :  { %3275 = vrot.lane.b32.xlu1 %v5681_v48, %s3504_s15 }
 0xe45   :  { %3287 = vrot.lane.b32.xlu1 %v2152_v39, %s3506_s17 }
 0xe4a   :  { %v3331_v3 = vpop.permute.xlu2 %3330 }
 0xe4d   :  { %3296 = vrot.lane.b32.xlu1 %v5674_v49, %s3506_s17 }
 0xe53   :  { %v3248_v1 = vpop.permute.xlu1 %3247 }
 0xe54   :  { %v3250_v34 = vadd.f32 %v3248_v1, %v5674_v49 }
 0xe55   :  { %3305 = vrot.lane.b32.xlu1 %v5676_v38, %s3514_s25 }
 0xe56   :  { %3354 = vrot.lane.b32.xlu0 %v3250_v34, %s3512_s23 }
 0xe5a   :  { %v3343_v32 = vpop.permute.xlu2 %3342 }
 0xe5e   :  { %3271 = vrot.lane.b32.xlu0 %v5682_v40, %s3504_s15 }
 0xe62   :  { %v2702_v14 = vpop.permute.xlu2 %2701 }
 0xe63   :  { %v2704_v25 = vadd.f32 %v2702_v14, %v5679_v6 }
 0xe65   :  { %3309 = vrot.lane.b32.xlu2 %v2704_v25, %s5683_s0 }
 0xe66   :  { %3283 = vrot.lane.b32.xlu0 %v2134_v18, %s3506_s17 }
 0xe67   :  { %v3327_v12 = vpop.permute.xlu1 %3326 }
 0xe68   :  { %v3361_v19 = vsel %vm1584_vm6, %v3327_v12, %v3331_v3  ;;  %vm5685_vm6 = vcmask 72704  }
 0xe69   :  { %vm5687_vm15 = vmmov %vm5685_vm6 }
 0xe6a   :  { %v3268_v60 = vpop.permute.xlu2 %3267 }
 0xe6b   :  { %v3312_v33 = vsel %vm1588_vm1, %v3502_v43, %v3268_v60 }
 0xe6e   :  { %3293 = vrot.lane.b32.xlu0 %v5675_v15, %s3506_s17 }
 0xe72   :  { %v3280_v49 = vpop.permute.xlu2 %3279 }
 0xe76   :  { %3302 = vrot.lane.b32.xlu0 %v5678_v35, %s3514_s25 }
 0xe7a   :  { %v3291_v17 = vpop.permute.xlu2 %3290 }
 0xe82   :  { %v3300_v6 = vpop.permute.xlu2 %3299 }
 0xe88   :  { %v3339_v26 = vpop.permute.xlu1 %3338 }
 0xe9f   :  { %v3335_v29 = vpop.permute.xlu0 %3334  ;;  %v3351_v62 = vpop.permute.xlu1 %3350 }
 0xea0   :  { %v3362_v4 = vsel %vm1586_vm3, %v3361_v19, %v3335_v29  ;;  %vm5686_vm3 = vmmov %vm5684_vm13 }
 0xea1   :  { %v3363_v56 = vsel %vm1588_vm1, %v3362_v4, %v3339_v26  ;;  %vm5690_vm1 = vcmask 97280  }
 0xea2   :  { %v3364_v53 = vsel %vm1590_vm7, %v3363_v56, %v3343_v32 }
 0xea7   :  { %v3359_v41 = vpop.permute.xlu1 %3358 }
 0xea8   :  { %v3347_v42 = vpop.permute.xlu0 %3346 }
 0xea9   :  { %v3365_v54 = vsel %vm1592_vm8, %v3364_v53, %v3347_v42 }
 0xeaa   :  { %v3366_v61 = vsel %vm1594_vm4, %v3365_v54, %v3351_v62 }
 0xeaf   :  { %v3276_v28 = vpop.permute.xlu1 %3275 }
 0xeb7   :  { %v3288_v36 = vpop.permute.xlu1 %3287 }
 0xebf   :  { %v3297_v37 = vpop.permute.xlu1 %3296  ;;  %v3310_v24 = vpop.permute.xlu2 %3309 }
 0xec7   :  { %v3306_v50 = vpop.permute.xlu1 %3305 }
 0xec8   :  { %v3355_v47 = vpop.permute.xlu0 %3354 }
 0xec9   :  { %v3367_v11 = vsel %vm1596_vm9, %v3366_v61, %v3355_v47 }
 0xeca   :  { %v3368_v7 = vsel %vm5684_vm13, %v3367_v11, %v3359_v41 }
 0xecb   :  { %v3369_v0 = vsel %vm5685_vm6, %v3368_v7, 0.0 }
 0xecc   :  { %3371 = vrot.lane.b32.xlu0 %v3369_v0, %s3543_s9 }
 0xed0   :  { %v3272_v2 = vpop.permute.xlu0 %3271 }
 0xed1   :  { %v3313_v15 = vsel %vm1590_vm7, %v3312_v33, %v3272_v2  ;;  %vm5691_vm7 = vcmask 105472  }
 0xed2   :  { %v3314_v13 = vsel %vm1592_vm8, %v3313_v15, %v3276_v28  ;;  %vm5692_vm8 = vcmask 113664  }
 0xed3   :  { %v3315_v38 = vsel %vm1594_vm4, %v3314_v13, %v3280_v49  ;;  %vm5693_vm4 = vcmask 121856  }
 0xed8   :  { %v3284_v55 = vpop.permute.xlu0 %3283 }
 0xed9   :  { %v3316_v23 = vsel %vm1596_vm9, %v3315_v38, %v3284_v55  ;;  %vm5694_vm9 = vcmask 130048  }
 0xeda   :  { %v3317_v51 = vsel %vm5686_vm3, %v3316_v23, %v3288_v36 }
 0xedb   :  { %v3318_v35 = vsel %vm5687_vm15, %v3317_v51, %v3291_v17 }
 0xee0   :  { %v3294_v21 = vpop.permute.xlu0 %3293 }
 0xee1   :  { %v3319_v46 = vsel %vm5688_vm0, %v3318_v35, %v3294_v21 }
 0xee2   :  { %v3320_v30 = vsel %vm5689_vm10, %v3319_v46, %v3297_v37 }
 0xee3   :  { %v3321_v59 = vsel %vm5690_vm1, %v3320_v30, %v3300_v6 }
 0xee8   :  { %v3303_v52 = vpop.permute.xlu0 %3302 }
 0xee9   :  { %v3322_v45 = vsel %vm5691_vm7, %v3321_v59, %v3303_v52 }
 0xeea   :  { %v3323_v5 = vsel %vm5692_vm8, %v3322_v45, %v3306_v50 }
 0xeeb   :  { %v3324_v31 = vsel %vm5693_vm4, %v3323_v5, %v3310_v24 }
 0xf3e   :  { %v3372_v27 = vpop.permute.xlu0 %3371 }
 0xf3f   :  { %v3374_v63 = vsel %vm5694_vm9, %v3324_v31, %v3372_v27 }
 0xf40   :  { %3375 = vst [vmem:[%s5525_s3] sm:$0xff] %v3374_v63 }

</bundles_post_ra>
